<compile_context>
chip_gen: v5e
topology: v5e:2x2
jax: 0.10.0
libtpu: 0.0.40
codegen_flags: <defaults>
</compile_context>

<pallas_src>
import functools

import jax
import jax.numpy as jnp
from jax import lax
from jax.experimental import pallas as pl
from jax.experimental.pallas import tpu as pltpu

_SQRT2 = 1.4142135623730951
_MXU_MIN_CONTRACT = 32   # switch channel matmuls to the MXU at/above this contraction width


def _gelu(x):
    # exact (erf-based) GELU, matching torch.nn.GELU() default
    return 0.5 * x * (1.0 + lax.erf(x / _SQRT2))


# ---------------------------------------------------------------------------
# Feature probe: stride-0 ("broadcast") vector loads.  When available, the row
# broadcast rides the vld slot instead of costing a VALU broadcast per term.
# Any failure (construction, lowering, or wrong numerics) -> fall back to the
# previously-verified (1, N) slice + implicit broadcast.
# ---------------------------------------------------------------------------
def _probe_bcast_load():
    try:
        def _k(x_ref, o_ref):
            o_ref[...] = x_ref[pl.ds(7, 8, stride=0), :]

        x = jnp.arange(8 * 128, dtype=jnp.float32).reshape(8, 128)
        out = jax.block_until_ready(
            pl.pallas_call(_k, out_shape=jax.ShapeDtypeStruct((8, 128), jnp.float32))(x))
        return bool(jnp.all(out == x[7:8, :]))
    except Exception:  # feature probe: any failure means "use fallback path"
        return False


_HAS_BCAST_LOAD = _probe_bcast_load()


def _row_bcast(ref, i, nrows):
    """Row `i` of a (R, N) ref broadcast over `nrows` sublanes (load-side if possible)."""
    if _HAS_BCAST_LOAD and nrows <= ref.shape[0]:
        return ref[pl.ds(i, nrows, stride=0), :]       # broadcast happens in the vld
    return ref[i:i + 1, :]                             # (1, N): implicit broadcast later


def _mm_ref(w_ref, x_ref, out_ch):
    """(Cout, Cin) @ (Cin, N) channel mix with N (spatial) on lanes.

    Small channel counts -> unrolled VPU FMAs (an MXU dot would use <2% of the
    array); at production widths -> MXU dot on the otherwise-idle vext slot,
    which frees VALU for the GELU polynomial.
    """
    in_ch = w_ref.shape[1]
    if in_ch >= _MXU_MIN_CONTRACT and in_ch % 8 == 0 and out_ch % 8 == 0:
        return jnp.dot(w_ref[...], x_ref[...], preferred_element_type=jnp.float32)
    w = w_ref[...]
    acc = jnp.zeros((out_ch, x_ref.shape[-1]), jnp.float32)
    for i in range(in_ch):
        # x-row broadcast from a stride-0 load when supported; the tiny (Cout, 1)
        # weight-column lane broadcast stays on the VPU (removed entirely on the
        # MXU path at production widths).
        acc = acc + w[:, i:i + 1] * _row_bcast(x_ref, i, out_ch)
    return acc


def _mm_val(w, x, out_ch):
    """Same as _mm_ref but for an in-register x (second stage of the fused head)."""
    in_ch = w.shape[1]
    if in_ch >= _MXU_MIN_CONTRACT and in_ch % 8 == 0 and out_ch % 8 == 0:
        return jnp.dot(w, x, preferred_element_type=jnp.float32)
    acc = jnp.zeros((out_ch, x.shape[-1]), jnp.float32)
    for i in range(in_ch):
        acc = acc + w[:, i:i + 1] * x[i:i + 1, :]
    return acc


def _spatial_split(n_sp, target=8192):
    """Split a flattened spatial axis into lane-aligned parallel chunks.

    Small slabs stay as one block (fewer ~0.35us grid steps, better for 1-TC
    chips); large slabs get >=2 lane-aligned chunks so both v7x TensorCores stay
    busy and input DMA overlaps compute.  Returns (n_chunks, chunk).
    """
    if n_sp % 256 != 0 or n_sp <= target:
        return 1, n_sp
    lanes = n_sp // 128
    n_chunks = max(2, n_sp // target)
    while lanes % n_chunks != 0:
        n_chunks -= 1
    return n_chunks, n_sp // n_chunks


# ---------------------------------------------------------------------------
# fc0 lift fused with the spatial zero-padding:
#   (B, nx, ny, 1) -> (B, width, nx+p, ny+p) with zeros in the pad strip.
# ---------------------------------------------------------------------------
def _fc0_pad_kernel(x_ref, w_ref, b_ref, o_ref):
    # x: (nx, ny); w, b: (width, 1); o: (width, nx_pad, ny_pad)
    nx, ny = x_ref.shape
    vals = w_ref[...][:, :, None] * x_ref[...][None, :, :] + b_ref[...][:, :, None]
    o_ref[...] = jnp.zeros(o_ref.shape, o_ref.dtype)      # zero the pad strip
    o_ref[:, :nx, :ny] = vals.astype(o_ref.dtype)


def fc0_lift_pad(x, w0, b0, padding):
    """x: (B, nx, ny, 1) -> padded, channel-major (B, width, nx+p, ny+p)."""
    b, nx, ny, _ = x.shape
    width = w0.shape[0]
    nxp, nyp = nx + padding, ny + padding
    x3 = x.reshape(b, nx, ny)
    return pl.pallas_call(
        _fc0_pad_kernel,
        out_shape=jax.ShapeDtypeStruct((b, width, nxp, nyp), jnp.float32),
        grid=(b,),
        in_specs=[
            pl.BlockSpec((None, nx, ny), lambda i: (i, 0, 0)),
            pl.BlockSpec((width, 1), lambda i: (0, 0)),
            pl.BlockSpec((width, 1), lambda i: (0, 0)),
        ],
        out_specs=pl.BlockSpec((None, width, nxp, nyp), lambda i: (i, 0, 0, 0)),
        compiler_params=pltpu.CompilerParams(dimension_semantics=("parallel",)),
    )(x3, w0, b0)


# ---------------------------------------------------------------------------
# Per-layer fused kernel:  out = gelu( conv1x1(h) + bias + spectral_residual )
# ---------------------------------------------------------------------------
def _conv_res_gelu_kernel(x_ref, w_ref, b_ref, r_ref, o_ref):
    # x, r: (C, N) with N = spatial chunk on lanes; w: (Cout, Cin); b: (Cout, 1)
    acc = r_ref[...] + b_ref[...]
    acc = acc + _mm_ref(w_ref, x_ref, o_ref.shape[0])
    o_ref[...] = _gelu(acc).astype(o_ref.dtype)


def conv_residual_gelu(h, x1, w, bias):
    """h, x1: (B, C, Hp, Wp); w: (Cout, Cin); bias: (Cout, 1)."""
    b, c, hh, ww = h.shape
    cout = w.shape[0]
    n_sp = hh * ww
    n_chunks, chunk = _spatial_split(n_sp)
    cost = pl.CostEstimate(
        flops=int(b * n_sp * (2 * c * cout + 4 * cout)),
        transcendentals=int(b * n_sp * cout),
        bytes_accessed=int(4 * (b * n_sp * (c + 2 * cout) + cout * (c + 1))))
    out = pl.pallas_call(
        _conv_res_gelu_kernel,
        out_shape=jax.ShapeDtypeStruct((b, cout, n_sp), jnp.float32),
        grid=(b, n_chunks),
        in_specs=[
            pl.BlockSpec((None, c, chunk), lambda i, j: (i, 0, j)),
            pl.BlockSpec((cout, c), lambda i, j: (0, 0)),
            pl.BlockSpec((cout, 1), lambda i, j: (0, 0)),
            pl.BlockSpec((None, cout, chunk), lambda i, j: (i, 0, j)),
        ],
        out_specs=pl.BlockSpec((None, cout, chunk), lambda i, j: (i, 0, j)),
        compiler_params=pltpu.CompilerParams(
            dimension_semantics=("parallel", "parallel")),
        cost_estimate=cost,
    )(h.reshape(b, c, n_sp), w, bias, x1.reshape(b, cout, n_sp))
    return out.reshape(b, cout, hh, ww)


# ---------------------------------------------------------------------------
# Spectral complex mode mixing:  out[o, n] = sum_i x[i, n] * w[i, o, n]
# (n = flattened [top | bottom] corner modes, 2*modes1*modes2 wide, on lanes)
# ---------------------------------------------------------------------------
def _spectral_mix_kernel(xr_ref, xi_ref, wr_ref, wi_ref, or_ref, oi_ref):
    # xr/xi: (I, M); wr/wi: (I, O, M); out: (O, M) with M = 2*modes1*modes2 on lanes
    out_ch = or_ref.shape[0]
    in_ch = wr_ref.shape[0]
    acc_r = jnp.zeros(or_ref.shape, jnp.float32)
    acc_i = jnp.zeros(oi_ref.shape, jnp.float32)
    for i in range(in_ch):
        xr_i = _row_bcast(xr_ref, i, out_ch)
        xi_i = _row_bcast(xi_ref, i, out_ch)
        wr_i = wr_ref[i]                       # (O, M)
        wi_i = wi_ref[i]
        acc_r = acc_r + xr_i * wr_i - xi_i * wi_i
        acc_i = acc_i + xr_i * wi_i + xi_i * wr_i
    or_ref[...] = acc_r
    oi_ref[...] = acc_i


def spectral_conv2d(h, wr, wi, modes1, modes2):
    """h: (B, C, Hp, Wp) f32; wr/wi: (I, O, 2*modes1*modes2) f32 (pre-packed [top|bottom])."""
    b, in_ch, hh, ww = h.shape
    out_ch = wr.shape[1]
    wf = ww // 2 + 1
    mm = 2 * modes1 * modes2

    # TODO(synk): rfft2 / irfft2 have no Pallas primitive; they run as XLA FFT ops.
    x_ft = jnp.fft.rfft2(h, axes=(-2, -1))                           # (B, C, Hp, Wf) c64
    corners = jnp.concatenate(
        [x_ft[:, :, :modes1, :modes2], x_ft[:, :, hh - modes1:, :modes2]],
        axis=2).reshape(b, in_ch, mm)
    xr = jnp.real(corners).astype(jnp.float32)
    xi = jnp.imag(corners).astype(jnp.float32)

    cost = pl.CostEstimate(
        flops=int(8 * b * in_ch * out_ch * mm),
        transcendentals=0,
        bytes_accessed=int(4 * (2 * b * mm * (in_ch + out_ch) + 2 * in_ch * out_ch * mm)))
    block_bytes = 4 * (2 * in_ch * out_ch * mm + 2 * in_ch * mm + 2 * out_ch * mm)
    # TODO(synk): at production widths/modes on v7x (64 MiB VMEM) additionally tile
    # the (I, O, 2m) weight slab over out_ch and mark it pipeline_mode=pl.Buffered(1).
    vmem_limit = int(min(max(4 * block_bytes, 32 * 2 ** 20), 64 * 2 ** 20))

    out_r, out_i = pl.pallas_call(
        _spectral_mix_kernel,
        out_shape=(jax.ShapeDtypeStruct((b, out_ch, mm), jnp.float32),
                   jax.ShapeDtypeStruct((b, out_ch, mm), jnp.float32)),
        grid=(b,),
        in_specs=[
            pl.BlockSpec((None, in_ch, mm), lambda i: (i, 0, 0)),
            pl.BlockSpec((None, in_ch, mm), lambda i: (i, 0, 0)),
            pl.BlockSpec((in_ch, out_ch, mm), lambda i: (0, 0, 0)),
            pl.BlockSpec((in_ch, out_ch, mm), lambda i: (0, 0, 0)),
        ],
        out_specs=(
            pl.BlockSpec((None, out_ch, mm), lambda i: (i, 0, 0)),
            pl.BlockSpec((None, out_ch, mm), lambda i: (i, 0, 0)),
        ),
        compiler_params=pltpu.CompilerParams(
            dimension_semantics=("parallel",), vmem_limit_bytes=vmem_limit),
        cost_estimate=cost,
    )(xr, xi, wr, wi)

    # Re-assemble the full complex spectrum (required as the irfft2 input anyway).
    oc = lax.complex(out_r, out_i).reshape(b, out_ch, 2, modes1, modes2)
    out_ft = jnp.zeros((b, out_ch, hh, wf), jnp.complex64)
    out_ft = out_ft.at[:, :, :modes1, :modes2].set(oc[:, :, 0])
    out_ft = out_ft.at[:, :, hh - modes1:, :modes2].set(oc[:, :, 1])
    return jnp.fft.irfft2(out_ft, s=(hh, ww), axes=(-2, -1)).astype(jnp.float32)


# ---------------------------------------------------------------------------
# Fused projection head:  fc2( gelu( fc1(h) ) )   in one kernel.
# ---------------------------------------------------------------------------
def _fc_head_kernel(x_ref, w1_ref, b1_ref, w2_ref, b2_ref, o_ref):
    # x: (width, N); w1: (last, width); w2: (n_out, last)
    hmid = _gelu(_mm_ref(w1_ref, x_ref, w1_ref.shape[0]) + b1_ref[...])
    o_ref[...] = (_mm_val(w2_ref[...], hmid, w2_ref.shape[0])
                  + b2_ref[...]).astype(o_ref.dtype)


def fc_head(h, w1, b1, w2, b2):
    """h: (B, width, Hp, Wp) -> (B, n_out, Hp, Wp) channel-major (fc1+GELU+fc2 fused)."""
    b, width, hh, ww = h.shape
    last = w1.shape[0]
    n_out = w2.shape[0]
    n_sp = hh * ww
    n_chunks, chunk = _spatial_split(n_sp)
    cost = pl.CostEstimate(
        flops=int(b * n_sp * (2 * width * last + 2 * last * n_out + 4 * last + n_out)),
        transcendentals=int(b * n_sp * last),
        bytes_accessed=int(4 * (b * n_sp * (width + n_out)
                                + last * (width + 1) + n_out * (last + 1))))
    out = pl.pallas_call(
        _fc_head_kernel,
        out_shape=jax.ShapeDtypeStruct((b, n_out, n_sp), jnp.float32),
        grid=(b, n_chunks),
        in_specs=[
            pl.BlockSpec((None, width, chunk), lambda i, j: (i, 0, j)),
            pl.BlockSpec((last, width), lambda i, j: (0, 0)),
            pl.BlockSpec((last, 1), lambda i, j: (0, 0)),
            pl.BlockSpec((n_out, last), lambda i, j: (0, 0)),
            pl.BlockSpec((n_out, 1), lambda i, j: (0, 0)),
        ],
        out_specs=pl.BlockSpec((None, n_out, chunk), lambda i, j: (i, 0, j)),
        compiler_params=pltpu.CompilerParams(
            dimension_semantics=("parallel", "parallel")),
        cost_estimate=cost,
    )(h.reshape(b, width, n_sp), w1, b1, w2, b2)
    return out.reshape(b, n_out, hh, ww)


# ---------------------------------------------------------------------------
# FNO2d forward
# ---------------------------------------------------------------------------
def fno2d_forward(x, params, modes1, modes2, padding=9):
    """x: (B, X, Y, 1) float32 -> (B, X, Y, n_out) float32."""
    b, nx, ny, _ = x.shape

    # fc0 lift fused with the zero-padding (F.pad(x, [0,p,0,p]) in NCHW).
    h = fc0_lift_pad(x, params["fc0_w"], params["fc0_b"], padding)   # (B, W, nx+p, ny+p)

    for layer in params["layers"]:
        x1 = spectral_conv2d(h, layer["wr"], layer["wi"], modes1, modes2)
        h = conv_residual_gelu(h, x1, layer["conv_w"], layer["conv_b"])

    # Projection head on the padded slab; crop the (smaller) n_out-channel output.
    out = fc_head(h, params["fc1_w"], params["fc1_b"],
                  params["fc2_w"], params["fc2_b"])                  # (B, n_out, nx+p, ny+p)
    out = out[:, :, :nx, :ny]
    return jnp.transpose(out, (0, 2, 3, 1))


# ---------------------------------------------------------------------------
# Deterministic parameter construction (shapes follow FNO2d.__init__), with the
# spectral weights stored pre-split (real/imag) and pre-packed lane-dense as
# (in, out, 2*modes1*modes2) = [top-block | bottom-block]  (one-time preprocessing).
# ---------------------------------------------------------------------------
def init_params(key, modes1, modes2, width, n_out, layer_num, last_size):
    keys = jax.random.split(key, 6 + 6 * layer_num)
    kit = iter(keys)

    def uni(k, shape, lim):
        return jax.random.uniform(k, shape, jnp.float32, -lim, lim)

    m = modes1 * modes2
    params = {
        # fc0: torch Linear(1, width) -> weight (width, 1), bias (width,)
        "fc0_w": uni(next(kit), (width, 1), 1.0),
        "fc0_b": uni(next(kit), (width, 1), 1.0),
        # fc1 / fc2 stored (out, in) + bias (out, 1) for the channel-major kernels
        "fc1_w": uni(next(kit), (last_size, width), 1.0 / width ** 0.5),
        "fc1_b": uni(next(kit), (last_size, 1), 1.0 / width ** 0.5),
        "fc2_w": uni(next(kit), (n_out, last_size), 1.0 / last_size ** 0.5),
        "fc2_b": uni(next(kit), (n_out, 1), 1.0 / last_size ** 0.5),
        "layers": [],
    }
    scale = 1.0 / (width * width)
    for _ in range(layer_num):
        # each corner's weight is (in, out, modes1*modes2) row-major over (m1, m2)
        w1r = jax.random.uniform(next(kit), (width, width, m), jnp.float32)
        w1i = jax.random.uniform(next(kit), (width, width, m), jnp.float32)
        w2r = jax.random.uniform(next(kit), (width, width, m), jnp.float32)
        w2i = jax.random.uniform(next(kit), (width, width, m), jnp.float32)
        conv_w = uni(next(kit), (width, width), 1.0 / width ** 0.5)   # (out, in)
        conv_b = uni(next(kit), (width, 1), 1.0 / width ** 0.5)
        params["layers"].append({
            "wr": scale * jnp.concatenate([w1r, w2r], axis=-1),   # (I, O, 2*m)
            "wi": scale * jnp.concatenate([w1i, w2i], axis=-1),
            "conv_w": conv_w,
            "conv_b": conv_b,
        })
    return params


if __name__ == "__main__":
    # Small synthetic configuration
    MODES1, MODES2 = 6, 6
    WIDTH = 8
    N_OUT = 4
    LAYER_NUM = 2
    LAST_SIZE = 32
    BATCH, NX, NY = 2, 16, 16

    key = jax.random.PRNGKey(0)
    k_param, k_x = jax.random.split(key)
    params = init_params(k_param, MODES1, MODES2, WIDTH, N_OUT, LAYER_NUM, LAST_SIZE)
    x = jax.random.normal(k_x, (BATCH, NX, NY, 1), jnp.float32)

    fwd = jax.jit(
        functools.partial(fno2d_forward, modes1=MODES1, modes2=MODES2, padding=9)
    )
    out = jax.block_until_ready(fwd(x, params))
    assert out.shape == (BATCH, NX, NY, N_OUT), out.shape
    assert bool(jnp.all(jnp.isfinite(out)))
    print("KERNEL_OK")
</pallas_src>

<mosaic_0001>
module attributes {stable_mosaic.version = 11 : i64} {
  func.func @_k(%arg0: memref<8x128xf32, #tpu.memory_space<vmem>>, %arg1: memref<8x128xf32, #tpu.memory_space<vmem>>) attributes {dimension_semantics = [], scalar_prefetch = 0 : i64, scratch_operands = 0 : i64, tpu.core_type = #tpu.core_type<tc>} {
    %c7 = arith.constant 7 : index
    %c0 = arith.constant 0 : index
    %0 = tpu.strided_load %arg0[%c7, %c0] {strides = array<i32: 0, 1>} : memref<8x128xf32, #tpu.memory_space<vmem>>, vector<8x128xf32>
    %c0_0 = arith.constant 0 : index
    %c0_1 = arith.constant 0 : index
    %1 = vector.load %arg1[%c0_0, %c0_1] : memref<8x128xf32, #tpu.memory_space<vmem>>, vector<8x128xf32>
    tpu.vector_store %arg1[%c0_0, %c0_1], %0 {strides = array<i32>} : memref<8x128xf32, #tpu.memory_space<vmem>>, vector<8x128xf32>,
    return
  }
}

module attributes {stable_mosaic.version = 11 : i64} {
  func.func @_fc0_pad_kernel(%arg0: i32, %arg1: memref<1x16x16xf32, #tpu.memory_space<vmem>>, %arg2: memref<8x1xf32, #tpu.memory_space<vmem>>, %arg3: memref<8x1xf32, #tpu.memory_space<vmem>>, %arg4: memref<1x8x25x25xf32, #tpu.memory_space<vmem>>) attributes {dimension_semantics = [#tpu.dimension_semantics<parallel>], iteration_bounds = array<i64: 2>, scalar_prefetch = 0 : i64, scratch_operands = 0 : i64, tpu.core_type = #tpu.core_type<tc>, window_params = [{transform_indices = @transform_0, window_bounds = array<i64: 1, 16, 16>}, {pipeline_mode = #tpu.pipeline_mode<synchronous>, transform_indices = @transform_1, window_bounds = array<i64: 8, 1>}, {pipeline_mode = #tpu.pipeline_mode<synchronous>, transform_indices = @transform_2, window_bounds = array<i64: 8, 1>}, {transform_indices = @transform_3, window_bounds = array<i64: 1, 8, 25, 25>}]} {
    %c0 = arith.constant 0 : index
    %c0_0 = arith.constant 0 : index
    %0 = vector.load %arg2[%c0, %c0_0] : memref<8x1xf32, #tpu.memory_space<vmem>>, vector<8x1xf32>
    %1 = vector.shape_cast %0 : vector<8x1xf32> to vector<8x1x1xf32>
    %c0_1 = arith.constant 0 : index
    %c0_2 = arith.constant 0 : index
    %c0_3 = arith.constant 0 : index
    %2 = vector.load %arg1[%c0_1, %c0_2, %c0_3] : memref<1x16x16xf32, #tpu.memory_space<vmem>>, vector<1x16x16xf32>
    %3 = vector.shape_cast %2 : vector<1x16x16xf32> to vector<16x16xf32>
    %4 = vector.shape_cast %3 : vector<16x16xf32> to vector<1x16x16xf32>
    %5 = vector.broadcast %1 : vector<8x1x1xf32> to vector<8x16x16xf32>
    %6 = vector.broadcast %4 : vector<1x16x16xf32> to vector<8x16x16xf32>
    %7 = arith.mulf %5, %6 : vector<8x16x16xf32>
    %c0_4 = arith.constant 0 : index
    %c0_5 = arith.constant 0 : index
    %8 = vector.load %arg3[%c0_4, %c0_5] : memref<8x1xf32, #tpu.memory_space<vmem>>, vector<8x1xf32>
    %9 = vector.shape_cast %8 : vector<8x1xf32> to vector<8x1x1xf32>
    %10 = vector.broadcast %9 : vector<8x1x1xf32> to vector<8x16x16xf32>
    %11 = arith.addf %7, %10 : vector<8x16x16xf32>
    %cst = arith.constant 0.000000e+00 : f32
    %12 = vector.broadcast %cst : f32 to vector<8x25x25xf32>
    %c0_6 = arith.constant 0 : index
    %c0_7 = arith.constant 0 : index
    %c0_8 = arith.constant 0 : index
    %c0_9 = arith.constant 0 : index
    %13 = vector.load %arg4[%c0_6, %c0_7, %c0_8, %c0_9] : memref<1x8x25x25xf32, #tpu.memory_space<vmem>>, vector<1x8x25x25xf32>
    %14 = vector.shape_cast %13 : vector<1x8x25x25xf32> to vector<8x25x25xf32>
    %15 = vector.shape_cast %12 : vector<8x25x25xf32> to vector<1x8x25x25xf32>
    tpu.vector_store %arg4[%c0_6, %c0_7, %c0_8, %c0_9], %15 {strides = array<i32>} : memref<1x8x25x25xf32, #tpu.memory_space<vmem>>, vector<1x8x25x25xf32>,
    %c0_10 = arith.constant 0 : index
    %c0_11 = arith.constant 0 : index
    %c0_12 = arith.constant 0 : index
    %c0_13 = arith.constant 0 : index
    %16 = vector.load %arg4[%c0_10, %c0_11, %c0_12, %c0_13] : memref<1x8x25x25xf32, #tpu.memory_space<vmem>>, vector<1x8x16x16xf32>
    %17 = vector.shape_cast %16 : vector<1x8x16x16xf32> to vector<8x16x16xf32>
    %18 = vector.shape_cast %11 : vector<8x16x16xf32> to vector<1x8x16x16xf32>
    tpu.vector_store %arg4[%c0_10, %c0_11, %c0_12, %c0_13], %18 {strides = array<i32>} : memref<1x8x25x25xf32, #tpu.memory_space<vmem>>, vector<1x8x16x16xf32>,
    return
  }
  func.func @transform_0(%arg0: i32) -> (i32, i32, i32) {
    %c0_i32 = arith.constant 0 : i32
    %c0_i32_0 = arith.constant 0 : i32
    %c0_i32_1 = arith.constant 0 : i32
    return %arg0, %c0_i32, %c0_i32_0 : i32, i32, i32
  }
  func.func @transform_1(%arg0: i32) -> (i32, i32) {
    %c0_i32 = arith.constant 0 : i32
    %c0_i32_0 = arith.constant 0 : i32
    %c0_i32_1 = arith.constant 0 : i32
    return %c0_i32, %c0_i32_0 : i32, i32
  }
  func.func @transform_2(%arg0: i32) -> (i32, i32) {
    %c0_i32 = arith.constant 0 : i32
    %c0_i32_0 = arith.constant 0 : i32
    %c0_i32_1 = arith.constant 0 : i32
    return %c0_i32, %c0_i32_0 : i32, i32
  }
  func.func @transform_3(%arg0: i32) -> (i32, i32, i32, i32) {
    %c0_i32 = arith.constant 0 : i32
    %c0_i32_0 = arith.constant 0 : i32
    %c0_i32_1 = arith.constant 0 : i32
    %c0_i32_2 = arith.constant 0 : i32
    return %arg0, %c0_i32, %c0_i32_0, %c0_i32_1 : i32, i32, i32, i32
  }
}

module attributes {stable_mosaic.version = 11 : i64} {
  func.func @_spectral_mix_kernel(%arg0: i32, %arg1: memref<1x8x72xf32, #tpu.memory_space<vmem>>, %arg2: memref<1x8x72xf32, #tpu.memory_space<vmem>>, %arg3: memref<8x8x72xf32, #tpu.memory_space<vmem>>, %arg4: memref<8x8x72xf32, #tpu.memory_space<vmem>>, %arg5: memref<1x8x72xf32, #tpu.memory_space<vmem>>, %arg6: memref<1x8x72xf32, #tpu.memory_space<vmem>>) attributes {dimension_semantics = [#tpu.dimension_semantics<parallel>], iteration_bounds = array<i64: 2>, scalar_prefetch = 0 : i64, scratch_operands = 0 : i64, tpu.core_type = #tpu.core_type<tc>, window_params = [{transform_indices = @transform_0, window_bounds = array<i64: 1, 8, 72>}, {transform_indices = @transform_1, window_bounds = array<i64: 1, 8, 72>}, {pipeline_mode = #tpu.pipeline_mode<synchronous>, transform_indices = @transform_2, window_bounds = array<i64: 8, 8, 72>}, {pipeline_mode = #tpu.pipeline_mode<synchronous>, transform_indices = @transform_3, window_bounds = array<i64: 8, 8, 72>}, {transform_indices = @transform_4, window_bounds = array<i64: 1, 8, 72>}, {transform_indices = @transform_5, window_bounds = array<i64: 1, 8, 72>}]} {
    %cst = arith.constant 0.000000e+00 : f32
    %0 = vector.broadcast %cst : f32 to vector<8x72xf32>
    %cst_0 = arith.constant 0.000000e+00 : f32
    %1 = vector.broadcast %cst_0 : f32 to vector<8x72xf32>
    %c0 = arith.constant 0 : index
    %c0_1 = arith.constant 0 : index
    %c0_2 = arith.constant 0 : index
    %2 = vector.load %arg1[%c0, %c0_1, %c0_2] : memref<1x8x72xf32, #tpu.memory_space<vmem>>, vector<1x1x72xf32>
    %3 = vector.shape_cast %2 : vector<1x1x72xf32> to vector<1x72xf32>
    %c0_3 = arith.constant 0 : index
    %c0_4 = arith.constant 0 : index
    %c0_5 = arith.constant 0 : index
    %4 = vector.load %arg2[%c0_3, %c0_4, %c0_5] : memref<1x8x72xf32, #tpu.memory_space<vmem>>, vector<1x1x72xf32>
    %5 = vector.shape_cast %4 : vector<1x1x72xf32> to vector<1x72xf32>
    %c0_6 = arith.constant 0 : index
    %c0_7 = arith.constant 0 : index
    %c0_8 = arith.constant 0 : index
    %6 = vector.load %arg3[%c0_6, %c0_7, %c0_8] : memref<8x8x72xf32, #tpu.memory_space<vmem>>, vector<1x8x72xf32>
    %7 = vector.shape_cast %6 : vector<1x8x72xf32> to vector<8x72xf32>
    %c0_9 = arith.constant 0 : index
    %c0_10 = arith.constant 0 : index
    %c0_11 = arith.constant 0 : index
    %8 = vector.load %arg4[%c0_9, %c0_10, %c0_11] : memref<8x8x72xf32, #tpu.memory_space<vmem>>, vector<1x8x72xf32>
    %9 = vector.shape_cast %8 : vector<1x8x72xf32> to vector<8x72xf32>
    %10 = vector.broadcast %3 : vector<1x72xf32> to vector<8x72xf32>
    %11 = arith.mulf %10, %7 : vector<8x72xf32>
    %12 = arith.addf %0, %11 : vector<8x72xf32>
    %13 = vector.broadcast %5 : vector<1x72xf32> to vector<8x72xf32>
    %14 = arith.mulf %13, %9 : vector<8x72xf32>
    %15 = arith.subf %12, %14 : vector<8x72xf32>
    %16 = vector.broadcast %3 : vector<1x72xf32> to vector<8x72xf32>
    %17 = arith.mulf %16, %9 : vector<8x72xf32>
    %18 = arith.addf %1, %17 : vector<8x72xf32>
    %19 = vector.broadcast %5 : vector<1x72xf32> to vector<8x72xf32>
    %20 = arith.mulf %19, %7 : vector<8x72xf32>
    %21 = arith.addf %18, %20 : vector<8x72xf32>
    %c0_12 = arith.constant 0 : index
    %c1 = arith.constant 1 : index
    %c0_13 = arith.constant 0 : index
    %22 = vector.load %arg1[%c0_12, %c1, %c0_13] : memref<1x8x72xf32, #tpu.memory_space<vmem>>, vector<1x1x72xf32>
    %23 = vector.shape_cast %22 : vector<1x1x72xf32> to vector<1x72xf32>
    %c0_14 = arith.constant 0 : index
    %c1_15 = arith.constant 1 : index
    %c0_16 = arith.constant 0 : index
    %24 = vector.load %arg2[%c0_14, %c1_15, %c0_16] : memref<1x8x72xf32, #tpu.memory_space<vmem>>, vector<1x1x72xf32>
    %25 = vector.shape_cast %24 : vector<1x1x72xf32> to vector<1x72xf32>
    %c1_17 = arith.constant 1 : index
    %c0_18 = arith.constant 0 : index
    %c0_19 = arith.constant 0 : index
    %26 = vector.load %arg3[%c1_17, %c0_18, %c0_19] : memref<8x8x72xf32, #tpu.memory_space<vmem>>, vector<1x8x72xf32>
    %27 = vector.shape_cast %26 : vector<1x8x72xf32> to vector<8x72xf32>
    %c1_20 = arith.constant 1 : index
    %c0_21 = arith.constant 0 : index
    %c0_22 = arith.constant 0 : index
    %28 = vector.load %arg4[%c1_20, %c0_21, %c0_22] : memref<8x8x72xf32, #tpu.memory_space<vmem>>, vector<1x8x72xf32>
    %29 = vector.shape_cast %28 : vector<1x8x72xf32> to vector<8x72xf32>
    %30 = vector.broadcast %23 : vector<1x72xf32> to vector<8x72xf32>
    %31 = arith.mulf %30, %27 : vector<8x72xf32>
    %32 = arith.addf %15, %31 : vector<8x72xf32>
    %33 = vector.broadcast %25 : vector<1x72xf32> to vector<8x72xf32>
    %34 = arith.mulf %33, %29 : vector<8x72xf32>
    %35 = arith.subf %32, %34 : vector<8x72xf32>
    %36 = vector.broadcast %23 : vector<1x72xf32> to vector<8x72xf32>
    %37 = arith.mulf %36, %29 : vector<8x72xf32>
    %38 = arith.addf %21, %37 : vector<8x72xf32>
    %39 = vector.broadcast %25 : vector<1x72xf32> to vector<8x72xf32>
    %40 = arith.mulf %39, %27 : vector<8x72xf32>
    %41 = arith.addf %38, %40 : vector<8x72xf32>
    %c0_23 = arith.constant 0 : index
    %c2 = arith.constant 2 : index
    %c0_24 = arith.constant 0 : index
    %42 = vector.load %arg1[%c0_23, %c2, %c0_24] : memref<1x8x72xf32, #tpu.memory_space<vmem>>, vector<1x1x72xf32>
    %43 = vector.shape_cast %42 : vector<1x1x72xf32> to vector<1x72xf32>
    %c0_25 = arith.constant 0 : index
    %c2_26 = arith.constant 2 : index
    %c0_27 = arith.constant 0 : index
    %44 = vector.load %arg2[%c0_25, %c2_26, %c0_27] : memref<1x8x72xf32, #tpu.memory_space<vmem>>, vector<1x1x72xf32>
    %45 = vector.shape_cast %44 : vector<1x1x72xf32> to vector<1x72xf32>
    %c2_28 = arith.constant 2 : index
    %c0_29 = arith.constant 0 : index
    %c0_30 = arith.constant 0 : index
    %46 = vector.load %arg3[%c2_28, %c0_29, %c0_30] : memref<8x8x72xf32, #tpu.memory_space<vmem>>, vector<1x8x72xf32>
    %47 = vector.shape_cast %46 : vector<1x8x72xf32> to vector<8x72xf32>
    %c2_31 = arith.constant 2 : index
    %c0_32 = arith.constant 0 : index
    %c0_33 = arith.constant 0 : index
    %48 = vector.load %arg4[%c2_31, %c0_32, %c0_33] : memref<8x8x72xf32, #tpu.memory_space<vmem>>, vector<1x8x72xf32>
    %49 = vector.shape_cast %48 : vector<1x8x72xf32> to vector<8x72xf32>
    %50 = vector.broadcast %43 : vector<1x72xf32> to vector<8x72xf32>
    %51 = arith.mulf %50, %47 : vector<8x72xf32>
    %52 = arith.addf %35, %51 : vector<8x72xf32>
    %53 = vector.broadcast %45 : vector<1x72xf32> to vector<8x72xf32>
    %54 = arith.mulf %53, %49 : vector<8x72xf32>
    %55 = arith.subf %52, %54 : vector<8x72xf32>
    %56 = vector.broadcast %43 : vector<1x72xf32> to vector<8x72xf32>
    %57 = arith.mulf %56, %49 : vector<8x72xf32>
    %58 = arith.addf %41, %57 : vector<8x72xf32>
    %59 = vector.broadcast %45 : vector<1x72xf32> to vector<8x72xf32>
    %60 = arith.mulf %59, %47 : vector<8x72xf32>
    %61 = arith.addf %58, %60 : vector<8x72xf32>
    %c0_34 = arith.constant 0 : index
    %c3 = arith.constant 3 : index
    %c0_35 = arith.constant 0 : index
    %62 = vector.load %arg1[%c0_34, %c3, %c0_35] : memref<1x8x72xf32, #tpu.memory_space<vmem>>, vector<1x1x72xf32>
    %63 = vector.shape_cast %62 : vector<1x1x72xf32> to vector<1x72xf32>
    %c0_36 = arith.constant 0 : index
    %c3_37 = arith.constant 3 : index
    %c0_38 = arith.constant 0 : index
    %64 = vector.load %arg2[%c0_36, %c3_37, %c0_38] : memref<1x8x72xf32, #tpu.memory_space<vmem>>, vector<1x1x72xf32>
    %65 = vector.shape_cast %64 : vector<1x1x72xf32> to vector<1x72xf32>
    %c3_39 = arith.constant 3 : index
    %c0_40 = arith.constant 0 : index
    %c0_41 = arith.constant 0 : index
    %66 = vector.load %arg3[%c3_39, %c0_40, %c0_41] : memref<8x8x72xf32, #tpu.memory_space<vmem>>, vector<1x8x72xf32>
    %67 = vector.shape_cast %66 : vector<1x8x72xf32> to vector<8x72xf32>
    %c3_42 = arith.constant 3 : index
    %c0_43 = arith.constant 0 : index
    %c0_44 = arith.constant 0 : index
    %68 = vector.load %arg4[%c3_42, %c0_43, %c0_44] : memref<8x8x72xf32, #tpu.memory_space<vmem>>, vector<1x8x72xf32>
    %69 = vector.shape_cast %68 : vector<1x8x72xf32> to vector<8x72xf32>
    %70 = vector.broadcast %63 : vector<1x72xf32> to vector<8x72xf32>
    %71 = arith.mulf %70, %67 : vector<8x72xf32>
    %72 = arith.addf %55, %71 : vector<8x72xf32>
    %73 = vector.broadcast %65 : vector<1x72xf32> to vector<8x72xf32>
    %74 = arith.mulf %73, %69 : vector<8x72xf32>
    %75 = arith.subf %72, %74 : vector<8x72xf32>
    %76 = vector.broadcast %63 : vector<1x72xf32> to vector<8x72xf32>
    %77 = arith.mulf %76, %69 : vector<8x72xf32>
    %78 = arith.addf %61, %77 : vector<8x72xf32>
    %79 = vector.broadcast %65 : vector<1x72xf32> to vector<8x72xf32>
    %80 = arith.mulf %79, %67 : vector<8x72xf32>
    %81 = arith.addf %78, %80 : vector<8x72xf32>
    %c0_45 = arith.constant 0 : index
    %c4 = arith.constant 4 : index
    %c0_46 = arith.constant 0 : index
    %82 = vector.load %arg1[%c0_45, %c4, %c0_46] : memref<1x8x72xf32, #tpu.memory_space<vmem>>, vector<1x1x72xf32>
    %83 = vector.shape_cast %82 : vector<1x1x72xf32> to vector<1x72xf32>
    %c0_47 = arith.constant 0 : index
    %c4_48 = arith.constant 4 : index
    %c0_49 = arith.constant 0 : index
    %84 = vector.load %arg2[%c0_47, %c4_48, %c0_49] : memref<1x8x72xf32, #tpu.memory_space<vmem>>, vector<1x1x72xf32>
    %85 = vector.shape_cast %84 : vector<1x1x72xf32> to vector<1x72xf32>
    %c4_50 = arith.constant 4 : index
    %c0_51 = arith.constant 0 : index
    %c0_52 = arith.constant 0 : index
    %86 = vector.load %arg3[%c4_50, %c0_51, %c0_52] : memref<8x8x72xf32, #tpu.memory_space<vmem>>, vector<1x8x72xf32>
    %87 = vector.shape_cast %86 : vector<1x8x72xf32> to vector<8x72xf32>
    %c4_53 = arith.constant 4 : index
    %c0_54 = arith.constant 0 : index
    %c0_55 = arith.constant 0 : index
    %88 = vector.load %arg4[%c4_53, %c0_54, %c0_55] : memref<8x8x72xf32, #tpu.memory_space<vmem>>, vector<1x8x72xf32>
    %89 = vector.shape_cast %88 : vector<1x8x72xf32> to vector<8x72xf32>
    %90 = vector.broadcast %83 : vector<1x72xf32> to vector<8x72xf32>
    %91 = arith.mulf %90, %87 : vector<8x72xf32>
    %92 = arith.addf %75, %91 : vector<8x72xf32>
    %93 = vector.broadcast %85 : vector<1x72xf32> to vector<8x72xf32>
    %94 = arith.mulf %93, %89 : vector<8x72xf32>
    %95 = arith.subf %92, %94 : vector<8x72xf32>
    %96 = vector.broadcast %83 : vector<1x72xf32> to vector<8x72xf32>
    %97 = arith.mulf %96, %89 : vector<8x72xf32>
    %98 = arith.addf %81, %97 : vector<8x72xf32>
    %99 = vector.broadcast %85 : vector<1x72xf32> to vector<8x72xf32>
    %100 = arith.mulf %99, %87 : vector<8x72xf32>
    %101 = arith.addf %98, %100 : vector<8x72xf32>
    %c0_56 = arith.constant 0 : index
    %c5 = arith.constant 5 : index
    %c0_57 = arith.constant 0 : index
    %102 = vector.load %arg1[%c0_56, %c5, %c0_57] : memref<1x8x72xf32, #tpu.memory_space<vmem>>, vector<1x1x72xf32>
    %103 = vector.shape_cast %102 : vector<1x1x72xf32> to vector<1x72xf32>
    %c0_58 = arith.constant 0 : index
    %c5_59 = arith.constant 5 : index
    %c0_60 = arith.constant 0 : index
    %104 = vector.load %arg2[%c0_58, %c5_59, %c0_60] : memref<1x8x72xf32, #tpu.memory_space<vmem>>, vector<1x1x72xf32>
    %105 = vector.shape_cast %104 : vector<1x1x72xf32> to vector<1x72xf32>
    %c5_61 = arith.constant 5 : index
    %c0_62 = arith.constant 0 : index
    %c0_63 = arith.constant 0 : index
    %106 = vector.load %arg3[%c5_61, %c0_62, %c0_63] : memref<8x8x72xf32, #tpu.memory_space<vmem>>, vector<1x8x72xf32>
    %107 = vector.shape_cast %106 : vector<1x8x72xf32> to vector<8x72xf32>
    %c5_64 = arith.constant 5 : index
    %c0_65 = arith.constant 0 : index
    %c0_66 = arith.constant 0 : index
    %108 = vector.load %arg4[%c5_64, %c0_65, %c0_66] : memref<8x8x72xf32, #tpu.memory_space<vmem>>, vector<1x8x72xf32>
    %109 = vector.shape_cast %108 : vector<1x8x72xf32> to vector<8x72xf32>
    %110 = vector.broadcast %103 : vector<1x72xf32> to vector<8x72xf32>
    %111 = arith.mulf %110, %107 : vector<8x72xf32>
    %112 = arith.addf %95, %111 : vector<8x72xf32>
    %113 = vector.broadcast %105 : vector<1x72xf32> to vector<8x72xf32>
    %114 = arith.mulf %113, %109 : vector<8x72xf32>
    %115 = arith.subf %112, %114 : vector<8x72xf32>
    %116 = vector.broadcast %103 : vector<1x72xf32> to vector<8x72xf32>
    %117 = arith.mulf %116, %109 : vector<8x72xf32>
    %118 = arith.addf %101, %117 : vector<8x72xf32>
    %119 = vector.broadcast %105 : vector<1x72xf32> to vector<8x72xf32>
    %120 = arith.mulf %119, %107 : vector<8x72xf32>
    %121 = arith.addf %118, %120 : vector<8x72xf32>
    %c0_67 = arith.constant 0 : index
    %c6 = arith.constant 6 : index
    %c0_68 = arith.constant 0 : index
    %122 = vector.load %arg1[%c0_67, %c6, %c0_68] : memref<1x8x72xf32, #tpu.memory_space<vmem>>, vector<1x1x72xf32>
    %123 = vector.shape_cast %122 : vector<1x1x72xf32> to vector<1x72xf32>
    %c0_69 = arith.constant 0 : index
    %c6_70 = arith.constant 6 : index
    %c0_71 = arith.constant 0 : index
    %124 = vector.load %arg2[%c0_69, %c6_70, %c0_71] : memref<1x8x72xf32, #tpu.memory_space<vmem>>, vector<1x1x72xf32>
    %125 = vector.shape_cast %124 : vector<1x1x72xf32> to vector<1x72xf32>
    %c6_72 = arith.constant 6 : index
    %c0_73 = arith.constant 0 : index
    %c0_74 = arith.constant 0 : index
    %126 = vector.load %arg3[%c6_72, %c0_73, %c0_74] : memref<8x8x72xf32, #tpu.memory_space<vmem>>, vector<1x8x72xf32>
    %127 = vector.shape_cast %126 : vector<1x8x72xf32> to vector<8x72xf32>
    %c6_75 = arith.constant 6 : index
    %c0_76 = arith.constant 0 : index
    %c0_77 = arith.constant 0 : index
    %128 = vector.load %arg4[%c6_75, %c0_76, %c0_77] : memref<8x8x72xf32, #tpu.memory_space<vmem>>, vector<1x8x72xf32>
    %129 = vector.shape_cast %128 : vector<1x8x72xf32> to vector<8x72xf32>
    %130 = vector.broadcast %123 : vector<1x72xf32> to vector<8x72xf32>
    %131 = arith.mulf %130, %127 : vector<8x72xf32>
    %132 = arith.addf %115, %131 : vector<8x72xf32>
    %133 = vector.broadcast %125 : vector<1x72xf32> to vector<8x72xf32>
    %134 = arith.mulf %133, %129 : vector<8x72xf32>
    %135 = arith.subf %132, %134 : vector<8x72xf32>
    %136 = vector.broadcast %123 : vector<1x72xf32> to vector<8x72xf32>
    %137 = arith.mulf %136, %129 : vector<8x72xf32>
    %138 = arith.addf %121, %137 : vector<8x72xf32>
    %139 = vector.broadcast %125 : vector<1x72xf32> to vector<8x72xf32>
    %140 = arith.mulf %139, %127 : vector<8x72xf32>
    %141 = arith.addf %138, %140 : vector<8x72xf32>
    %c0_78 = arith.constant 0 : index
    %c7 = arith.constant 7 : index
    %c0_79 = arith.constant 0 : index
    %142 = vector.load %arg1[%c0_78, %c7, %c0_79] : memref<1x8x72xf32, #tpu.memory_space<vmem>>, vector<1x1x72xf32>
    %143 = vector.shape_cast %142 : vector<1x1x72xf32> to vector<1x72xf32>
    %c0_80 = arith.constant 0 : index
    %c7_81 = arith.constant 7 : index
    %c0_82 = arith.constant 0 : index
    %144 = vector.load %arg2[%c0_80, %c7_81, %c0_82] : memref<1x8x72xf32, #tpu.memory_space<vmem>>, vector<1x1x72xf32>
    %145 = vector.shape_cast %144 : vector<1x1x72xf32> to vector<1x72xf32>
    %c7_83 = arith.constant 7 : index
    %c0_84 = arith.constant 0 : index
    %c0_85 = arith.constant 0 : index
    %146 = vector.load %arg3[%c7_83, %c0_84, %c0_85] : memref<8x8x72xf32, #tpu.memory_space<vmem>>, vector<1x8x72xf32>
    %147 = vector.shape_cast %146 : vector<1x8x72xf32> to vector<8x72xf32>
    %c7_86 = arith.constant 7 : index
    %c0_87 = arith.constant 0 : index
    %c0_88 = arith.constant 0 : index
    %148 = vector.load %arg4[%c7_86, %c0_87, %c0_88] : memref<8x8x72xf32, #tpu.memory_space<vmem>>, vector<1x8x72xf32>
    %149 = vector.shape_cast %148 : vector<1x8x72xf32> to vector<8x72xf32>
    %150 = vector.broadcast %143 : vector<1x72xf32> to vector<8x72xf32>
    %151 = arith.mulf %150, %147 : vector<8x72xf32>
    %152 = arith.addf %135, %151 : vector<8x72xf32>
    %153 = vector.broadcast %145 : vector<1x72xf32> to vector<8x72xf32>
    %154 = arith.mulf %153, %149 : vector<8x72xf32>
    %155 = arith.subf %152, %154 : vector<8x72xf32>
    %156 = vector.broadcast %143 : vector<1x72xf32> to vector<8x72xf32>
    %157 = arith.mulf %156, %149 : vector<8x72xf32>
    %158 = arith.addf %141, %157 : vector<8x72xf32>
    %159 = vector.broadcast %145 : vector<1x72xf32> to vector<8x72xf32>
    %160 = arith.mulf %159, %147 : vector<8x72xf32>
    %161 = arith.addf %158, %160 : vector<8x72xf32>
    %c0_89 = arith.constant 0 : index
    %c0_90 = arith.constant 0 : index
    %c0_91 = arith.constant 0 : index
    %162 = vector.load %arg5[%c0_89, %c0_90, %c0_91] : memref<1x8x72xf32, #tpu.memory_space<vmem>>, vector<1x8x72xf32>
    %163 = vector.shape_cast %162 : vector<1x8x72xf32> to vector<8x72xf32>
    %164 = vector.shape_cast %155 : vector<8x72xf32> to vector<1x8x72xf32>
    tpu.vector_store %arg5[%c0_89, %c0_90, %c0_91], %164 {strides = array<i32>} : memref<1x8x72xf32, #tpu.memory_space<vmem>>, vector<1x8x72xf32>,
    %c0_92 = arith.constant 0 : index
    %c0_93 = arith.constant 0 : index
    %c0_94 = arith.constant 0 : index
    %165 = vector.load %arg6[%c0_92, %c0_93, %c0_94] : memref<1x8x72xf32, #tpu.memory_space<vmem>>, vector<1x8x72xf32>
    %166 = vector.shape_cast %165 : vector<1x8x72xf32> to vector<8x72xf32>
    %167 = vector.shape_cast %161 : vector<8x72xf32> to vector<1x8x72xf32>
    tpu.vector_store %arg6[%c0_92, %c0_93, %c0_94], %167 {strides = array<i32>} : memref<1x8x72xf32, #tpu.memory_space<vmem>>, vector<1x8x72xf32>,
    return
  }
  func.func @transform_0(%arg0: i32) -> (i32, i32, i32) {
    %c0_i32 = arith.constant 0 : i32
    %c0_i32_0 = arith.constant 0 : i32
    %c0_i32_1 = arith.constant 0 : i32
    return %arg0, %c0_i32, %c0_i32_0 : i32, i32, i32
  }
  func.func @transform_1(%arg0: i32) -> (i32, i32, i32) {
    %c0_i32 = arith.constant 0 : i32
    %c0_i32_0 = arith.constant 0 : i32
    %c0_i32_1 = arith.constant 0 : i32
    return %arg0, %c0_i32, %c0_i32_0 : i32, i32, i32
  }
  func.func @transform_2(%arg0: i32) -> (i32, i32, i32) {
    %c0_i32 = arith.constant 0 : i32
    %c0_i32_0 = arith.constant 0 : i32
    %c0_i32_1 = arith.constant 0 : i32
    %c0_i32_2 = arith.constant 0 : i32
    return %c0_i32, %c0_i32_0, %c0_i32_1 : i32, i32, i32
  }
  func.func @transform_3(%arg0: i32) -> (i32, i32, i32) {
    %c0_i32 = arith.constant 0 : i32
    %c0_i32_0 = arith.constant 0 : i32
    %c0_i32_1 = arith.constant 0 : i32
    %c0_i32_2 = arith.constant 0 : i32
    return %c0_i32, %c0_i32_0, %c0_i32_1 : i32, i32, i32
  }
  func.func @transform_4(%arg0: i32) -> (i32, i32, i32) {
    %c0_i32 = arith.constant 0 : i32
    %c0_i32_0 = arith.constant 0 : i32
    %c0_i32_1 = arith.constant 0 : i32
    return %arg0, %c0_i32, %c0_i32_0 : i32, i32, i32
  }
  func.func @transform_5(%arg0: i32) -> (i32, i32, i32) {
    %c0_i32 = arith.constant 0 : i32
    %c0_i32_0 = arith.constant 0 : i32
    %c0_i32_1 = arith.constant 0 : i32
    return %arg0, %c0_i32, %c0_i32_0 : i32, i32, i32
  }
}

module attributes {stable_mosaic.version = 11 : i64} {
  func.func @_conv_res_gelu_kernel(%arg0: i32, %arg1: i32, %arg2: memref<1x8x625xf32, #tpu.memory_space<vmem>>, %arg3: memref<8x8xf32, #tpu.memory_space<vmem>>, %arg4: memref<8x1xf32, #tpu.memory_space<vmem>>, %arg5: memref<1x8x625xf32, #tpu.memory_space<vmem>>, %arg6: memref<1x8x625xf32, #tpu.memory_space<vmem>>) attributes {dimension_semantics = [#tpu.dimension_semantics<parallel>, #tpu.dimension_semantics<parallel>], iteration_bounds = array<i64: 2, 1>, scalar_prefetch = 0 : i64, scratch_operands = 0 : i64, tpu.core_type = #tpu.core_type<tc>, window_params = [{transform_indices = @transform_0, window_bounds = array<i64: 1, 8, 625>}, {pipeline_mode = #tpu.pipeline_mode<synchronous>, transform_indices = @transform_1, window_bounds = array<i64: 8, 8>}, {pipeline_mode = #tpu.pipeline_mode<synchronous>, transform_indices = @transform_2, window_bounds = array<i64: 8, 1>}, {transform_indices = @transform_3, window_bounds = array<i64: 1, 8, 625>}, {transform_indices = @transform_4, window_bounds = array<i64: 1, 8, 625>}]} {
    %c0 = arith.constant 0 : index
    %c0_0 = arith.constant 0 : index
    %c0_1 = arith.constant 0 : index
    %0 = vector.load %arg5[%c0, %c0_0, %c0_1] : memref<1x8x625xf32, #tpu.memory_space<vmem>>, vector<1x8x625xf32>
    %1 = vector.shape_cast %0 : vector<1x8x625xf32> to vector<8x625xf32>
    %c0_2 = arith.constant 0 : index
    %c0_3 = arith.constant 0 : index
    %2 = vector.load %arg4[%c0_2, %c0_3] : memref<8x1xf32, #tpu.memory_space<vmem>>, vector<8x1xf32>
    %3 = vector.broadcast %2 : vector<8x1xf32> to vector<8x625xf32>
    %4 = arith.addf %1, %3 : vector<8x625xf32>
    %c0_4 = arith.constant 0 : index
    %c0_5 = arith.constant 0 : index
    %5 = vector.load %arg3[%c0_4, %c0_5] : memref<8x8xf32, #tpu.memory_space<vmem>>, vector<8x8xf32>
    %cst = arith.constant 0.000000e+00 : f32
    %6 = vector.broadcast %cst : f32 to vector<8x625xf32>
    %7 = vector.extract_strided_slice %5 {offsets = [0, 0], sizes = [8, 1], strides = [1, 1]} : vector<8x8xf32> to vector<8x1xf32>
    %c0_6 = arith.constant 0 : index
    %c0_7 = arith.constant 0 : index
    %c0_8 = arith.constant 0 : index
    %8 = vector.load %arg2[%c0_6, %c0_7, %c0_8] : memref<1x8x625xf32, #tpu.memory_space<vmem>>, vector<1x1x625xf32>
    %9 = vector.shape_cast %8 : vector<1x1x625xf32> to vector<1x625xf32>
    %10 = vector.broadcast %7 : vector<8x1xf32> to vector<8x625xf32>
    %11 = vector.broadcast %9 : vector<1x625xf32> to vector<8x625xf32>
    %12 = arith.mulf %10, %11 : vector<8x625xf32>
    %13 = arith.addf %6, %12 : vector<8x625xf32>
    %14 = vector.extract_strided_slice %5 {offsets = [0, 1], sizes = [8, 1], strides = [1, 1]} : vector<8x8xf32> to vector<8x1xf32>
    %c0_9 = arith.constant 0 : index
    %c1 = arith.constant 1 : index
    %c0_10 = arith.constant 0 : index
    %15 = vector.load %arg2[%c0_9, %c1, %c0_10] : memref<1x8x625xf32, #tpu.memory_space<vmem>>, vector<1x1x625xf32>
    %16 = vector.shape_cast %15 : vector<1x1x625xf32> to vector<1x625xf32>
    %17 = vector.broadcast %14 : vector<8x1xf32> to vector<8x625xf32>
    %18 = vector.broadcast %16 : vector<1x625xf32> to vector<8x625xf32>
    %19 = arith.mulf %17, %18 : vector<8x625xf32>
    %20 = arith.addf %13, %19 : vector<8x625xf32>
    %21 = vector.extract_strided_slice %5 {offsets = [0, 2], sizes = [8, 1], strides = [1, 1]} : vector<8x8xf32> to vector<8x1xf32>
    %c0_11 = arith.constant 0 : index
    %c2 = arith.constant 2 : index
    %c0_12 = arith.constant 0 : index
    %22 = vector.load %arg2[%c0_11, %c2, %c0_12] : memref<1x8x625xf32, #tpu.memory_space<vmem>>, vector<1x1x625xf32>
    %23 = vector.shape_cast %22 : vector<1x1x625xf32> to vector<1x625xf32>
    %24 = vector.broadcast %21 : vector<8x1xf32> to vector<8x625xf32>
    %25 = vector.broadcast %23 : vector<1x625xf32> to vector<8x625xf32>
    %26 = arith.mulf %24, %25 : vector<8x625xf32>
    %27 = arith.addf %20, %26 : vector<8x625xf32>
    %28 = vector.extract_strided_slice %5 {offsets = [0, 3], sizes = [8, 1], strides = [1, 1]} : vector<8x8xf32> to vector<8x1xf32>
    %c0_13 = arith.constant 0 : index
    %c3 = arith.constant 3 : index
    %c0_14 = arith.constant 0 : index
    %29 = vector.load %arg2[%c0_13, %c3, %c0_14] : memref<1x8x625xf32, #tpu.memory_space<vmem>>, vector<1x1x625xf32>
    %30 = vector.shape_cast %29 : vector<1x1x625xf32> to vector<1x625xf32>
    %31 = vector.broadcast %28 : vector<8x1xf32> to vector<8x625xf32>
    %32 = vector.broadcast %30 : vector<1x625xf32> to vector<8x625xf32>
    %33 = arith.mulf %31, %32 : vector<8x625xf32>
    %34 = arith.addf %27, %33 : vector<8x625xf32>
    %35 = vector.extract_strided_slice %5 {offsets = [0, 4], sizes = [8, 1], strides = [1, 1]} : vector<8x8xf32> to vector<8x1xf32>
    %c0_15 = arith.constant 0 : index
    %c4 = arith.constant 4 : index
    %c0_16 = arith.constant 0 : index
    %36 = vector.load %arg2[%c0_15, %c4, %c0_16] : memref<1x8x625xf32, #tpu.memory_space<vmem>>, vector<1x1x625xf32>
    %37 = vector.shape_cast %36 : vector<1x1x625xf32> to vector<1x625xf32>
    %38 = vector.broadcast %35 : vector<8x1xf32> to vector<8x625xf32>
    %39 = vector.broadcast %37 : vector<1x625xf32> to vector<8x625xf32>
    %40 = arith.mulf %38, %39 : vector<8x625xf32>
    %41 = arith.addf %34, %40 : vector<8x625xf32>
    %42 = vector.extract_strided_slice %5 {offsets = [0, 5], sizes = [8, 1], strides = [1, 1]} : vector<8x8xf32> to vector<8x1xf32>
    %c0_17 = arith.constant 0 : index
    %c5 = arith.constant 5 : index
    %c0_18 = arith.constant 0 : index
    %43 = vector.load %arg2[%c0_17, %c5, %c0_18] : memref<1x8x625xf32, #tpu.memory_space<vmem>>, vector<1x1x625xf32>
    %44 = vector.shape_cast %43 : vector<1x1x625xf32> to vector<1x625xf32>
    %45 = vector.broadcast %42 : vector<8x1xf32> to vector<8x625xf32>
    %46 = vector.broadcast %44 : vector<1x625xf32> to vector<8x625xf32>
    %47 = arith.mulf %45, %46 : vector<8x625xf32>
    %48 = arith.addf %41, %47 : vector<8x625xf32>
    %49 = vector.extract_strided_slice %5 {offsets = [0, 6], sizes = [8, 1], strides = [1, 1]} : vector<8x8xf32> to vector<8x1xf32>
    %c0_19 = arith.constant 0 : index
    %c6 = arith.constant 6 : index
    %c0_20 = arith.constant 0 : index
    %50 = vector.load %arg2[%c0_19, %c6, %c0_20] : memref<1x8x625xf32, #tpu.memory_space<vmem>>, vector<1x1x625xf32>
    %51 = vector.shape_cast %50 : vector<1x1x625xf32> to vector<1x625xf32>
    %52 = vector.broadcast %49 : vector<8x1xf32> to vector<8x625xf32>
    %53 = vector.broadcast %51 : vector<1x625xf32> to vector<8x625xf32>
    %54 = arith.mulf %52, %53 : vector<8x625xf32>
    %55 = arith.addf %48, %54 : vector<8x625xf32>
    %56 = vector.extract_strided_slice %5 {offsets = [0, 7], sizes = [8, 1], strides = [1, 1]} : vector<8x8xf32> to vector<8x1xf32>
    %c0_21 = arith.constant 0 : index
    %c7 = arith.constant 7 : index
    %c0_22 = arith.constant 0 : index
    %57 = vector.load %arg2[%c0_21, %c7, %c0_22] : memref<1x8x625xf32, #tpu.memory_space<vmem>>, vector<1x1x625xf32>
    %58 = vector.shape_cast %57 : vector<1x1x625xf32> to vector<1x625xf32>
    %59 = vector.broadcast %56 : vector<8x1xf32> to vector<8x625xf32>
    %60 = vector.broadcast %58 : vector<1x625xf32> to vector<8x625xf32>
    %61 = arith.mulf %59, %60 : vector<8x625xf32>
    %62 = arith.addf %55, %61 : vector<8x625xf32>
    %63 = arith.addf %4, %62 : vector<8x625xf32>
    %cst_23 = arith.constant 5.000000e-01 : f32
    %64 = vector.broadcast %cst_23 : f32 to vector<8x625xf32>
    %65 = arith.mulf %64, %63 : vector<8x625xf32>
    %cst_24 = arith.constant 1.41421354 : f32
    %66 = vector.broadcast %cst_24 : f32 to vector<8x625xf32>
    %67 = arith.divf %63, %66 : vector<8x625xf32>
    %68 = math.erf %67 : vector<8x625xf32>
    %cst_25 = arith.constant 1.000000e+00 : f32
    %69 = vector.broadcast %cst_25 : f32 to vector<8x625xf32>
    %70 = arith.addf %69, %68 : vector<8x625xf32>
    %71 = arith.mulf %65, %70 : vector<8x625xf32>
    %c0_26 = arith.constant 0 : index
    %c0_27 = arith.constant 0 : index
    %c0_28 = arith.constant 0 : index
    %72 = vector.load %arg6[%c0_26, %c0_27, %c0_28] : memref<1x8x625xf32, #tpu.memory_space<vmem>>, vector<1x8x625xf32>
    %73 = vector.shape_cast %72 : vector<1x8x625xf32> to vector<8x625xf32>
    %74 = vector.shape_cast %71 : vector<8x625xf32> to vector<1x8x625xf32>
    tpu.vector_store %arg6[%c0_26, %c0_27, %c0_28], %74 {strides = array<i32>} : memref<1x8x625xf32, #tpu.memory_space<vmem>>, vector<1x8x625xf32>,
    return
  }
  func.func @transform_0(%arg0: i32, %arg1: i32) -> (i32, i32, i32) {
    %c0_i32 = arith.constant 0 : i32
    %c0_i32_0 = arith.constant 0 : i32
    return %arg0, %c0_i32, %arg1 : i32, i32, i32
  }
  func.func @transform_1(%arg0: i32, %arg1: i32) -> (i32, i32) {
    %c0_i32 = arith.constant 0 : i32
    %c0_i32_0 = arith.constant 0 : i32
    %c0_i32_1 = arith.constant 0 : i32
    return %c0_i32, %c0_i32_0 : i32, i32
  }
  func.func @transform_2(%arg0: i32, %arg1: i32) -> (i32, i32) {
    %c0_i32 = arith.constant 0 : i32
    %c0_i32_0 = arith.constant 0 : i32
    %c0_i32_1 = arith.constant 0 : i32
    return %c0_i32, %c0_i32_0 : i32, i32
  }
  func.func @transform_3(%arg0: i32, %arg1: i32) -> (i32, i32, i32) {
    %c0_i32 = arith.constant 0 : i32
    %c0_i32_0 = arith.constant 0 : i32
    return %arg0, %c0_i32, %arg1 : i32, i32, i32
  }
  func.func @transform_4(%arg0: i32, %arg1: i32) -> (i32, i32, i32) {
    %c0_i32 = arith.constant 0 : i32
    %c0_i32_0 = arith.constant 0 : i32
    return %arg0, %c0_i32, %arg1 : i32, i32, i32
  }
}

module attributes {stable_mosaic.version = 11 : i64} {
  func.func @_fc_head_kernel(%arg0: i32, %arg1: i32, %arg2: memref<1x8x625xf32, #tpu.memory_space<vmem>>, %arg3: memref<32x8xf32, #tpu.memory_space<vmem>>, %arg4: memref<32x1xf32, #tpu.memory_space<vmem>>, %arg5: memref<4x32xf32, #tpu.memory_space<vmem>>, %arg6: memref<4x1xf32, #tpu.memory_space<vmem>>, %arg7: memref<1x4x625xf32, #tpu.memory_space<vmem>>) attributes {dimension_semantics = [#tpu.dimension_semantics<parallel>, #tpu.dimension_semantics<parallel>], iteration_bounds = array<i64: 2, 1>, scalar_prefetch = 0 : i64, scratch_operands = 0 : i64, tpu.core_type = #tpu.core_type<tc>, window_params = [{transform_indices = @transform_0, window_bounds = array<i64: 1, 8, 625>}, {pipeline_mode = #tpu.pipeline_mode<synchronous>, transform_indices = @transform_1, window_bounds = array<i64: 32, 8>}, {pipeline_mode = #tpu.pipeline_mode<synchronous>, transform_indices = @transform_2, window_bounds = array<i64: 32, 1>}, {pipeline_mode = #tpu.pipeline_mode<synchronous>, transform_indices = @transform_3, window_bounds = array<i64: 4, 32>}, {pipeline_mode = #tpu.pipeline_mode<synchronous>, transform_indices = @transform_4, window_bounds = array<i64: 4, 1>}, {transform_indices = @transform_5, window_bounds = array<i64: 1, 4, 625>}]} {
    %c0 = arith.constant 0 : index
    %c0_0 = arith.constant 0 : index
    %0 = vector.load %arg3[%c0, %c0_0] : memref<32x8xf32, #tpu.memory_space<vmem>>, vector<32x8xf32>
    %cst = arith.constant 0.000000e+00 : f32
    %1 = vector.broadcast %cst : f32 to vector<32x625xf32>
    %2 = vector.extract_strided_slice %0 {offsets = [0, 0], sizes = [32, 1], strides = [1, 1]} : vector<32x8xf32> to vector<32x1xf32>
    %c0_1 = arith.constant 0 : index
    %c0_2 = arith.constant 0 : index
    %c0_3 = arith.constant 0 : index
    %3 = vector.load %arg2[%c0_1, %c0_2, %c0_3] : memref<1x8x625xf32, #tpu.memory_space<vmem>>, vector<1x1x625xf32>
    %4 = vector.shape_cast %3 : vector<1x1x625xf32> to vector<1x625xf32>
    %5 = vector.broadcast %2 : vector<32x1xf32> to vector<32x625xf32>
    %6 = vector.broadcast %4 : vector<1x625xf32> to vector<32x625xf32>
    %7 = arith.mulf %5, %6 : vector<32x625xf32>
    %8 = arith.addf %1, %7 : vector<32x625xf32>
    %9 = vector.extract_strided_slice %0 {offsets = [0, 1], sizes = [32, 1], strides = [1, 1]} : vector<32x8xf32> to vector<32x1xf32>
    %c0_4 = arith.constant 0 : index
    %c1 = arith.constant 1 : index
    %c0_5 = arith.constant 0 : index
    %10 = vector.load %arg2[%c0_4, %c1, %c0_5] : memref<1x8x625xf32, #tpu.memory_space<vmem>>, vector<1x1x625xf32>
    %11 = vector.shape_cast %10 : vector<1x1x625xf32> to vector<1x625xf32>
    %12 = vector.broadcast %9 : vector<32x1xf32> to vector<32x625xf32>
    %13 = vector.broadcast %11 : vector<1x625xf32> to vector<32x625xf32>
    %14 = arith.mulf %12, %13 : vector<32x625xf32>
    %15 = arith.addf %8, %14 : vector<32x625xf32>
    %16 = vector.extract_strided_slice %0 {offsets = [0, 2], sizes = [32, 1], strides = [1, 1]} : vector<32x8xf32> to vector<32x1xf32>
    %c0_6 = arith.constant 0 : index
    %c2 = arith.constant 2 : index
    %c0_7 = arith.constant 0 : index
    %17 = vector.load %arg2[%c0_6, %c2, %c0_7] : memref<1x8x625xf32, #tpu.memory_space<vmem>>, vector<1x1x625xf32>
    %18 = vector.shape_cast %17 : vector<1x1x625xf32> to vector<1x625xf32>
    %19 = vector.broadcast %16 : vector<32x1xf32> to vector<32x625xf32>
    %20 = vector.broadcast %18 : vector<1x625xf32> to vector<32x625xf32>
    %21 = arith.mulf %19, %20 : vector<32x625xf32>
    %22 = arith.addf %15, %21 : vector<32x625xf32>
    %23 = vector.extract_strided_slice %0 {offsets = [0, 3], sizes = [32, 1], strides = [1, 1]} : vector<32x8xf32> to vector<32x1xf32>
    %c0_8 = arith.constant 0 : index
    %c3 = arith.constant 3 : index
    %c0_9 = arith.constant 0 : index
    %24 = vector.load %arg2[%c0_8, %c3, %c0_9] : memref<1x8x625xf32, #tpu.memory_space<vmem>>, vector<1x1x625xf32>
    %25 = vector.shape_cast %24 : vector<1x1x625xf32> to vector<1x625xf32>
    %26 = vector.broadcast %23 : vector<32x1xf32> to vector<32x625xf32>
    %27 = vector.broadcast %25 : vector<1x625xf32> to vector<32x625xf32>
    %28 = arith.mulf %26, %27 : vector<32x625xf32>
    %29 = arith.addf %22, %28 : vector<32x625xf32>
    %30 = vector.extract_strided_slice %0 {offsets = [0, 4], sizes = [32, 1], strides = [1, 1]} : vector<32x8xf32> to vector<32x1xf32>
    %c0_10 = arith.constant 0 : index
    %c4 = arith.constant 4 : index
    %c0_11 = arith.constant 0 : index
    %31 = vector.load %arg2[%c0_10, %c4, %c0_11] : memref<1x8x625xf32, #tpu.memory_space<vmem>>, vector<1x1x625xf32>
    %32 = vector.shape_cast %31 : vector<1x1x625xf32> to vector<1x625xf32>
    %33 = vector.broadcast %30 : vector<32x1xf32> to vector<32x625xf32>
    %34 = vector.broadcast %32 : vector<1x625xf32> to vector<32x625xf32>
    %35 = arith.mulf %33, %34 : vector<32x625xf32>
    %36 = arith.addf %29, %35 : vector<32x625xf32>
    %37 = vector.extract_strided_slice %0 {offsets = [0, 5], sizes = [32, 1], strides = [1, 1]} : vector<32x8xf32> to vector<32x1xf32>
    %c0_12 = arith.constant 0 : index
    %c5 = arith.constant 5 : index
    %c0_13 = arith.constant 0 : index
    %38 = vector.load %arg2[%c0_12, %c5, %c0_13] : memref<1x8x625xf32, #tpu.memory_space<vmem>>, vector<1x1x625xf32>
    %39 = vector.shape_cast %38 : vector<1x1x625xf32> to vector<1x625xf32>
    %40 = vector.broadcast %37 : vector<32x1xf32> to vector<32x625xf32>
    %41 = vector.broadcast %39 : vector<1x625xf32> to vector<32x625xf32>
    %42 = arith.mulf %40, %41 : vector<32x625xf32>
    %43 = arith.addf %36, %42 : vector<32x625xf32>
    %44 = vector.extract_strided_slice %0 {offsets = [0, 6], sizes = [32, 1], strides = [1, 1]} : vector<32x8xf32> to vector<32x1xf32>
    %c0_14 = arith.constant 0 : index
    %c6 = arith.constant 6 : index
    %c0_15 = arith.constant 0 : index
    %45 = vector.load %arg2[%c0_14, %c6, %c0_15] : memref<1x8x625xf32, #tpu.memory_space<vmem>>, vector<1x1x625xf32>
    %46 = vector.shape_cast %45 : vector<1x1x625xf32> to vector<1x625xf32>
    %47 = vector.broadcast %44 : vector<32x1xf32> to vector<32x625xf32>
    %48 = vector.broadcast %46 : vector<1x625xf32> to vector<32x625xf32>
    %49 = arith.mulf %47, %48 : vector<32x625xf32>
    %50 = arith.addf %43, %49 : vector<32x625xf32>
    %51 = vector.extract_strided_slice %0 {offsets = [0, 7], sizes = [32, 1], strides = [1, 1]} : vector<32x8xf32> to vector<32x1xf32>
    %c0_16 = arith.constant 0 : index
    %c7 = arith.constant 7 : index
    %c0_17 = arith.constant 0 : index
    %52 = vector.load %arg2[%c0_16, %c7, %c0_17] : memref<1x8x625xf32, #tpu.memory_space<vmem>>, vector<1x1x625xf32>
    %53 = vector.shape_cast %52 : vector<1x1x625xf32> to vector<1x625xf32>
    %54 = vector.broadcast %51 : vector<32x1xf32> to vector<32x625xf32>
    %55 = vector.broadcast %53 : vector<1x625xf32> to vector<32x625xf32>
    %56 = arith.mulf %54, %55 : vector<32x625xf32>
    %57 = arith.addf %50, %56 : vector<32x625xf32>
    %c0_18 = arith.constant 0 : index
    %c0_19 = arith.constant 0 : index
    %58 = vector.load %arg4[%c0_18, %c0_19] : memref<32x1xf32, #tpu.memory_space<vmem>>, vector<32x1xf32>
    %59 = vector.broadcast %58 : vector<32x1xf32> to vector<32x625xf32>
    %60 = arith.addf %57, %59 : vector<32x625xf32>
    %cst_20 = arith.constant 5.000000e-01 : f32
    %61 = vector.broadcast %cst_20 : f32 to vector<32x625xf32>
    %62 = arith.mulf %61, %60 : vector<32x625xf32>
    %cst_21 = arith.constant 1.41421354 : f32
    %63 = vector.broadcast %cst_21 : f32 to vector<32x625xf32>
    %64 = arith.divf %60, %63 : vector<32x625xf32>
    %65 = math.erf %64 : vector<32x625xf32>
    %cst_22 = arith.constant 1.000000e+00 : f32
    %66 = vector.broadcast %cst_22 : f32 to vector<32x625xf32>
    %67 = arith.addf %66, %65 : vector<32x625xf32>
    %68 = arith.mulf %62, %67 : vector<32x625xf32>
    %c0_23 = arith.constant 0 : index
    %c0_24 = arith.constant 0 : index
    %69 = vector.load %arg5[%c0_23, %c0_24] : memref<4x32xf32, #tpu.memory_space<vmem>>, vector<4x32xf32>
    %cst_25 = arith.constant 0.000000e+00 : f32
    %70 = vector.broadcast %cst_25 : f32 to vector<4x625xf32>
    %71 = vector.extract_strided_slice %69 {offsets = [0, 0], sizes = [4, 1], strides = [1, 1]} : vector<4x32xf32> to vector<4x1xf32>
    %72 = vector.extract_strided_slice %68 {offsets = [0, 0], sizes = [1, 625], strides = [1, 1]} : vector<32x625xf32> to vector<1x625xf32>
    %73 = vector.broadcast %71 : vector<4x1xf32> to vector<4x625xf32>
    %74 = vector.broadcast %72 : vector<1x625xf32> to vector<4x625xf32>
    %75 = arith.mulf %73, %74 : vector<4x625xf32>
    %76 = arith.addf %70, %75 : vector<4x625xf32>
    %77 = vector.extract_strided_slice %69 {offsets = [0, 1], sizes = [4, 1], strides = [1, 1]} : vector<4x32xf32> to vector<4x1xf32>
    %78 = vector.extract_strided_slice %68 {offsets = [1, 0], sizes = [1, 625], strides = [1, 1]} : vector<32x625xf32> to vector<1x625xf32>
    %79 = vector.broadcast %77 : vector<4x1xf32> to vector<4x625xf32>
    %80 = vector.broadcast %78 : vector<1x625xf32> to vector<4x625xf32>
    %81 = arith.mulf %79, %80 : vector<4x625xf32>
    %82 = arith.addf %76, %81 : vector<4x625xf32>
    %83 = vector.extract_strided_slice %69 {offsets = [0, 2], sizes = [4, 1], strides = [1, 1]} : vector<4x32xf32> to vector<4x1xf32>
    %84 = vector.extract_strided_slice %68 {offsets = [2, 0], sizes = [1, 625], strides = [1, 1]} : vector<32x625xf32> to vector<1x625xf32>
    %85 = vector.broadcast %83 : vector<4x1xf32> to vector<4x625xf32>
    %86 = vector.broadcast %84 : vector<1x625xf32> to vector<4x625xf32>
    %87 = arith.mulf %85, %86 : vector<4x625xf32>
    %88 = arith.addf %82, %87 : vector<4x625xf32>
    %89 = vector.extract_strided_slice %69 {offsets = [0, 3], sizes = [4, 1], strides = [1, 1]} : vector<4x32xf32> to vector<4x1xf32>
    %90 = vector.extract_strided_slice %68 {offsets = [3, 0], sizes = [1, 625], strides = [1, 1]} : vector<32x625xf32> to vector<1x625xf32>
    %91 = vector.broadcast %89 : vector<4x1xf32> to vector<4x625xf32>
    %92 = vector.broadcast %90 : vector<1x625xf32> to vector<4x625xf32>
    %93 = arith.mulf %91, %92 : vector<4x625xf32>
    %94 = arith.addf %88, %93 : vector<4x625xf32>
    %95 = vector.extract_strided_slice %69 {offsets = [0, 4], sizes = [4, 1], strides = [1, 1]} : vector<4x32xf32> to vector<4x1xf32>
    %96 = vector.extract_strided_slice %68 {offsets = [4, 0], sizes = [1, 625], strides = [1, 1]} : vector<32x625xf32> to vector<1x625xf32>
    %97 = vector.broadcast %95 : vector<4x1xf32> to vector<4x625xf32>
    %98 = vector.broadcast %96 : vector<1x625xf32> to vector<4x625xf32>
    %99 = arith.mulf %97, %98 : vector<4x625xf32>
    %100 = arith.addf %94, %99 : vector<4x625xf32>
    %101 = vector.extract_strided_slice %69 {offsets = [0, 5], sizes = [4, 1], strides = [1, 1]} : vector<4x32xf32> to vector<4x1xf32>
    %102 = vector.extract_strided_slice %68 {offsets = [5, 0], sizes = [1, 625], strides = [1, 1]} : vector<32x625xf32> to vector<1x625xf32>
    %103 = vector.broadcast %101 : vector<4x1xf32> to vector<4x625xf32>
    %104 = vector.broadcast %102 : vector<1x625xf32> to vector<4x625xf32>
    %105 = arith.mulf %103, %104 : vector<4x625xf32>
    %106 = arith.addf %100, %105 : vector<4x625xf32>
    %107 = vector.extract_strided_slice %69 {offsets = [0, 6], sizes = [4, 1], strides = [1, 1]} : vector<4x32xf32> to vector<4x1xf32>
    %108 = vector.extract_strided_slice %68 {offsets = [6, 0], sizes = [1, 625], strides = [1, 1]} : vector<32x625xf32> to vector<1x625xf32>
    %109 = vector.broadcast %107 : vector<4x1xf32> to vector<4x625xf32>
    %110 = vector.broadcast %108 : vector<1x625xf32> to vector<4x625xf32>
    %111 = arith.mulf %109, %110 : vector<4x625xf32>
    %112 = arith.addf %106, %111 : vector<4x625xf32>
    %113 = vector.extract_strided_slice %69 {offsets = [0, 7], sizes = [4, 1], strides = [1, 1]} : vector<4x32xf32> to vector<4x1xf32>
    %114 = vector.extract_strided_slice %68 {offsets = [7, 0], sizes = [1, 625], strides = [1, 1]} : vector<32x625xf32> to vector<1x625xf32>
    %115 = vector.broadcast %113 : vector<4x1xf32> to vector<4x625xf32>
    %116 = vector.broadcast %114 : vector<1x625xf32> to vector<4x625xf32>
    %117 = arith.mulf %115, %116 : vector<4x625xf32>
    %118 = arith.addf %112, %117 : vector<4x625xf32>
    %119 = vector.extract_strided_slice %69 {offsets = [0, 8], sizes = [4, 1], strides = [1, 1]} : vector<4x32xf32> to vector<4x1xf32>
    %120 = vector.extract_strided_slice %68 {offsets = [8, 0], sizes = [1, 625], strides = [1, 1]} : vector<32x625xf32> to vector<1x625xf32>
    %121 = vector.broadcast %119 : vector<4x1xf32> to vector<4x625xf32>
    %122 = vector.broadcast %120 : vector<1x625xf32> to vector<4x625xf32>
    %123 = arith.mulf %121, %122 : vector<4x625xf32>
    %124 = arith.addf %118, %123 : vector<4x625xf32>
    %125 = vector.extract_strided_slice %69 {offsets = [0, 9], sizes = [4, 1], strides = [1, 1]} : vector<4x32xf32> to vector<4x1xf32>
    %126 = vector.extract_strided_slice %68 {offsets = [9, 0], sizes = [1, 625], strides = [1, 1]} : vector<32x625xf32> to vector<1x625xf32>
    %127 = vector.broadcast %125 : vector<4x1xf32> to vector<4x625xf32>
    %128 = vector.broadcast %126 : vector<1x625xf32> to vector<4x625xf32>
    %129 = arith.mulf %127, %128 : vector<4x625xf32>
    %130 = arith.addf %124, %129 : vector<4x625xf32>
    %131 = vector.extract_strided_slice %69 {offsets = [0, 10], sizes = [4, 1], strides = [1, 1]} : vector<4x32xf32> to vector<4x1xf32>
    %132 = vector.extract_strided_slice %68 {offsets = [10, 0], sizes = [1, 625], strides = [1, 1]} : vector<32x625xf32> to vector<1x625xf32>
    %133 = vector.broadcast %131 : vector<4x1xf32> to vector<4x625xf32>
    %134 = vector.broadcast %132 : vector<1x625xf32> to vector<4x625xf32>
    %135 = arith.mulf %133, %134 : vector<4x625xf32>
    %136 = arith.addf %130, %135 : vector<4x625xf32>
    %137 = vector.extract_strided_slice %69 {offsets = [0, 11], sizes = [4, 1], strides = [1, 1]} : vector<4x32xf32> to vector<4x1xf32>
    %138 = vector.extract_strided_slice %68 {offsets = [11, 0], sizes = [1, 625], strides = [1, 1]} : vector<32x625xf32> to vector<1x625xf32>
    %139 = vector.broadcast %137 : vector<4x1xf32> to vector<4x625xf32>
    %140 = vector.broadcast %138 : vector<1x625xf32> to vector<4x625xf32>
    %141 = arith.mulf %139, %140 : vector<4x625xf32>
    %142 = arith.addf %136, %141 : vector<4x625xf32>
    %143 = vector.extract_strided_slice %69 {offsets = [0, 12], sizes = [4, 1], strides = [1, 1]} : vector<4x32xf32> to vector<4x1xf32>
    %144 = vector.extract_strided_slice %68 {offsets = [12, 0], sizes = [1, 625], strides = [1, 1]} : vector<32x625xf32> to vector<1x625xf32>
    %145 = vector.broadcast %143 : vector<4x1xf32> to vector<4x625xf32>
    %146 = vector.broadcast %144 : vector<1x625xf32> to vector<4x625xf32>
    %147 = arith.mulf %145, %146 : vector<4x625xf32>
    %148 = arith.addf %142, %147 : vector<4x625xf32>
    %149 = vector.extract_strided_slice %69 {offsets = [0, 13], sizes = [4, 1], strides = [1, 1]} : vector<4x32xf32> to vector<4x1xf32>
    %150 = vector.extract_strided_slice %68 {offsets = [13, 0], sizes = [1, 625], strides = [1, 1]} : vector<32x625xf32> to vector<1x625xf32>
    %151 = vector.broadcast %149 : vector<4x1xf32> to vector<4x625xf32>
    %152 = vector.broadcast %150 : vector<1x625xf32> to vector<4x625xf32>
    %153 = arith.mulf %151, %152 : vector<4x625xf32>
    %154 = arith.addf %148, %153 : vector<4x625xf32>
    %155 = vector.extract_strided_slice %69 {offsets = [0, 14], sizes = [4, 1], strides = [1, 1]} : vector<4x32xf32> to vector<4x1xf32>
    %156 = vector.extract_strided_slice %68 {offsets = [14, 0], sizes = [1, 625], strides = [1, 1]} : vector<32x625xf32> to vector<1x625xf32>
    %157 = vector.broadcast %155 : vector<4x1xf32> to vector<4x625xf32>
    %158 = vector.broadcast %156 : vector<1x625xf32> to vector<4x625xf32>
    %159 = arith.mulf %157, %158 : vector<4x625xf32>
    %160 = arith.addf %154, %159 : vector<4x625xf32>
    %161 = vector.extract_strided_slice %69 {offsets = [0, 15], sizes = [4, 1], strides = [1, 1]} : vector<4x32xf32> to vector<4x1xf32>
    %162 = vector.extract_strided_slice %68 {offsets = [15, 0], sizes = [1, 625], strides = [1, 1]} : vector<32x625xf32> to vector<1x625xf32>
    %163 = vector.broadcast %161 : vector<4x1xf32> to vector<4x625xf32>
    %164 = vector.broadcast %162 : vector<1x625xf32> to vector<4x625xf32>
    %165 = arith.mulf %163, %164 : vector<4x625xf32>
    %166 = arith.addf %160, %165 : vector<4x625xf32>
    %167 = vector.extract_strided_slice %69 {offsets = [0, 16], sizes = [4, 1], strides = [1, 1]} : vector<4x32xf32> to vector<4x1xf32>
    %168 = vector.extract_strided_slice %68 {offsets = [16, 0], sizes = [1, 625], strides = [1, 1]} : vector<32x625xf32> to vector<1x625xf32>
    %169 = vector.broadcast %167 : vector<4x1xf32> to vector<4x625xf32>
    %170 = vector.broadcast %168 : vector<1x625xf32> to vector<4x625xf32>
    %171 = arith.mulf %169, %170 : vector<4x625xf32>
    %172 = arith.addf %166, %171 : vector<4x625xf32>
    %173 = vector.extract_strided_slice %69 {offsets = [0, 17], sizes = [4, 1], strides = [1, 1]} : vector<4x32xf32> to vector<4x1xf32>
    %174 = vector.extract_strided_slice %68 {offsets = [17, 0], sizes = [1, 625], strides = [1, 1]} : vector<32x625xf32> to vector<1x625xf32>
    %175 = vector.broadcast %173 : vector<4x1xf32> to vector<4x625xf32>
    %176 = vector.broadcast %174 : vector<1x625xf32> to vector<4x625xf32>
    %177 = arith.mulf %175, %176 : vector<4x625xf32>
    %178 = arith.addf %172, %177 : vector<4x625xf32>
    %179 = vector.extract_strided_slice %69 {offsets = [0, 18], sizes = [4, 1], strides = [1, 1]} : vector<4x32xf32> to vector<4x1xf32>
    %180 = vector.extract_strided_slice %68 {offsets = [18, 0], sizes = [1, 625], strides = [1, 1]} : vector<32x625xf32> to vector<1x625xf32>
    %181 = vector.broadcast %179 : vector<4x1xf32> to vector<4x625xf32>
    %182 = vector.broadcast %180 : vector<1x625xf32> to vector<4x625xf32>
    %183 = arith.mulf %181, %182 : vector<4x625xf32>
    %184 = arith.addf %178, %183 : vector<4x625xf32>
    %185 = vector.extract_strided_slice %69 {offsets = [0, 19], sizes = [4, 1], strides = [1, 1]} : vector<4x32xf32> to vector<4x1xf32>
    %186 = vector.extract_strided_slice %68 {offsets = [19, 0], sizes = [1, 625], strides = [1, 1]} : vector<32x625xf32> to vector<1x625xf32>
    %187 = vector.broadcast %185 : vector<4x1xf32> to vector<4x625xf32>
    %188 = vector.broadcast %186 : vector<1x625xf32> to vector<4x625xf32>
    %189 = arith.mulf %187, %188 : vector<4x625xf32>
    %190 = arith.addf %184, %189 : vector<4x625xf32>
    %191 = vector.extract_strided_slice %69 {offsets = [0, 20], sizes = [4, 1], strides = [1, 1]} : vector<4x32xf32> to vector<4x1xf32>
    %192 = vector.extract_strided_slice %68 {offsets = [20, 0], sizes = [1, 625], strides = [1, 1]} : vector<32x625xf32> to vector<1x625xf32>
    %193 = vector.broadcast %191 : vector<4x1xf32> to vector<4x625xf32>
    %194 = vector.broadcast %192 : vector<1x625xf32> to vector<4x625xf32>
    %195 = arith.mulf %193, %194 : vector<4x625xf32>
    %196 = arith.addf %190, %195 : vector<4x625xf32>
    %197 = vector.extract_strided_slice %69 {offsets = [0, 21], sizes = [4, 1], strides = [1, 1]} : vector<4x32xf32> to vector<4x1xf32>
    %198 = vector.extract_strided_slice %68 {offsets = [21, 0], sizes = [1, 625], strides = [1, 1]} : vector<32x625xf32> to vector<1x625xf32>
    %199 = vector.broadcast %197 : vector<4x1xf32> to vector<4x625xf32>
    %200 = vector.broadcast %198 : vector<1x625xf32> to vector<4x625xf32>
    %201 = arith.mulf %199, %200 : vector<4x625xf32>
    %202 = arith.addf %196, %201 : vector<4x625xf32>
    %203 = vector.extract_strided_slice %69 {offsets = [0, 22], sizes = [4, 1], strides = [1, 1]} : vector<4x32xf32> to vector<4x1xf32>
    %204 = vector.extract_strided_slice %68 {offsets = [22, 0], sizes = [1, 625], strides = [1, 1]} : vector<32x625xf32> to vector<1x625xf32>
    %205 = vector.broadcast %203 : vector<4x1xf32> to vector<4x625xf32>
    %206 = vector.broadcast %204 : vector<1x625xf32> to vector<4x625xf32>
    %207 = arith.mulf %205, %206 : vector<4x625xf32>
    %208 = arith.addf %202, %207 : vector<4x625xf32>
    %209 = vector.extract_strided_slice %69 {offsets = [0, 23], sizes = [4, 1], strides = [1, 1]} : vector<4x32xf32> to vector<4x1xf32>
    %210 = vector.extract_strided_slice %68 {offsets = [23, 0], sizes = [1, 625], strides = [1, 1]} : vector<32x625xf32> to vector<1x625xf32>
    %211 = vector.broadcast %209 : vector<4x1xf32> to vector<4x625xf32>
    %212 = vector.broadcast %210 : vector<1x625xf32> to vector<4x625xf32>
    %213 = arith.mulf %211, %212 : vector<4x625xf32>
    %214 = arith.addf %208, %213 : vector<4x625xf32>
    %215 = vector.extract_strided_slice %69 {offsets = [0, 24], sizes = [4, 1], strides = [1, 1]} : vector<4x32xf32> to vector<4x1xf32>
    %216 = vector.extract_strided_slice %68 {offsets = [24, 0], sizes = [1, 625], strides = [1, 1]} : vector<32x625xf32> to vector<1x625xf32>
    %217 = vector.broadcast %215 : vector<4x1xf32> to vector<4x625xf32>
    %218 = vector.broadcast %216 : vector<1x625xf32> to vector<4x625xf32>
    %219 = arith.mulf %217, %218 : vector<4x625xf32>
    %220 = arith.addf %214, %219 : vector<4x625xf32>
    %221 = vector.extract_strided_slice %69 {offsets = [0, 25], sizes = [4, 1], strides = [1, 1]} : vector<4x32xf32> to vector<4x1xf32>
    %222 = vector.extract_strided_slice %68 {offsets = [25, 0], sizes = [1, 625], strides = [1, 1]} : vector<32x625xf32> to vector<1x625xf32>
    %223 = vector.broadcast %221 : vector<4x1xf32> to vector<4x625xf32>
    %224 = vector.broadcast %222 : vector<1x625xf32> to vector<4x625xf32>
    %225 = arith.mulf %223, %224 : vector<4x625xf32>
    %226 = arith.addf %220, %225 : vector<4x625xf32>
    %227 = vector.extract_strided_slice %69 {offsets = [0, 26], sizes = [4, 1], strides = [1, 1]} : vector<4x32xf32> to vector<4x1xf32>
    %228 = vector.extract_strided_slice %68 {offsets = [26, 0], sizes = [1, 625], strides = [1, 1]} : vector<32x625xf32> to vector<1x625xf32>
    %229 = vector.broadcast %227 : vector<4x1xf32> to vector<4x625xf32>
    %230 = vector.broadcast %228 : vector<1x625xf32> to vector<4x625xf32>
    %231 = arith.mulf %229, %230 : vector<4x625xf32>
    %232 = arith.addf %226, %231 : vector<4x625xf32>
    %233 = vector.extract_strided_slice %69 {offsets = [0, 27], sizes = [4, 1], strides = [1, 1]} : vector<4x32xf32> to vector<4x1xf32>
    %234 = vector.extract_strided_slice %68 {offsets = [27, 0], sizes = [1, 625], strides = [1, 1]} : vector<32x625xf32> to vector<1x625xf32>
    %235 = vector.broadcast %233 : vector<4x1xf32> to vector<4x625xf32>
    %236 = vector.broadcast %234 : vector<1x625xf32> to vector<4x625xf32>
    %237 = arith.mulf %235, %236 : vector<4x625xf32>
    %238 = arith.addf %232, %237 : vector<4x625xf32>
    %239 = vector.extract_strided_slice %69 {offsets = [0, 28], sizes = [4, 1], strides = [1, 1]} : vector<4x32xf32> to vector<4x1xf32>
    %240 = vector.extract_strided_slice %68 {offsets = [28, 0], sizes = [1, 625], strides = [1, 1]} : vector<32x625xf32> to vector<1x625xf32>
    %241 = vector.broadcast %239 : vector<4x1xf32> to vector<4x625xf32>
    %242 = vector.broadcast %240 : vector<1x625xf32> to vector<4x625xf32>
    %243 = arith.mulf %241, %242 : vector<4x625xf32>
    %244 = arith.addf %238, %243 : vector<4x625xf32>
    %245 = vector.extract_strided_slice %69 {offsets = [0, 29], sizes = [4, 1], strides = [1, 1]} : vector<4x32xf32> to vector<4x1xf32>
    %246 = vector.extract_strided_slice %68 {offsets = [29, 0], sizes = [1, 625], strides = [1, 1]} : vector<32x625xf32> to vector<1x625xf32>
    %247 = vector.broadcast %245 : vector<4x1xf32> to vector<4x625xf32>
    %248 = vector.broadcast %246 : vector<1x625xf32> to vector<4x625xf32>
    %249 = arith.mulf %247, %248 : vector<4x625xf32>
    %250 = arith.addf %244, %249 : vector<4x625xf32>
    %251 = vector.extract_strided_slice %69 {offsets = [0, 30], sizes = [4, 1], strides = [1, 1]} : vector<4x32xf32> to vector<4x1xf32>
    %252 = vector.extract_strided_slice %68 {offsets = [30, 0], sizes = [1, 625], strides = [1, 1]} : vector<32x625xf32> to vector<1x625xf32>
    %253 = vector.broadcast %251 : vector<4x1xf32> to vector<4x625xf32>
    %254 = vector.broadcast %252 : vector<1x625xf32> to vector<4x625xf32>
    %255 = arith.mulf %253, %254 : vector<4x625xf32>
    %256 = arith.addf %250, %255 : vector<4x625xf32>
    %257 = vector.extract_strided_slice %69 {offsets = [0, 31], sizes = [4, 1], strides = [1, 1]} : vector<4x32xf32> to vector<4x1xf32>
    %258 = vector.extract_strided_slice %68 {offsets = [31, 0], sizes = [1, 625], strides = [1, 1]} : vector<32x625xf32> to vector<1x625xf32>
    %259 = vector.broadcast %257 : vector<4x1xf32> to vector<4x625xf32>
    %260 = vector.broadcast %258 : vector<1x625xf32> to vector<4x625xf32>
    %261 = arith.mulf %259, %260 : vector<4x625xf32>
    %262 = arith.addf %256, %261 : vector<4x625xf32>
    %c0_26 = arith.constant 0 : index
    %c0_27 = arith.constant 0 : index
    %263 = vector.load %arg6[%c0_26, %c0_27] : memref<4x1xf32, #tpu.memory_space<vmem>>, vector<4x1xf32>
    %264 = vector.broadcast %263 : vector<4x1xf32> to vector<4x625xf32>
    %265 = arith.addf %262, %264 : vector<4x625xf32>
    %c0_28 = arith.constant 0 : index
    %c0_29 = arith.constant 0 : index
    %c0_30 = arith.constant 0 : index
    %266 = vector.load %arg7[%c0_28, %c0_29, %c0_30] : memref<1x4x625xf32, #tpu.memory_space<vmem>>, vector<1x4x625xf32>
    %267 = vector.shape_cast %266 : vector<1x4x625xf32> to vector<4x625xf32>
    %268 = vector.shape_cast %265 : vector<4x625xf32> to vector<1x4x625xf32>
    tpu.vector_store %arg7[%c0_28, %c0_29, %c0_30], %268 {strides = array<i32>} : memref<1x4x625xf32, #tpu.memory_space<vmem>>, vector<1x4x625xf32>,
    return
  }
  func.func @transform_0(%arg0: i32, %arg1: i32) -> (i32, i32, i32) {
    %c0_i32 = arith.constant 0 : i32
    %c0_i32_0 = arith.constant 0 : i32
    return %arg0, %c0_i32, %arg1 : i32, i32, i32
  }
  func.func @transform_1(%arg0: i32, %arg1: i32) -> (i32, i32) {
    %c0_i32 = arith.constant 0 : i32
    %c0_i32_0 = arith.constant 0 : i32
    %c0_i32_1 = arith.constant 0 : i32
    return %c0_i32, %c0_i32_0 : i32, i32
  }
  func.func @transform_2(%arg0: i32, %arg1: i32) -> (i32, i32) {
    %c0_i32 = arith.constant 0 : i32
    %c0_i32_0 = arith.constant 0 : i32
    %c0_i32_1 = arith.constant 0 : i32
    return %c0_i32, %c0_i32_0 : i32, i32
  }
  func.func @transform_3(%arg0: i32, %arg1: i32) -> (i32, i32) {
    %c0_i32 = arith.constant 0 : i32
    %c0_i32_0 = arith.constant 0 : i32
    %c0_i32_1 = arith.constant 0 : i32
    return %c0_i32, %c0_i32_0 : i32, i32
  }
  func.func @transform_4(%arg0: i32, %arg1: i32) -> (i32, i32) {
    %c0_i32 = arith.constant 0 : i32
    %c0_i32_0 = arith.constant 0 : i32
    %c0_i32_1 = arith.constant 0 : i32
    return %c0_i32, %c0_i32_0 : i32, i32
  }
  func.func @transform_5(%arg0: i32, %arg1: i32) -> (i32, i32, i32) {
    %c0_i32 = arith.constant 0 : i32
    %c0_i32_0 = arith.constant 0 : i32
    return %arg0, %c0_i32, %arg1 : i32, i32, i32
  }
}

</mosaic_0001>

<bundles_post_ra>
// kernel: tpu_custom_call.1
= control target key start
LH: loop header
LB: loop body
LE: loop exit
PB: predicated region body
PF: predicated region fallthrough
CT: control target
= control target key end

     0   :  { %6 = vsyncpa [#allocation3], 0  ;;  %s114_s0 = inlined_call_operand.hbm [shape: f32[8,128], index: 0, kind: input, shape index: {}]   ;;  %s115_s1 = inlined_call_operand.hbm [shape: f32[8,128], index: 1, kind: output, shape index: {}]  }
   0x1   :  { %7 = vsyncpa [#allocation4], 0  ;;  %s13_s8 = sshll.u32 %s114_s0, 4  ;;  %s96_s9 = smov [#allocation2]   ;;  %s14_s8 = int_to_ptr.hbm [resolvable:$true] %s13_s8 }
   0x2   :  { %s15_s10 = sshll.u32 %s96_s9, 4  ;;  %s16_s10 = int_to_ptr.vmem [resolvable:$true] %s15_s10 }
   0x3   :  { %18 = dma.hbm_to_vmem [thread:$0]  %s14_s8, 128, %s16_s10, [#allocation3]  }
   0x4   :  { %92 = dma.done.wait [#allocation3], 128  }
   0x5   :  { %93 = vsyncadd [#allocation3], 4294967168  ;;  %s97_s11 = smov [#allocation5]   ;;  %s32_s15 = sshll.u32 %s115_s1, 4  ;;  %v23_v0 = vld [vmem:[#allocation2 + $0x7] ss:$0 sm:$0xff]  ;;  %s33_s15 = int_to_ptr.hbm [resolvable:$true] %s32_s15 }
   0x6   :  { %s30_s12 = sshll.u32 %s97_s11, 4  ;;  %24 = vst [vmem:[#allocation5] sm:$0xff] %v23_v0  ;;  %s31_s12 = int_to_ptr.vmem [resolvable:$true] %s30_s12 }
   0x7   :  { %35 = dma.vmem_to_hbm [thread:$0]  %s31_s12, 128, %s33_s15, [#allocation4]  }
   0x8   :  { %94 = dma.done.wait [#allocation4], 128  }
   0x9   :  { %95 = vsyncadd [#allocation4], 4294967168 }
   0xa   :  { %40 = vsyncpa [#allocation3], 1 }
   0xb   :  { %41 = vsyncpa [#allocation4], 1 }

// kernel: fno2d_forward.6
= control target key start
LH: loop header
LB: loop body
LE: loop exit
PB: predicated region body
PF: predicated region fallthrough
CT: control target
= control target key end

     0   :  { %8 = vsyncpa [#allocation3], 0  ;;  %s800_s0 = inlined_call_operand.hbm [shape: f32[2,16,16], index: 0, kind: input, shape index: {}]   ;;  %s801_s1 = inlined_call_operand.vmem [shape: f32[8,1], index: 1, kind: input, shape index: {}]   ;;  %s802_s2 = inlined_call_operand.vmem [shape: f32[8,1], index: 2, kind: input, shape index: {}]   ;;  %s803_s3 = inlined_call_operand.vmem [shape: f32[2,8,25,25], index: 3, kind: output, shape index: {}]  }
   0x1   :  { %10 = vsyncpa [#allocation3 + $0x1], 0  ;;  %s593_s12 = smov 0   ;;  %s595_s13 = smov 0  }
   0x2   :  { %s597_s14 = smov 0   ;;  %s599_s15 = smov 0  }
   0x3 LB: > { %s612_s16 = sadd.s32 4294967295, %s567_s15   ;;  %s615_s17 = sadd.s32 1, %s567_s15   ;;  %s567_s15 = sphi %s599_s15, %s810_s15   ;;  %s563_s14 = sphi %s597_s14, %s809_s14   ;;  %s559_s13 = sphi %s595_s13, %s808_s13   ;;  %s555_s12 = sphi %s593_s12, %s807_s12  }
   0x4   : > { %s20_s18 = ssub.s32 %s567_s15, %s615_s17  ;;  %s23_s19 = sadd.s32 1, %s563_s14 }
   0x5   : > { %p21_p0 = scmp.eq.s32.totalorder %s20_s18, 0  ;;  %p30_p1 = scmp.ne.s32.totalorder %s563_s14, %s559_s13 }
   0x6   : > { %p31_p2 = scmp.eq.s32.totalorder %s567_s15, 0  ;;  %p36_p3 = scmp.ne.s32.totalorder %s559_s13, %s555_s12 }
   0x7   : > { %s625_s20 = scalar_select %p21_p0, %s563_s14, %s23_s19  }
   0x8   : > { %p627_p4 = por %p31_p2, %p30_p1  ;;  %p37_p5 = scmp.eq.s32.totalorder %s612_s16, 0 }
   0x9   : > { %p463_p6 = scmp.lt.s32.totalorder %s567_s15, 2  ;;  %s134_s23 = sand.u32 1, %s563_s14  }
   0xa   : > { %p633_p7 = por %p37_p5, %p36_p3  ;;  %s446_s24 = sshll.u32 %s134_s23, 4 }
   0xb   : > { %s455_s25 = sshll.u32 %s567_s15, 4  ;;  %s138_s29 = scalar_lea.vmem [#allocation2], %s446_s24 }
   0xc   : > { %s143_s28 = scalar_lea.hbm %s800_s0, %s455_s25  ;;  %s146_s30 = sshll.u32 %s138_s29, 4  ;;  %s147_s30 = int_to_ptr.vmem [resolvable:$true] %s146_s30 }
   0xd   : > { %s144_s4 = sshll.u32 %s143_s28, 4  ;;  %p644_p8 = pnand %p463_p6, %p627_p4  ;;  %s145_s4 = int_to_ptr.hbm [resolvable:$true] %s144_s4 }
   0xe   : > { %p449_p9 = scmp.ge.s32.totalorder %s567_s15, 1  ;;  %s135_s6 = scalar_lea.sflag [#allocation3], %s134_s23 }
   0xf   : > { %s503_s7 = sshra.s32 %s145_s4, 4  ;;  %p507_p11 = pneg %p644_p8  ;;  %s504_s7 = int_to_ptr.hbm [resolvable:$true] %s503_s7 }
  0x10   : > { %s505_s8 = scalar_lea.hbm %s504_s7, 16  ;;  %s510_s11 = scalar_lea.hbm %s800_s0, 32 }
  0x11   : > { %p506_p10 = scmp.ne.s32.totalorder %s504_s7, %s505_s8  ;;  %p511_p0 = scmp.lt.s32.totalorder %s504_s7, %s800_s0 }
  0x12   : > { %p512_p1 = scmp.lt.s32.totalorder %s510_s11, %s505_s8 }
  0x13   : > { %p508_p12 = pnand %p507_p11, %p506_p10 }
  0x14   : > { %p513_p2 = por %p512_p1, %p511_p0 }
  0x15   : > { %p509_p13 = pneg %p508_p12 }
  0x17   : > { %p514_p3 = pnand %p513_p2, %p509_p13 }
  0x19   : > { %517 = shalt.err (!%p514_p3)
}
  0x1a   : > { %s569_s19 = smov 128   ;;  %s570_s21 = smov 8  }
  0x1b   : > { %462 = dma.hbm_to_vmem [thread:$0]  (!%p644_p8), %s145_s4, 256, %s147_s30, %s135_s6, %s569_s19, %s569_s19, %s570_s21  }
  0x1c   : > { %p154_p4 = scmp.lt.s32.totalorder %s567_s15, 3 }
  0x1e   : > { %p155_p5 = pnand %p449_p9, %p154_p4 }
  0x1f   : > { %s160_s23 = sand.u32 (!%p155_p5), 1, %s559_s13  }
  0x20   : > { %158 = sbr.rel (%p155_p5) target bundleno = 200 (0xc8), region = 32  ;;  %s663_s24 = sshll.u32 (!%p155_p5), %s160_s23, 4 }
  0x21   : > { %s161_s25 = scalar_lea.sflag (!%p155_p5), [#allocation3], %s160_s23  ;;  %s164_s26 = scalar_lea.vmem (!%p155_p5), [#allocation2], %s663_s24 }
  0x25   : > { %550 = dma.done.wait (%p633_p7), %s161_s25, 256  }
  0x26   : > { %552 = vsyncadd (%p633_p7), %s161_s25, 4294967040  ;;  %v571_v0 = vmov 0   ;;  %v193_v1 = vld [vmem:[%s801_s1] sm:$0xff]  ;;  %p188_p6 = scmp.lt.s32.totalorder %s612_s16, 1  ;;  %vm325_vm0 = vcmask 203776   ;;  %v572_v33 = vmov 0.0  }
  0x27   : > { %500 = vset.pattern.permute.xlu0 %v571_v0  ;;  %502 = vset.pattern.permute.xlu2 %v571_v0  ;;  %v204_v2 = vperm.slane %v193_v1, 0  ;;  %v198_v3 = vrot.slane %v193_v1, 4  ;;  %v196_v4 = vrot.slane %v193_v1, 2  ;;  %v195_v7 = vrot.slane %v193_v1, 1  ;;  %v260_v15 = vld [vmem:[%s802_s2] sm:$0xff]  ;;  %v203_v37 = vld [vmem:[%s164_s26 + $0x8] sm:$0xff] }
  0x28   : > { %501 = vset.pattern.permute.xlu1 %v571_v0  ;;  %v199_v8 = vrot.slane %v193_v1, 5  ;;  %v197_v9 = vrot.slane %v193_v1, 3  ;;  %v200_v13 = vrot.slane %v193_v1, 6  ;;  %v201_v14 = vrot.slane %v193_v1, 7  ;;  %s812_s16 = smov (!%p188_p6, %s612_s16), 1  ;;  %v202_v36 = vld [vmem:[%s164_s26] sm:$0xff] }
  0x29   : > { %213 = vperm.xlu0 %500, %v204_v2   ;;  %v208_v5 = vperm.slane %v198_v3, 0  ;;  %v206_v6 = vperm.slane %v196_v4, 0  ;;  %v205_v10 = vperm.slane %v195_v7, 0  ;;  %v269_v17 = vperm.slane %v260_v15, 0  ;;  %s456_s29 = sshll.u32 %s812_s16, 8 }
  0x2a   : > { %v209_v11 = vperm.slane %v199_v8, 0  ;;  %v207_v12 = vperm.slane %v197_v9, 0  ;;  %v210_v16 = vperm.slane %v200_v13, 0  ;;  %v211_v18 = vperm.slane %v201_v14, 0  ;;  %s681_s5 = scalar_lea.vmem %s803_s3, %s456_s29 }
  0x2b   : > { %229 = vperm.xlu2 %502, %v208_v5   ;;  %221 = vperm.xlu1 %501, %v206_v6   ;;  %v262_v19 = vrot.slane %v260_v15, 1  ;;  %v264_v20 = vrot.slane %v260_v15, 3  ;;  %v263_v21 = vrot.slane %v260_v15, 2  ;;  %v265_v25 = vrot.slane %v260_v15, 4  ;;  %326 = vst.msk [vmem:[%s681_s5] sm:$0xff] %vm325_vm0, %v572_v33 }
  0x2c   : > { %v267_v26 = vrot.slane %v260_v15, 6  ;;  %v266_v27 = vrot.slane %v260_v15, 5  ;;  %v268_v31 = vrot.slane %v260_v15, 7  ;;  %vm329_vm1 = vcmask 196608   ;;  %327 = vst.msk [vmem:[%s681_s5 + $0x8] sm:$0xff] %vm325_vm0, %v572_v33 }
  0x2d   : > { %v270_v22 = vperm.slane %v262_v19, 0  ;;  %v272_v23 = vperm.slane %v264_v20, 0  ;;  %v271_v24 = vperm.slane %v263_v21, 0  ;;  %v273_v28 = vperm.slane %v265_v25, 0  ;;  %328 = vst.msk [vmem:[%s681_s5 + $0x10] sm:$0xff] %vm325_vm0, %v572_v33 }
  0x2e   : > { %v275_v29 = vperm.slane %v267_v26, 0  ;;  %v274_v30 = vperm.slane %v266_v27, 0  ;;  %v276_v32 = vperm.slane %v268_v31, 0  ;;  %330 = vst.msk [vmem:[%s681_s5 + $0x18] sm:$0x1] %vm329_vm1, %v572_v33  ;;  %vm359_vm2 = vcmask 130048  }
  0x2f   : > { %333 = vst.msk [vmem:[%s681_s5 + $0x30] sm:$0xff] %vm325_vm0, %v572_v33 }
  0x30   : > { %334 = vst.msk [vmem:[%s681_s5 + $0x38] sm:$0x1] %vm329_vm1, %v572_v33 }
  0x31   : > { %217 = vperm.xlu0 %500, %v205_v10   ;;  %337 = vst.msk [vmem:[%s681_s5 + $0x50] sm:$0xff] %vm325_vm0, %v572_v33 }
  0x32   : > { %338 = vst.msk [vmem:[%s681_s5 + $0x58] sm:$0x1] %vm329_vm1, %v572_v33 }
  0x33   : > { %233 = vperm.xlu2 %502, %v209_v11   ;;  %225 = vperm.xlu1 %501, %v207_v12   ;;  %341 = vst.msk [vmem:[%s681_s5 + $0x70] sm:$0xff] %vm325_vm0, %v572_v33 }
  0x34   : > { %342 = vst.msk [vmem:[%s681_s5 + $0x78] sm:$0x1] %vm329_vm1, %v572_v33 }
  0x35   : > { %345 = vst.msk [vmem:[%s681_s5 + $0x90] sm:$0xff] %vm325_vm0, %v572_v33 }
  0x36   : > { %346 = vst.msk [vmem:[%s681_s5 + $0x98] sm:$0x1] %vm329_vm1, %v572_v33 }
  0x37   : > { %349 = vst.msk [vmem:[%s681_s5 + $0xb0] sm:$0xff] %vm325_vm0, %v572_v33 }
  0x38   : > { %350 = vst.msk [vmem:[%s681_s5 + $0xb8] sm:$0x1] %vm329_vm1, %v572_v33 }
  0x39   : > { %237 = vperm.xlu0 %500, %v210_v16   ;;  %353 = vst.msk [vmem:[%s681_s5 + $0xd0] sm:$0xff] %vm325_vm0, %v572_v33 }
  0x3a   : > { %354 = vst.msk [vmem:[%s681_s5 + $0xd8] sm:$0x1] %vm329_vm1, %v572_v33 }
  0x3b   : > { %278 = vperm.xlu2 %502, %v269_v17   ;;  %241 = vperm.xlu1 %501, %v211_v18   ;;  %357 = vst.msk [vmem:[%s681_s5 + $0xf0] sm:$0xff] %vm325_vm0, %v572_v33 }
  0x3c   : > { %358 = vst.msk [vmem:[%s681_s5 + $0xf8] sm:$0x1] %vm329_vm1, %v572_v33 }
  0x3d   : > { %331 = vst.msk [vmem:[%s681_s5 + $0x20] sm:$0xff] %vm325_vm0, %v572_v33 }
  0x3e   : > { %332 = vst.msk [vmem:[%s681_s5 + $0x28] sm:$0xff] %vm325_vm0, %v572_v33 }
  0x3f   : > { %335 = vst.msk [vmem:[%s681_s5 + $0x40] sm:$0xff] %vm325_vm0, %v572_v33 }
  0x40   : > { %336 = vst.msk [vmem:[%s681_s5 + $0x48] sm:$0xff] %vm325_vm0, %v572_v33 }
  0x41   : > { %282 = vperm.xlu0 %500, %v270_v22   ;;  %339 = vst.msk [vmem:[%s681_s5 + $0x60] sm:$0xff] %vm325_vm0, %v572_v33 }
  0x42   : > { %340 = vst.msk [vmem:[%s681_s5 + $0x68] sm:$0xff] %vm325_vm0, %v572_v33 }
  0x43   : > { %290 = vperm.xlu2 %502, %v272_v23   ;;  %286 = vperm.xlu1 %501, %v271_v24   ;;  %343 = vst.msk [vmem:[%s681_s5 + $0x80] sm:$0xff] %vm325_vm0, %v572_v33 }
  0x44   : > { %344 = vst.msk [vmem:[%s681_s5 + $0x88] sm:$0xff] %vm325_vm0, %v572_v33 }
  0x45   : > { %347 = vst.msk [vmem:[%s681_s5 + $0xa0] sm:$0xff] %vm325_vm0, %v572_v33 }
  0x46   : > { %348 = vst.msk [vmem:[%s681_s5 + $0xa8] sm:$0xff] %vm325_vm0, %v572_v33 }
  0x47   : > { %351 = vst.msk [vmem:[%s681_s5 + $0xc0] sm:$0xff] %vm325_vm0, %v572_v33 }
  0x48   : > { %352 = vst.msk [vmem:[%s681_s5 + $0xc8] sm:$0xff] %vm325_vm0, %v572_v33 }
  0x49   : > { %294 = vperm.xlu0 %500, %v273_v28   ;;  %355 = vst.msk [vmem:[%s681_s5 + $0xe0] sm:$0xff] %vm325_vm0, %v572_v33 }
  0x4a   : > { %356 = vst.msk [vmem:[%s681_s5 + $0xe8] sm:$0xff] %vm325_vm0, %v572_v33 }
  0x4b   : > { %302 = vperm.xlu2 %502, %v275_v29   ;;  %298 = vperm.xlu1 %501, %v274_v30  }
  0x51   : > { %306 = vperm.xlu0 %500, %v276_v32  }
  0x85   : > { %v713_v34 = vpop.permute.xlu2 %229 }
  0x86   : > { %v252_v5 = vmul.f32 %v713_v34, %v202_v36  ;;  %v253_v6 = vmul.f32 %v713_v34, %v203_v37 }
  0x8d   : > { %v234_v35 = vpop.permute.xlu2 %233 }
  0x8e   : > { %v254_v8 = vmul.f32 %v234_v35, %v202_v36  ;;  %v255_v9 = vmul.f32 %v234_v35, %v203_v37 }
  0x95   : > { %v279_v38 = vpop.permute.xlu2 %278 }
  0x9b   : > { %v214_v39 = vpop.permute.xlu0 %213 }
  0x9c   : > { %v244_v40 = vmul.f32 %v214_v39, %v202_v36  ;;  %v245_v41 = vmul.f32 %v214_v39, %v203_v37 }
  0x9d   : > { %v222_v42 = vpop.permute.xlu1 %221  ;;  %v291_v45 = vpop.permute.xlu2 %290 }
  0x9e   : > { %v309_v43 = vadd.f32 %v279_v38, %v244_v40  ;;  %v310_v44 = vadd.f32 %v279_v38, %v245_v41  ;;  %v248_v62 = vmul.f32 %v222_v42, %v202_v36  ;;  %v249_v63 = vmul.f32 %v222_v42, %v203_v37 }
  0xa0   : > { %360 = vst.msk [vmem:[%s681_s5] sm:$0xff] %vm359_vm2, %v309_v43 }
  0xa1   : > { %361 = vst.msk [vmem:[%s681_s5 + $0x8] sm:$0xff] %vm359_vm2, %v310_v44 }
  0xa3   : > { %v218_v46 = vpop.permute.xlu0 %217 }
  0xa4   : > { %v246_v59 = vmul.f32 %v218_v46, %v202_v36  ;;  %v247_v60 = vmul.f32 %v218_v46, %v203_v37 }
  0xa5   : > { %v226_v47 = vpop.permute.xlu1 %225  ;;  %v303_v55 = vpop.permute.xlu2 %302 }
  0xa6   : > { %v250_v48 = vmul.f32 %v226_v47, %v202_v36  ;;  %v251_v49 = vmul.f32 %v226_v47, %v203_v37 }
  0xa8   : > { %v315_v50 = vadd.f32 %v291_v45, %v250_v48  ;;  %v316_v51 = vadd.f32 %v291_v45, %v251_v49 }
  0xaa   : > { %366 = vst.msk [vmem:[%s681_s5 + $0x60] sm:$0xff] %vm359_vm2, %v315_v50 }
  0xab   : > { %367 = vst.msk [vmem:[%s681_s5 + $0x68] sm:$0xff] %vm359_vm2, %v316_v51  ;;  %v238_v52 = vpop.permute.xlu0 %237 }
  0xac   : > { %v256_v53 = vmul.f32 %v238_v52, %v202_v36  ;;  %v257_v54 = vmul.f32 %v238_v52, %v203_v37 }
  0xad   : > { %v242_v56 = vpop.permute.xlu1 %241 }
  0xae   : > { %v321_v57 = vadd.f32 %v303_v55, %v256_v53  ;;  %v322_v58 = vadd.f32 %v303_v55, %v257_v54  ;;  %v258_v15 = vmul.f32 %v242_v56, %v202_v36  ;;  %v259_v16 = vmul.f32 %v242_v56, %v203_v37 }
  0xb0   : > { %372 = vst.msk [vmem:[%s681_s5 + $0xc0] sm:$0xff] %vm359_vm2, %v321_v57 }
  0xb1   : > { %373 = vst.msk [vmem:[%s681_s5 + $0xc8] sm:$0xff] %vm359_vm2, %v322_v58 }
  0xb3   : > { %v283_v61 = vpop.permute.xlu0 %282 }
  0xb4   : > { %v311_v0 = vadd.f32 %v283_v61, %v246_v59  ;;  %v312_v1 = vadd.f32 %v283_v61, %v247_v60 }
  0xb5   : > { %v287_v2 = vpop.permute.xlu1 %286 }
  0xb6   : > { %362 = vst.msk [vmem:[%s681_s5 + $0x20] sm:$0xff] %vm359_vm2, %v311_v0  ;;  %v313_v3 = vadd.f32 %v287_v2, %v248_v62  ;;  %v314_v4 = vadd.f32 %v287_v2, %v249_v63 }
  0xb7   : > { %363 = vst.msk [vmem:[%s681_s5 + $0x28] sm:$0xff] %vm359_vm2, %v312_v1 }
  0xb8   : > { %364 = vst.msk [vmem:[%s681_s5 + $0x40] sm:$0xff] %vm359_vm2, %v313_v3 }
  0xb9   : > { %365 = vst.msk [vmem:[%s681_s5 + $0x48] sm:$0xff] %vm359_vm2, %v314_v4 }
  0xbb   : > { %v295_v7 = vpop.permute.xlu0 %294 }
  0xbc   : > { %v317_v10 = vadd.f32 %v295_v7, %v252_v5  ;;  %v318_v11 = vadd.f32 %v295_v7, %v253_v6 }
  0xbd   : > { %v299_v12 = vpop.permute.xlu1 %298 }
  0xbe   : > { %368 = vst.msk [vmem:[%s681_s5 + $0x80] sm:$0xff] %vm359_vm2, %v317_v10  ;;  %v319_v13 = vadd.f32 %v299_v12, %v254_v8  ;;  %v320_v14 = vadd.f32 %v299_v12, %v255_v9 }
  0xbf   : > { %369 = vst.msk [vmem:[%s681_s5 + $0x88] sm:$0xff] %vm359_vm2, %v318_v11 }
  0xc0   : > { %370 = vst.msk [vmem:[%s681_s5 + $0xa0] sm:$0xff] %vm359_vm2, %v319_v13 }
  0xc1   : > { %371 = vst.msk [vmem:[%s681_s5 + $0xa8] sm:$0xff] %vm359_vm2, %v320_v14 }
  0xc3   : > { %v307_v17 = vpop.permute.xlu0 %306 }
  0xc4   : > { %v323_v18 = vadd.f32 %v307_v17, %v258_v15  ;;  %v324_v19 = vadd.f32 %v307_v17, %v259_v16 }
  0xc6   : > { %374 = vst.msk [vmem:[%s681_s5 + $0xe0] sm:$0xff] %vm359_vm2, %v323_v18 }
  0xc7   : > { %375 = vst.msk [vmem:[%s681_s5 + $0xe8] sm:$0xff] %vm359_vm2, %v324_v19 }
  0xc8 PF: > { %p13_p7 = scmp.ge.s32.totalorder %s615_s17, 4   ;;  %s807_s12 = smov %s559_s13 }
  0xc9   : > { %s808_s13 = smov %s563_s14  ;;  %s809_s14 = smov %s625_s20 }
  0xca   : > { %s810_s15 = smov %s615_s17  ;;  %15 = sbr.rel (!%p13_p7) target bundleno = 3 (0x3), region = 72 }
  0xcf   :  { %397 = vsyncpa [#allocation3], 1 }
  0xd0   :  { %399 = vsyncpa [#allocation3 + $0x1], 1 }

// kernel: fno2d_forward.7
= control target key start
LH: loop header
LB: loop body
LE: loop exit
PB: predicated region body
PF: predicated region fallthrough
CT: control target
= control target key end

     0   :  { %s560_s18 = smov 0   ;;  %s657_s0 = inlined_call_operand.vmem [shape: f32[2,8,72], index: 0, kind: input, shape index: {}]   ;;  %s658_s1 = inlined_call_operand.vmem [shape: f32[2,8,72], index: 1, kind: input, shape index: {}]   ;;  %s659_s2 = inlined_call_operand.vmem [shape: f32[8,8,72], index: 2, kind: input, shape index: {}]   ;;  %s660_s3 = inlined_call_operand.vmem [shape: f32[8,8,72], index: 3, kind: input, shape index: {}]   ;;  %s661_s4 = inlined_call_operand.vmem [shape: f32[2,8,72], index: 4, kind: output, shape index: {0}]   ;;  %s662_s5 = inlined_call_operand.vmem [shape: f32[2,8,72], index: 5, kind: output, shape index: {1}]  }
   0x1 LB: > { %s473_s19 = sadd.s32 4294967295, %s528_s18   ;;  %p477_p0 = scmp.ge.s32.totalorder %s528_s18, 1  ;;  %s528_s18 = sphi %s560_s18, %s16_s18  }
   0x2   : > { %p198_p1 = scmp.lt.s32.totalorder %s528_s18, 3 }
   0x4   : > { %p199_p2 = pnand %p477_p0, %p198_p1 }
   0x5   : > { %p232_p3 = scmp.lt.s32.totalorder (!%p199_p2), %s473_s19, 1 }
   0x6   : > { %202 = sbr.rel (%p199_p2) target bundleno = 50 (0x32), region = 36 }
   0xb   : > { %s664_s19 = smov (!%p232_p3, %s473_s19), 1  ;;  %v250_v0 = vld [vmem:[%s659_s2] sm:$0xff]  ;;  %v482_v2 = vld [vmem:[%s659_s2 + $0x8] sm:$0xff]  ;;  %v484_v12 = vld [vmem:[%s659_s2 + $0x10] sm:$0xff]  ;;  %vm374_vm0 = vcmask 588800  }
   0xc   : > { %s568_s20 = sshll.u32 %s664_s19, 3  ;;  %v251_v1 = vld [vmem:[%s660_s3] sm:$0xff]  ;;  %v483_v3 = vld [vmem:[%s660_s3 + $0x8] sm:$0xff]  ;;  %v485_v16 = vld [vmem:[%s660_s3 + $0x10] sm:$0xff] }
   0xd   : > { %s577_s25 = scalar_lea.vmem %s657_s0, %s568_s20  ;;  %s583_s28 = scalar_lea.vmem %s658_s1, %s568_s20  ;;  %v486_v24 = vld [vmem:[%s659_s2 + $0x18] sm:$0xff]  ;;  %v488_v39 = vld [vmem:[%s659_s2 + $0x20] sm:$0xff]  ;;  %v490_v51 = vld [vmem:[%s659_s2 + $0x28] sm:$0xff] }
   0xe   : > { %v506_v4 = vld [vmem:[%s577_s25] ss:$0 sm:$0xff]  ;;  %v508_v8 = vld [vmem:[%s577_s25 + $0x1] ss:$0 sm:$0xff]  ;;  %v510_v13 = vld [vmem:[%s577_s25 + $0x2] ss:$0 sm:$0xff]  ;;  %s243_s14 = scalar_lea.vmem %s661_s4, %s568_s20  ;;  %s247_s16 = scalar_lea.vmem %s662_s5, %s568_s20 }
   0xf   : > { %v507_v5 = vld [vmem:[%s583_s28] ss:$0 sm:$0xff]  ;;  %v253_v6 = vmul.f32 %v506_v4, %v250_v0  ;;  %v258_v7 = vmul.f32 %v506_v4, %v251_v1  ;;  %v509_v9 = vld [vmem:[%s583_s28 + $0x1] ss:$0 sm:$0xff]  ;;  %v269_v14 = vmul.f32 %v508_v8, %v482_v2  ;;  %v274_v15 = vmul.f32 %v508_v8, %v483_v3  ;;  %v511_v21 = vld [vmem:[%s583_s28 + $0x2] ss:$0 sm:$0xff] }
  0x10   : > { %v256_v10 = vmul.f32 %v507_v5, %v251_v1  ;;  %v260_v11 = vmul.f32 %v507_v5, %v250_v0  ;;  %v272_v19 = vmul.f32 %v509_v9, %v483_v3  ;;  %v276_v20 = vmul.f32 %v509_v9, %v482_v2  ;;  %v512_v25 = vld [vmem:[%s577_s25 + $0x3] ss:$0 sm:$0xff]  ;;  %v487_v28 = vld [vmem:[%s660_s3 + $0x18] sm:$0xff]  ;;  %v514_v36 = vld [vmem:[%s577_s25 + $0x4] ss:$0 sm:$0xff] }
  0x11   : > { %v285_v23 = vmul.f32 %v510_v13, %v484_v12  ;;  %v290_v27 = vmul.f32 %v510_v13, %v485_v16  ;;  %v288_v30 = vmul.f32 %v511_v21, %v485_v16  ;;  %v513_v31 = vld [vmem:[%s583_s28 + $0x3] ss:$0 sm:$0xff]  ;;  %v292_v33 = vmul.f32 %v511_v21, %v484_v12  ;;  %v515_v43 = vld [vmem:[%s583_s28 + $0x4] ss:$0 sm:$0xff]  ;;  %v516_v48 = vld [vmem:[%s577_s25 + $0x5] ss:$0 sm:$0xff] }
  0x12   : > { %v257_v17 = vsub.f32 %v253_v6, %v256_v10  ;;  %v261_v18 = vadd.f32 %v260_v11, %v258_v7  ;;  %v301_v35 = vmul.f32 %v512_v25, %v486_v24  ;;  %v306_v38 = vmul.f32 %v512_v25, %v487_v28  ;;  %v489_v40 = vld [vmem:[%s660_s3 + $0x20] sm:$0xff]  ;;  %v491_v52 = vld [vmem:[%s660_s3 + $0x28] sm:$0xff]  ;;  %v492_v63 = vld [vmem:[%s659_s2 + $0x30] sm:$0xff] }
  0x13   : > { %v304_v42 = vmul.f32 %v513_v31, %v487_v28  ;;  %v308_v45 = vmul.f32 %v513_v31, %v486_v24  ;;  %v317_v47 = vmul.f32 %v514_v36, %v488_v39  ;;  %v322_v50 = vmul.f32 %v514_v36, %v489_v40  ;;  %v517_v55 = vld [vmem:[%s583_s28 + $0x5] ss:$0 sm:$0xff]  ;;  %v518_v60 = vld [vmem:[%s577_s25 + $0x6] ss:$0 sm:$0xff]  ;;  %v493_v0 = vld [vmem:[%s660_s3 + $0x30] sm:$0xff] }
  0x14   : > { %v270_v22 = vadd.f32 %v269_v14, %v257_v17  ;;  %v275_v26 = vadd.f32 %v274_v15, %v261_v18  ;;  %v320_v54 = vmul.f32 %v515_v43, %v489_v40  ;;  %v324_v57 = vmul.f32 %v515_v43, %v488_v39  ;;  %v519_v3 = vld [vmem:[%s583_s28 + $0x6] ss:$0 sm:$0xff]  ;;  %v520_v8 = vld [vmem:[%s577_s25 + $0x7] ss:$0 sm:$0xff]  ;;  %v494_v11 = vld [vmem:[%s659_s2 + $0x38] sm:$0xff] }
  0x15   : > { %v333_v59 = vmul.f32 %v516_v48, %v490_v51  ;;  %v338_v62 = vmul.f32 %v516_v48, %v491_v52  ;;  %v336_v2 = vmul.f32 %v517_v55, %v491_v52  ;;  %v340_v5 = vmul.f32 %v517_v55, %v490_v51  ;;  %v495_v12 = vld [vmem:[%s660_s3 + $0x38] sm:$0xff]  ;;  %v521_v15 = vld [vmem:[%s583_s28 + $0x7] ss:$0 sm:$0xff] }
  0x16   : > { %v273_v29 = vsub.f32 %v270_v22, %v272_v19  ;;  %v277_v32 = vadd.f32 %v276_v20, %v275_v26  ;;  %v349_v7 = vmul.f32 %v518_v60, %v492_v63  ;;  %v354_v10 = vmul.f32 %v518_v60, %v493_v0 }
  0x17   : > { %v352_v14 = vmul.f32 %v519_v3, %v493_v0  ;;  %v356_v17 = vmul.f32 %v519_v3, %v492_v63  ;;  %v365_v19 = vmul.f32 %v520_v8, %v494_v11  ;;  %v370_v21 = vmul.f32 %v520_v8, %v495_v12 }
  0x18   : > { %v286_v34 = vadd.f32 %v285_v23, %v273_v29  ;;  %v291_v37 = vadd.f32 %v290_v27, %v277_v32  ;;  %v368_v23 = vmul.f32 %v521_v15, %v495_v12  ;;  %v372_v25 = vmul.f32 %v521_v15, %v494_v11 }
  0x1a   : > { %v289_v41 = vsub.f32 %v286_v34, %v288_v30  ;;  %v293_v44 = vadd.f32 %v292_v33, %v291_v37 }
  0x1c   : > { %v302_v46 = vadd.f32 %v301_v35, %v289_v41  ;;  %v307_v49 = vadd.f32 %v306_v38, %v293_v44 }
  0x1e   : > { %v305_v53 = vsub.f32 %v302_v46, %v304_v42  ;;  %v309_v56 = vadd.f32 %v308_v45, %v307_v49 }
  0x20   : > { %v318_v58 = vadd.f32 %v317_v47, %v305_v53  ;;  %v323_v61 = vadd.f32 %v322_v50, %v309_v56 }
  0x22   : > { %v321_v1 = vsub.f32 %v318_v58, %v320_v54  ;;  %v325_v4 = vadd.f32 %v324_v57, %v323_v61 }
  0x24   : > { %v334_v6 = vadd.f32 %v333_v59, %v321_v1  ;;  %v339_v9 = vadd.f32 %v338_v62, %v325_v4 }
  0x26   : > { %v337_v13 = vsub.f32 %v334_v6, %v336_v2  ;;  %v341_v16 = vadd.f32 %v340_v5, %v339_v9 }
  0x28   : > { %v350_v18 = vadd.f32 %v349_v7, %v337_v13  ;;  %v355_v20 = vadd.f32 %v354_v10, %v341_v16 }
  0x2a   : > { %v353_v22 = vsub.f32 %v350_v18, %v352_v14  ;;  %v357_v24 = vadd.f32 %v356_v17, %v355_v20 }
  0x2c   : > { %v366_v26 = vadd.f32 %v365_v19, %v353_v22  ;;  %v371_v27 = vadd.f32 %v370_v21, %v357_v24 }
  0x2e   : > { %v369_v28 = vsub.f32 %v366_v26, %v368_v23  ;;  %v373_v29 = vadd.f32 %v372_v25, %v371_v27 }
  0x30   : > { %375 = vst.msk [vmem:[%s243_s14] sm:$0xff] %vm374_vm0, %v369_v28 }
  0x31   : > { %376 = vst.msk [vmem:[%s247_s16] sm:$0xff] %vm374_vm0, %v373_v29 }
  0x32 PF: > { %s16_s18 = sadd.s32 1, %s528_s18  }
  0x33   : > { %p13_p4 = scmp.ge.s32.totalorder %s16_s18, 4  }
  0x35   :  { %15 = sbr.rel (!%p13_p4) target bundleno = 1 (0x1), region = 95 }

// kernel: reverse.5
= control target key start
LH: loop header
LB: loop body
LE: loop exit
PB: predicated region body
PF: predicated region fallthrough
CT: control target
= control target key end

     0   :  { %v169_v26 = vlaneseq  ;;  %v175_v35 = vld [vmem:[#allocation0 + $0x7] ss:$-1 sm:$0xff]  ;;  %v203_v44 = vld [vmem:[#allocation0 + $0x1f] ss:$-1 sm:$0xff]  ;;  %v231_v52 = vld [vmem:[#allocation0 + $0x37] ss:$-1 sm:$0xff]  ;;  %s1163_s0 = inlined_call_operand.vmem [shape: f32[2,8,25,12], index: 0, kind: input, shape index: {}]   ;;  %s1164_s1 = inlined_call_operand.vmem [shape: f32[2,8,25,12], index: 1, kind: output, shape index: {}]  }
   0x1   :  { %v93_v0 = vld [vmem:[%s1163_s0] sm:$0xff]  ;;  %v95_v1 = vld [vmem:[%s1163_s0 + $0x8] sm:$0xff]  ;;  %v97_v2 = vld [vmem:[%s1163_s0 + $0x10] sm:$0xff]  ;;  %v176_v41 = vrot.slane %v175_v35, 4  ;;  %v204_v49 = vrot.slane %v203_v44, 4  ;;  %v232_v57 = vrot.slane %v231_v52, 4 }
   0x2   :  { %94 = vst [vmem:[#allocation0 + $0x8] sm:$0xff] %v93_v0  ;;  %v99_v3 = vld [vmem:[%s1163_s0 + $0x18] sm:$0xff]  ;;  %v101_v4 = vld [vmem:[%s1163_s0 + $0x20] sm:$0xff]  ;;  %v103_v5 = vld [vmem:[%s1163_s0 + $0x28] sm:$0xff]  ;;  %v994_v33 = vshrl.u32 %v169_v26, 7 }
   0x3   :  { %96 = vst [vmem:[#allocation0 + $0x10] sm:$0xff] %v95_v1  ;;  %v105_v6 = vld [vmem:[%s1163_s0 + $0x30] sm:$0xff]  ;;  %v107_v7 = vld [vmem:[%s1163_s0 + $0x38] sm:$0xff]  ;;  %v109_v8 = vld [vmem:[%s1163_s0 + $0x40] sm:$0xff] }
   0x4   :  { %98 = vst [vmem:[#allocation0 + $0x20] sm:$0xff] %v97_v2  ;;  %v111_v9 = vld [vmem:[%s1163_s0 + $0x48] sm:$0xff]  ;;  %v113_v10 = vld [vmem:[%s1163_s0 + $0x50] sm:$0xff]  ;;  %v115_v11 = vld [vmem:[%s1163_s0 + $0x58] sm:$0xff]  ;;  %vm171_vm0 = vcmp.lt.s32.totalorder %v994_v33, 4 }
   0x5   :  { %100 = vst [vmem:[#allocation0 + $0x28] sm:$0xff] %v99_v3  ;;  %v117_v12 = vld [vmem:[%s1163_s0 + $0x60] sm:$0xff]  ;;  %v119_v13 = vld [vmem:[%s1163_s0 + $0x68] sm:$0xff]  ;;  %v121_v14 = vld [vmem:[%s1163_s0 + $0x70] sm:$0xff] }
   0x6   :  { %102 = vst [vmem:[#allocation0 + $0x38] sm:$0xff] %v101_v4  ;;  %v123_v15 = vld [vmem:[%s1163_s0 + $0x78] sm:$0xff]  ;;  %v125_v16 = vld [vmem:[%s1163_s0 + $0x80] sm:$0xff]  ;;  %v127_v17 = vld [vmem:[%s1163_s0 + $0x88] sm:$0xff] }
   0x7   :  { %104 = vst [vmem:[#allocation0 + $0x40] sm:$0xff] %v103_v5  ;;  %v129_v18 = vld [vmem:[%s1163_s0 + $0x90] sm:$0xff]  ;;  %v131_v19 = vld [vmem:[%s1163_s0 + $0x98] sm:$0xff]  ;;  %v133_v20 = vld [vmem:[%s1163_s0 + $0xa0] sm:$0xff] }
   0x8   :  { %106 = vst [vmem:[#allocation0 + $0x50] sm:$0xff] %v105_v6  ;;  %v135_v21 = vld [vmem:[%s1163_s0 + $0xa8] sm:$0xff]  ;;  %v137_v22 = vld [vmem:[%s1163_s0 + $0xb0] sm:$0xff]  ;;  %v139_v23 = vld [vmem:[%s1163_s0 + $0xb8] sm:$0xff] }
   0x9   :  { %108 = vst [vmem:[#allocation0 + $0x58] sm:$0xff] %v107_v7  ;;  %v141_v24 = vld [vmem:[%s1163_s0 + $0xc0] sm:$0xff]  ;;  %v143_v25 = vld [vmem:[%s1163_s0 + $0xc8] sm:$0xff]  ;;  %v145_v27 = vld [vmem:[%s1163_s0 + $0xd0] sm:$0xff] }
   0xa   :  { %110 = vst [vmem:[#allocation0 + $0x68] sm:$0xff] %v109_v8  ;;  %v147_v28 = vld [vmem:[%s1163_s0 + $0xd8] sm:$0xff]  ;;  %v149_v29 = vld [vmem:[%s1163_s0 + $0xe0] sm:$0xff]  ;;  %v162_v30 = vld [vmem:[#allocation0 + $0xf] ss:$-1 sm:$0xff] }
   0xb   :  { %112 = vst [vmem:[#allocation0 + $0x70] sm:$0xff] %v111_v9  ;;  %v151_v31 = vld [vmem:[%s1163_s0 + $0xe8] sm:$0xff]  ;;  %v167_v32 = vld [vmem:[#allocation0 + $0x17] ss:$-1 sm:$0xff]  ;;  %v155_v36 = vld [vmem:[%s1163_s0 + $0xf8] sm:$0xff]  ;;  %v163_v37 = vrot.slane %v162_v30, 4 }
   0xc   :  { %114 = vst [vmem:[#allocation0 + $0x80] sm:$0xff] %v113_v10  ;;  %v153_v34 = vld [vmem:[%s1163_s0 + $0xf0] sm:$0xff]  ;;  %v180_v38 = vld [vmem:[#allocation0 + $0xf] ss:$-1 sm:$0xff]  ;;  %v168_v39 = vrot.slane %v167_v32, 4 }
   0xd   :  { %116 = vst [vmem:[#allocation0 + $0x88] sm:$0xff] %v115_v11  ;;  %v190_v40 = vld [vmem:[#allocation0 + $0x27] ss:$-1 sm:$0xff]  ;;  %v195_v42 = vld [vmem:[#allocation0 + $0x2f] ss:$-1 sm:$0xff]  ;;  %v181_v43 = vrot.slane %v180_v38, 4 }
   0xe   :  { %118 = vst [vmem:[#allocation0 + $0x98] sm:$0xff] %v117_v12  ;;  %v191_v45 = vrot.slane %v190_v40, 4  ;;  %v208_v46 = vld [vmem:[#allocation0 + $0x27] ss:$-1 sm:$0xff]  ;;  %v196_v47 = vrot.slane %v195_v42, 4 }
   0xf   :  { %120 = vst [vmem:[#allocation0 + $0xa0] sm:$0xff] %v119_v13  ;;  %v218_v48 = vld [vmem:[#allocation0 + $0x3f] ss:$-1 sm:$0xff]  ;;  %v223_v50 = vld [vmem:[#allocation0 + $0x47] ss:$-1 sm:$0xff]  ;;  %v209_v51 = vrot.slane %v208_v46, 4 }
  0x10   :  { %122 = vst [vmem:[#allocation0 + $0xb0] sm:$0xff] %v121_v14  ;;  %v219_v53 = vrot.slane %v218_v48, 4  ;;  %v236_v54 = vld [vmem:[#allocation0 + $0x3f] ss:$-1 sm:$0xff]  ;;  %v224_v55 = vrot.slane %v223_v50, 4 }
  0x11   :  { %124 = vst [vmem:[#allocation0 + $0xb8] sm:$0xff] %v123_v15  ;;  %v246_v56 = vld [vmem:[#allocation0 + $0x57] ss:$-1 sm:$0xff]  ;;  %v251_v58 = vld [vmem:[#allocation0 + $0x5f] ss:$-1 sm:$0xff]  ;;  %v237_v59 = vrot.slane %v236_v54, 4 }
  0x12   :  { %126 = vst [vmem:[#allocation0 + $0xc8] sm:$0xff] %v125_v16  ;;  %v259_v60 = vld [vmem:[#allocation0 + $0x4f] ss:$-1 sm:$0xff]  ;;  %v247_v61 = vrot.slane %v246_v56, 4  ;;  %v264_v62 = vld [vmem:[#allocation0 + $0x57] ss:$-1 sm:$0xff] }
  0x13   :  { %128 = vst [vmem:[#allocation0 + $0xd0] sm:$0xff] %v127_v17  ;;  %v252_v63 = vrot.slane %v251_v58, 4  ;;  %v274_v0 = vld [vmem:[#allocation0 + $0x6f] ss:$-1 sm:$0xff]  ;;  %v260_v1 = vrot.slane %v259_v60, 4  ;;  %v265_v3 = vrot.slane %v264_v62, 4 }
  0x14   :  { %130 = vst [vmem:[#allocation0 + $0xe0] sm:$0xff] %v129_v18  ;;  %v279_v2 = vld [vmem:[#allocation0 + $0x77] ss:$-1 sm:$0xff]  ;;  %v287_v4 = vld [vmem:[#allocation0 + $0x67] ss:$-1 sm:$0xff]  ;;  %v275_v5 = vrot.slane %v274_v0, 4 }
  0x15   :  { %132 = vst [vmem:[#allocation0 + $0xe8] sm:$0xff] %v131_v19  ;;  %v292_v6 = vld [vmem:[#allocation0 + $0x6f] ss:$-1 sm:$0xff]  ;;  %v280_v7 = vrot.slane %v279_v2, 4  ;;  %v302_v8 = vld [vmem:[#allocation0 + $0x87] ss:$-1 sm:$0xff] }
  0x16   :  { %134 = vst [vmem:[#allocation0 + $0xf8] sm:$0xff] %v133_v20  ;;  %v288_v9 = vrot.slane %v287_v4, 4  ;;  %v307_v10 = vld [vmem:[#allocation0 + $0x8f] ss:$-1 sm:$0xff]  ;;  %v293_v11 = vrot.slane %v292_v6, 4  ;;  %v303_v13 = vrot.slane %v302_v8, 4 }
  0x17   :  { %136 = vst [vmem:[#allocation0 + $0x100] sm:$0xff] %v135_v21  ;;  %v315_v12 = vld [vmem:[#allocation0 + $0x7f] ss:$-1 sm:$0xff]  ;;  %v320_v14 = vld [vmem:[#allocation0 + $0x87] ss:$-1 sm:$0xff]  ;;  %v308_v15 = vrot.slane %v307_v10, 4 }
  0x18   :  { %138 = vst [vmem:[#allocation0 + $0x110] sm:$0xff] %v137_v22  ;;  %v330_v16 = vld [vmem:[#allocation0 + $0x9f] ss:$-1 sm:$0xff]  ;;  %v316_v17 = vrot.slane %v315_v12, 4  ;;  %v335_v18 = vld [vmem:[#allocation0 + $0xa7] ss:$-1 sm:$0xff] }
  0x19   :  { %140 = vst [vmem:[#allocation0 + $0x118] sm:$0xff] %v139_v23  ;;  %v321_v19 = vrot.slane %v320_v14, 4  ;;  %v343_v20 = vld [vmem:[#allocation0 + $0x97] ss:$-1 sm:$0xff]  ;;  %v331_v21 = vrot.slane %v330_v16, 4  ;;  %v336_v23 = vrot.slane %v335_v18, 4 }
  0x1a   :  { %142 = vst [vmem:[#allocation0 + $0x128] sm:$0xff] %v141_v24  ;;  %v348_v22 = vld [vmem:[#allocation0 + $0x9f] ss:$-1 sm:$0xff]  ;;  %v358_v24 = vld [vmem:[#allocation0 + $0xb7] ss:$-1 sm:$0xff] }
  0x1b   :  { %144 = vst [vmem:[#allocation0 + $0x130] sm:$0xff] %v143_v25  ;;  %v344_v25 = vrot.slane %v343_v20, 4  ;;  %v363_v26 = vld [vmem:[#allocation0 + $0xbf] ss:$-1 sm:$0xff]  ;;  %v376_v30 = vld [vmem:[#allocation0 + $0xb7] ss:$-1 sm:$0xff] }
  0x1c   :  { %146 = vst [vmem:[#allocation0 + $0x140] sm:$0xff] %v145_v27  ;;  %v349_v27 = vrot.slane %v348_v22, 4  ;;  %v386_v32 = vld [vmem:[#allocation0 + $0xcf] ss:$-1 sm:$0xff]  ;;  %v391_v35 = vld [vmem:[#allocation0 + $0xd7] ss:$-1 sm:$0xff] }
  0x1d   :  { %148 = vst [vmem:[#allocation0 + $0x148] sm:$0xff] %v147_v28  ;;  %v371_v28 = vld [vmem:[#allocation0 + $0xaf] ss:$-1 sm:$0xff]  ;;  %v387_v38 = vrot.slane %v386_v32, 4  ;;  %v392_v40 = vrot.slane %v391_v35, 4 }
  0x1e   :  { %150 = vst [vmem:[#allocation0 + $0x158] sm:$0xff] %v149_v29  ;;  %v359_v29 = vrot.slane %v358_v24, 4 }
  0x1f   :  { %152 = vst [vmem:[#allocation0 + $0x160] sm:$0xff] %v151_v31  ;;  %v364_v31 = vrot.slane %v363_v26, 4 }
  0x20   :  { %154 = vst [vmem:[#allocation0 + $0x170] sm:$0xff] %v153_v34  ;;  %v372_v34 = vrot.slane %v371_v28, 4 }
  0x21   :  { %156 = vst [vmem:[#allocation0 + $0x178] sm:$0xff] %v155_v36  ;;  %v377_v36 = vrot.slane %v376_v30, 4 }
  0x22   :  { %164 = vst [vmem:[#allocation1] sm:$0xff] %v163_v37  ;;  %v399_v37 = vld [vmem:[#allocation0 + $0xc7] ss:$-1 sm:$0xff] }
  0x23   :  { %172 = vst.msk [vmem:[#allocation1] sm:$0xff] %vm171_vm0, %v168_v39  ;;  %v404_v39 = vld [vmem:[#allocation0 + $0xcf] ss:$-1 sm:$0xff]  ;;  %v400_v42 = vrot.slane %v399_v37, 4 }
  0x24   :  { %177 = vst [vmem:[#allocation1 + $0x8] sm:$0xff] %v176_v41  ;;  %v414_v41 = vld [vmem:[#allocation0 + $0xe7] ss:$-1 sm:$0xff]  ;;  %v405_v44 = vrot.slane %v404_v39, 4 }
  0x25   :  { %185 = vst.msk [vmem:[#allocation1 + $0x8] sm:$0xff] %vm171_vm0, %v181_v43  ;;  %v419_v43 = vld [vmem:[#allocation0 + $0xef] ss:$-1 sm:$0xff]  ;;  %v415_v46 = vrot.slane %v414_v41, 4 }
  0x26   :  { %192 = vst [vmem:[#allocation1 + $0x10] sm:$0xff] %v191_v45  ;;  %v427_v45 = vld [vmem:[#allocation0 + $0xdf] ss:$-1 sm:$0xff]  ;;  %v420_v48 = vrot.slane %v419_v43, 4 }
  0x27   :  { %200 = vst.msk [vmem:[#allocation1 + $0x10] sm:$0xff] %vm171_vm0, %v196_v47  ;;  %v432_v47 = vld [vmem:[#allocation0 + $0xe7] ss:$-1 sm:$0xff]  ;;  %v428_v50 = vrot.slane %v427_v45, 4 }
  0x28   :  { %205 = vst [vmem:[#allocation1 + $0x18] sm:$0xff] %v204_v49  ;;  %v442_v49 = vld [vmem:[#allocation0 + $0xff] ss:$-1 sm:$0xff]  ;;  %v433_v52 = vrot.slane %v432_v47, 4 }
  0x29   :  { %213 = vst.msk [vmem:[#allocation1 + $0x18] sm:$0xff] %vm171_vm0, %v209_v51  ;;  %v447_v51 = vld [vmem:[#allocation0 + $0x107] ss:$-1 sm:$0xff]  ;;  %v443_v54 = vrot.slane %v442_v49, 4 }
  0x2a   :  { %220 = vst [vmem:[#allocation1 + $0x20] sm:$0xff] %v219_v53  ;;  %v455_v53 = vld [vmem:[#allocation0 + $0xf7] ss:$-1 sm:$0xff]  ;;  %v448_v56 = vrot.slane %v447_v51, 4 }
  0x2b   :  { %228 = vst.msk [vmem:[#allocation1 + $0x20] sm:$0xff] %vm171_vm0, %v224_v55  ;;  %v460_v55 = vld [vmem:[#allocation0 + $0xff] ss:$-1 sm:$0xff]  ;;  %v456_v58 = vrot.slane %v455_v53, 4 }
  0x2c   :  { %233 = vst [vmem:[#allocation1 + $0x28] sm:$0xff] %v232_v57  ;;  %v470_v57 = vld [vmem:[#allocation0 + $0x117] ss:$-1 sm:$0xff]  ;;  %v461_v60 = vrot.slane %v460_v55, 4  ;;  %v698_v37 = vld [vmem:[#allocation1 + $0x8] sm:$0xff] }
  0x2d   :  { %241 = vst.msk [vmem:[#allocation1 + $0x28] sm:$0xff] %vm171_vm0, %v237_v59  ;;  %v475_v59 = vld [vmem:[#allocation0 + $0x11f] ss:$-1 sm:$0xff]  ;;  %v471_v62 = vrot.slane %v470_v57, 4 }
  0x2e   :  { %248 = vst [vmem:[#allocation1 + $0x30] sm:$0xff] %v247_v61  ;;  %v483_v61 = vld [vmem:[#allocation0 + $0x10f] ss:$-1 sm:$0xff]  ;;  %v476_v0 = vrot.slane %v475_v59, 4  ;;  %v700_v33 = vld [vmem:[#allocation1 + $0x10] sm:$0xff] }
  0x2f   :  { %256 = vst.msk [vmem:[#allocation1 + $0x30] sm:$0xff] %vm171_vm0, %v252_v63  ;;  %v488_v63 = vld [vmem:[#allocation0 + $0x117] ss:$-1 sm:$0xff]  ;;  %v484_v2 = vrot.slane %v483_v61, 4 }
  0x30   :  { %261 = vst [vmem:[#allocation1 + $0x38] sm:$0xff] %v260_v1  ;;  %v498_v1 = vld [vmem:[#allocation0 + $0x12f] ss:$-1 sm:$0xff]  ;;  %v489_v4 = vrot.slane %v488_v63, 4 }
  0x31   :  { %269 = vst.msk [vmem:[#allocation1 + $0x38] sm:$0xff] %vm171_vm0, %v265_v3  ;;  %v503_v3 = vld [vmem:[#allocation0 + $0x137] ss:$-1 sm:$0xff]  ;;  %v499_v6 = vrot.slane %v498_v1, 4 }
  0x32   :  { %276 = vst [vmem:[#allocation1 + $0x40] sm:$0xff] %v275_v5  ;;  %v511_v5 = vld [vmem:[#allocation0 + $0x127] ss:$-1 sm:$0xff]  ;;  %v504_v8 = vrot.slane %v503_v3, 4 }
  0x33   :  { %284 = vst.msk [vmem:[#allocation1 + $0x40] sm:$0xff] %vm171_vm0, %v280_v7  ;;  %v516_v7 = vld [vmem:[#allocation0 + $0x12f] ss:$-1 sm:$0xff]  ;;  %v512_v10 = vrot.slane %v511_v5, 4  ;;  %v704_v39 = vld [vmem:[#allocation1 + $0x20] sm:$0xff] }
  0x34   :  { %289 = vst [vmem:[#allocation1 + $0x48] sm:$0xff] %v288_v9  ;;  %v526_v9 = vld [vmem:[#allocation0 + $0x147] ss:$-1 sm:$0xff]  ;;  %v517_v12 = vrot.slane %v516_v7, 4 }
  0x35   :  { %297 = vst.msk [vmem:[#allocation1 + $0x48] sm:$0xff] %vm171_vm0, %v293_v11  ;;  %v531_v11 = vld [vmem:[#allocation0 + $0x14f] ss:$-1 sm:$0xff]  ;;  %v527_v14 = vrot.slane %v526_v9, 4 }
  0x36   :  { %304 = vst [vmem:[#allocation1 + $0x50] sm:$0xff] %v303_v13  ;;  %v539_v13 = vld [vmem:[#allocation0 + $0x13f] ss:$-1 sm:$0xff]  ;;  %v532_v16 = vrot.slane %v531_v11, 4  ;;  %v708_v41 = vld [vmem:[#allocation1 + $0x30] sm:$0xff] }
  0x37   :  { %312 = vst.msk [vmem:[#allocation1 + $0x50] sm:$0xff] %vm171_vm0, %v308_v15  ;;  %v544_v15 = vld [vmem:[#allocation0 + $0x147] ss:$-1 sm:$0xff]  ;;  %v540_v18 = vrot.slane %v539_v13, 4 }
  0x38   :  { %317 = vst [vmem:[#allocation1 + $0x58] sm:$0xff] %v316_v17  ;;  %v554_v17 = vld [vmem:[#allocation0 + $0x15f] ss:$-1 sm:$0xff]  ;;  %v545_v20 = vrot.slane %v544_v15, 4 }
  0x39   :  { %325 = vst.msk [vmem:[#allocation1 + $0x58] sm:$0xff] %vm171_vm0, %v321_v19  ;;  %v559_v19 = vld [vmem:[#allocation0 + $0x167] ss:$-1 sm:$0xff]  ;;  %v555_v22 = vrot.slane %v554_v17, 4 }
  0x3a   :  { %332 = vst [vmem:[#allocation1 + $0x60] sm:$0xff] %v331_v21  ;;  %v567_v21 = vld [vmem:[#allocation0 + $0x157] ss:$-1 sm:$0xff]  ;;  %v560_v24 = vrot.slane %v559_v19, 4  ;;  %v712_v43 = vld [vmem:[#allocation1 + $0x40] sm:$0xff] }
  0x3b   :  { %340 = vst.msk [vmem:[#allocation1 + $0x60] sm:$0xff] %vm171_vm0, %v336_v23  ;;  %v572_v23 = vld [vmem:[#allocation0 + $0x15f] ss:$-1 sm:$0xff]  ;;  %v568_v26 = vrot.slane %v567_v21, 4 }
  0x3c   :  { %345 = vst [vmem:[#allocation1 + $0x68] sm:$0xff] %v344_v25  ;;  %v582_v25 = vld [vmem:[#allocation0 + $0x177] ss:$-1 sm:$0xff]  ;;  %v573_v28 = vrot.slane %v572_v23, 4 }
  0x3d   :  { %353 = vst.msk [vmem:[#allocation1 + $0x68] sm:$0xff] %vm171_vm0, %v349_v27  ;;  %v587_v27 = vld [vmem:[#allocation0 + $0x17f] ss:$-1 sm:$0xff]  ;;  %v583_v30 = vrot.slane %v582_v25, 4 }
  0x3e   :  { %360 = vst [vmem:[#allocation1 + $0x70] sm:$0xff] %v359_v29  ;;  %v595_v29 = vld [vmem:[#allocation0 + $0x16f] ss:$-1 sm:$0xff]  ;;  %v588_v32 = vrot.slane %v587_v27, 4  ;;  %v716_v45 = vld [vmem:[#allocation1 + $0x50] sm:$0xff] }
  0x3f   :  { %368 = vst.msk [vmem:[#allocation1 + $0x70] sm:$0xff] %vm171_vm0, %v364_v31  ;;  %v600_v31 = vld [vmem:[#allocation0 + $0x177] ss:$-1 sm:$0xff] }
  0x40   :  { %373 = vst [vmem:[#allocation1 + $0x78] sm:$0xff] %v372_v34  ;;  %v596_v34 = vrot.slane %v595_v29, 4  ;;  %v601_v35 = vrot.slane %v600_v31, 4 }
  0x41   :  { %381 = vst.msk [vmem:[#allocation1 + $0x78] sm:$0xff] %vm171_vm0, %v377_v36  ;;  %v696_v36 = vld [vmem:[#allocation1] sm:$0xff] }
  0x42   :  { %388 = vst [vmem:[#allocation1 + $0x80] sm:$0xff] %v387_v38  ;;  %v702_v38 = vld [vmem:[#allocation1 + $0x18] sm:$0xff]  ;;  %v720_v47 = vld [vmem:[#allocation1 + $0x60] sm:$0xff] }
  0x43   :  { %396 = vst.msk [vmem:[#allocation1 + $0x80] sm:$0xff] %vm171_vm0, %v392_v40  ;;  %v706_v40 = vld [vmem:[#allocation1 + $0x28] sm:$0xff] }
  0x44   :  { %401 = vst [vmem:[#allocation1 + $0x88] sm:$0xff] %v400_v42  ;;  %v710_v42 = vld [vmem:[#allocation1 + $0x38] sm:$0xff] }
  0x45   :  { %409 = vst.msk [vmem:[#allocation1 + $0x88] sm:$0xff] %vm171_vm0, %v405_v44  ;;  %v714_v44 = vld [vmem:[#allocation1 + $0x48] sm:$0xff] }
  0x46   :  { %416 = vst [vmem:[#allocation1 + $0x90] sm:$0xff] %v415_v46  ;;  %v718_v46 = vld [vmem:[#allocation1 + $0x58] sm:$0xff]  ;;  %v724_v49 = vld [vmem:[#allocation1 + $0x70] sm:$0xff] }
  0x47   :  { %424 = vst.msk [vmem:[#allocation1 + $0x90] sm:$0xff] %vm171_vm0, %v420_v48  ;;  %v722_v48 = vld [vmem:[#allocation1 + $0x68] sm:$0xff] }
  0x48   :  { %429 = vst [vmem:[#allocation1 + $0x98] sm:$0xff] %v428_v50  ;;  %v726_v50 = vld [vmem:[#allocation1 + $0x78] sm:$0xff] }
  0x49   :  { %437 = vst.msk [vmem:[#allocation1 + $0x98] sm:$0xff] %vm171_vm0, %v433_v52 }
  0x4a   :  { %444 = vst [vmem:[#allocation1 + $0xa0] sm:$0xff] %v443_v54  ;;  %v728_v51 = vld [vmem:[#allocation1 + $0x80] sm:$0xff] }
  0x4b   :  { %452 = vst.msk [vmem:[#allocation1 + $0xa0] sm:$0xff] %vm171_vm0, %v448_v56 }
  0x4c   :  { %457 = vst [vmem:[#allocation1 + $0xa8] sm:$0xff] %v456_v58  ;;  %v730_v52 = vld [vmem:[#allocation1 + $0x88] sm:$0xff] }
  0x4d   :  { %465 = vst.msk [vmem:[#allocation1 + $0xa8] sm:$0xff] %vm171_vm0, %v461_v60 }
  0x4e   :  { %472 = vst [vmem:[#allocation1 + $0xb0] sm:$0xff] %v471_v62  ;;  %v732_v53 = vld [vmem:[#allocation1 + $0x90] sm:$0xff] }
  0x4f   :  { %480 = vst.msk [vmem:[#allocation1 + $0xb0] sm:$0xff] %vm171_vm0, %v476_v0 }
  0x50   :  { %485 = vst [vmem:[#allocation1 + $0xb8] sm:$0xff] %v484_v2  ;;  %v734_v54 = vld [vmem:[#allocation1 + $0x98] sm:$0xff] }
  0x51   :  { %493 = vst.msk [vmem:[#allocation1 + $0xb8] sm:$0xff] %vm171_vm0, %v489_v4 }
  0x52   :  { %500 = vst [vmem:[#allocation1 + $0xc0] sm:$0xff] %v499_v6  ;;  %v736_v55 = vld [vmem:[#allocation1 + $0xa0] sm:$0xff] }
  0x53   :  { %508 = vst.msk [vmem:[#allocation1 + $0xc0] sm:$0xff] %vm171_vm0, %v504_v8 }
  0x54   :  { %513 = vst [vmem:[#allocation1 + $0xc8] sm:$0xff] %v512_v10  ;;  %v738_v56 = vld [vmem:[#allocation1 + $0xa8] sm:$0xff] }
  0x55   :  { %521 = vst.msk [vmem:[#allocation1 + $0xc8] sm:$0xff] %vm171_vm0, %v517_v12 }
  0x56   :  { %528 = vst [vmem:[#allocation1 + $0xd0] sm:$0xff] %v527_v14  ;;  %v740_v57 = vld [vmem:[#allocation1 + $0xb0] sm:$0xff] }
  0x57   :  { %536 = vst.msk [vmem:[#allocation1 + $0xd0] sm:$0xff] %vm171_vm0, %v532_v16 }
  0x58   :  { %541 = vst [vmem:[#allocation1 + $0xd8] sm:$0xff] %v540_v18  ;;  %v742_v58 = vld [vmem:[#allocation1 + $0xb8] sm:$0xff] }
  0x59   :  { %549 = vst.msk [vmem:[#allocation1 + $0xd8] sm:$0xff] %vm171_vm0, %v545_v20 }
  0x5a   :  { %556 = vst [vmem:[#allocation1 + $0xe0] sm:$0xff] %v555_v22  ;;  %v744_v59 = vld [vmem:[#allocation1 + $0xc0] sm:$0xff] }
  0x5b   :  { %564 = vst.msk [vmem:[#allocation1 + $0xe0] sm:$0xff] %vm171_vm0, %v560_v24 }
  0x5c   :  { %569 = vst [vmem:[#allocation1 + $0xe8] sm:$0xff] %v568_v26  ;;  %v746_v60 = vld [vmem:[#allocation1 + $0xc8] sm:$0xff] }
  0x5d   :  { %577 = vst.msk [vmem:[#allocation1 + $0xe8] sm:$0xff] %vm171_vm0, %v573_v28 }
  0x5e   :  { %584 = vst [vmem:[#allocation1 + $0xf0] sm:$0xff] %v583_v30  ;;  %v748_v61 = vld [vmem:[#allocation1 + $0xd0] sm:$0xff] }
  0x5f   :  { %592 = vst.msk [vmem:[#allocation1 + $0xf0] sm:$0xff] %vm171_vm0, %v588_v32 }
  0x60   :  { %597 = vst [vmem:[#allocation1 + $0xf8] sm:$0xff] %v596_v34  ;;  %v750_v62 = vld [vmem:[#allocation1 + $0xd8] sm:$0xff] }
  0x61   :  { %605 = vst.msk [vmem:[#allocation1 + $0xf8] sm:$0xff] %vm171_vm0, %v601_v35 }
  0x62   :  { %697 = vst [vmem:[%s1164_s1] sm:$0xff] %v696_v36  ;;  %v752_v63 = vld [vmem:[#allocation1 + $0xe0] sm:$0xff] }
  0x63   :  { %699 = vst [vmem:[%s1164_s1 + $0x8] sm:$0xff] %v698_v37 }
  0x64   :  { %701 = vst [vmem:[%s1164_s1 + $0x10] sm:$0xff] %v700_v33  ;;  %v754_v0 = vld [vmem:[#allocation1 + $0xe8] sm:$0xff] }
  0x65   :  { %703 = vst [vmem:[%s1164_s1 + $0x18] sm:$0xff] %v702_v38 }
  0x66   :  { %705 = vst [vmem:[%s1164_s1 + $0x20] sm:$0xff] %v704_v39  ;;  %v756_v1 = vld [vmem:[#allocation1 + $0xf0] sm:$0xff] }
  0x67   :  { %707 = vst [vmem:[%s1164_s1 + $0x28] sm:$0xff] %v706_v40 }
  0x68   :  { %709 = vst [vmem:[%s1164_s1 + $0x30] sm:$0xff] %v708_v41  ;;  %v758_v2 = vld [vmem:[#allocation1 + $0xf8] sm:$0xff] }
  0x69   :  { %711 = vst [vmem:[%s1164_s1 + $0x38] sm:$0xff] %v710_v42 }
  0x6a   :  { %713 = vst [vmem:[%s1164_s1 + $0x40] sm:$0xff] %v712_v43 }
  0x6b   :  { %715 = vst [vmem:[%s1164_s1 + $0x48] sm:$0xff] %v714_v44 }
  0x6c   :  { %717 = vst [vmem:[%s1164_s1 + $0x50] sm:$0xff] %v716_v45 }
  0x6d   :  { %719 = vst [vmem:[%s1164_s1 + $0x58] sm:$0xff] %v718_v46 }
  0x6e   :  { %721 = vst [vmem:[%s1164_s1 + $0x60] sm:$0xff] %v720_v47 }
  0x6f   :  { %723 = vst [vmem:[%s1164_s1 + $0x68] sm:$0xff] %v722_v48 }
  0x70   :  { %725 = vst [vmem:[%s1164_s1 + $0x70] sm:$0xff] %v724_v49 }
  0x71   :  { %727 = vst [vmem:[%s1164_s1 + $0x78] sm:$0xff] %v726_v50 }
  0x72   :  { %729 = vst [vmem:[%s1164_s1 + $0x80] sm:$0xff] %v728_v51 }
  0x73   :  { %731 = vst [vmem:[%s1164_s1 + $0x88] sm:$0xff] %v730_v52 }
  0x74   :  { %733 = vst [vmem:[%s1164_s1 + $0x90] sm:$0xff] %v732_v53 }
  0x75   :  { %735 = vst [vmem:[%s1164_s1 + $0x98] sm:$0xff] %v734_v54 }
  0x76   :  { %737 = vst [vmem:[%s1164_s1 + $0xa0] sm:$0xff] %v736_v55 }
  0x77   :  { %739 = vst [vmem:[%s1164_s1 + $0xa8] sm:$0xff] %v738_v56 }
  0x78   :  { %741 = vst [vmem:[%s1164_s1 + $0xb0] sm:$0xff] %v740_v57 }
  0x79   :  { %743 = vst [vmem:[%s1164_s1 + $0xb8] sm:$0xff] %v742_v58 }
  0x7a   :  { %745 = vst [vmem:[%s1164_s1 + $0xc0] sm:$0xff] %v744_v59 }
  0x7b   :  { %747 = vst [vmem:[%s1164_s1 + $0xc8] sm:$0xff] %v746_v60 }
  0x7c   :  { %749 = vst [vmem:[%s1164_s1 + $0xd0] sm:$0xff] %v748_v61 }
  0x7d   :  { %751 = vst [vmem:[%s1164_s1 + $0xd8] sm:$0xff] %v750_v62 }
  0x7e   :  { %753 = vst [vmem:[%s1164_s1 + $0xe0] sm:$0xff] %v752_v63 }
  0x7f   :  { %755 = vst [vmem:[%s1164_s1 + $0xe8] sm:$0xff] %v754_v0 }
  0x80   :  { %757 = vst [vmem:[%s1164_s1 + $0xf0] sm:$0xff] %v756_v1 }
  0x81   :  { %759 = vst [vmem:[%s1164_s1 + $0xf8] sm:$0xff] %v758_v2 }

// kernel: fno2d_forward.8
= control target key start
LH: loop header
LB: loop body
LE: loop exit
PB: predicated region body
PF: predicated region fallthrough
CT: control target
= control target key end

     0   :  { %s1008_s15 = smov 0   ;;  %s1010_s16 = smov 0   ;;  %s1348_s0 = inlined_call_operand.vmem [shape: f32[2,8,625], index: 0, kind: input, shape index: {}]   ;;  %s1349_s1 = inlined_call_operand.vmem [shape: f32[8,8], index: 1, kind: input, shape index: {}]   ;;  %s1350_s2 = inlined_call_operand.vmem [shape: f32[8,1], index: 2, kind: input, shape index: {}]   ;;  %s1351_s3 = inlined_call_operand.vmem [shape: f32[2,8,625], index: 3, kind: input, shape index: {}]   ;;  %s1352_s4 = inlined_call_operand.vmem [shape: f32[2,8,625], index: 4, kind: output, shape index: {}]  }
   0x1   :  { %s1012_s17 = smov 0  }
   0x2 LB: > { %s26_s18 = sadd.s32 1, %s968_s16  ;;  %p869_p0 = scmp.ge.s32.totalorder %s972_s17, 1  ;;  %s972_s17 = sphi %s1012_s17, %s14_s17   ;;  %s968_s16 = sphi %s1010_s16, %s1361_s16   ;;  %s964_s15 = sphi %s1008_s15, %s1360_s15  }
   0x3   : > { %p28_p1 = scmp.ge.s32.totalorder %s26_s18, 2  ;;  %p200_p2 = scmp.lt.s32.totalorder %s972_s17, 3 }
   0x5   : > { %s1363_s18 = smov (%p28_p1, %s26_s18), 0  ;;  %p201_p3 = pnand %p869_p0, %p200_p2 }
   0x6   : > { %p244_p4 = scmp.lt.s32.totalorder (!%p201_p3), %s964_s15, 1 }
   0x7   : > { %204 = sbr.rel (%p201_p3) target bundleno = 230 (0xe6), region = 36 }
   0xc   : > { %v289_v0 = vld [vmem:[%s1349_s1] sm:$0xff]  ;;  %v974_v1 = vmov 0   ;;  %v975_v2 = vmov 2   ;;  %v976_v3 = vmov 4   ;;  %v977_v4 = vmov 1   ;;  %s1365_s15 = smov (!%p244_p4, %s964_s15), 1 }
   0xd   : > { %928 = vset.pattern.permute.xlu0 %v974_v1  ;;  %930 = vset.pattern.permute.xlu1 %v975_v2  ;;  %v978_v5 = vmov 3   ;;  %v979_v6 = vmov 5   ;;  %v278_v7 = vld [vmem:[%s1350_s2] sm:$0xff]  ;;  %v980_v8 = vmov 6   ;;  %v981_v9 = vmov 7   ;;  %s1036_s23 = smul.u32 40, %s1365_s15 }
   0xe   : > { %295 = vperm.xlu0 %928, %v289_v0   ;;  %353 = vperm.xlu1 %930, %v289_v0   ;;  %v982_v37 = vmov 1.4142135  }
   0xf   : > { %932 = vset.pattern.permute.xlu2 %v976_v3  ;;  %s1042_s26 = scalar_lea.vmem %s1348_s0, %s1036_s23  ;;  %938 = vrcp.f32 %v982_v37  ;;  %s1161_s29 = scalar_lea.vmem %s1351_s3, %s1036_s23 }
  0x10   : > { %411 = vperm.xlu2 %932, %v289_v0   ;;  %v290_v10 = vld [vmem:[%s1042_s26] ss:$8 sm:$0xf]  ;;  %v875_v13 = vld [vmem:[%s1042_s26 + $0x2] ss:$8 sm:$0xf]  ;;  %s1321_s6 = scalar_lea.vmem %s1352_s4, %s1036_s23 }
  0x11   : > { %v291_v11 = vld [vmem:[%s1042_s26] ss:$8 sm:$0x10]  ;;  %v876_v14 = vld [vmem:[%s1042_s26 + $0x2] ss:$8 sm:$0x10] }
  0x12   : > { %v1046_v12 = vor.u32 %v291_v11, %v290_v10  ;;  %v879_v15 = vld [vmem:[%s1042_s26 + $0x4] ss:$8 sm:$0xf]  ;;  %v1052_v17 = vor.u32 %v876_v14, %v875_v13  ;;  %v873_v21 = vld [vmem:[%s1042_s26 + $0x1] ss:$8 sm:$0xf] }
  0x13   : > { %v880_v16 = vld [vmem:[%s1042_s26 + $0x4] ss:$8 sm:$0x10]  ;;  %v874_v22 = vld [vmem:[%s1042_s26 + $0x1] ss:$8 sm:$0x10] }
  0x14   : > { %v299_v18 = vperm.slane %v1046_v12, 0  ;;  %v300_v19 = vperm.slane %v1046_v12, 1  ;;  %v409_v20 = vor.u32 %v880_v16, %v879_v15  ;;  %v301_v23 = vperm.slane %v1046_v12, 2  ;;  %v881_v32 = vld [vmem:[%s1042_s26 + $0x5] ss:$8 sm:$0xf] }
  0x15   : > { %v302_v24 = vperm.slane %v1046_v12, 3  ;;  %v303_v25 = vperm.slane %v1046_v12, 4  ;;  %v357_v27 = vperm.slane %v1052_v17, 0  ;;  %v358_v28 = vperm.slane %v1052_v17, 1  ;;  %v1086_v54 = vpop.eup %938 }
  0x16   : > { %929 = vset.pattern.permute.xlu0 %v977_v4  ;;  %931 = vset.pattern.permute.xlu1 %v978_v5  ;;  %v359_v29 = vperm.slane %v1052_v17, 2  ;;  %v360_v30 = vperm.slane %v1052_v17, 3  ;;  %v1065_v31 = vor.u32 %v874_v22, %v873_v21  ;;  %v882_v33 = vld [vmem:[%s1042_s26 + $0x5] ss:$8 sm:$0x10]  ;;  %v361_v34 = vperm.slane %v1052_v17, 4 }
  0x17   : > { %324 = vperm.xlu0 %929, %v289_v0   ;;  %382 = vperm.xlu1 %931, %v289_v0   ;;  %v415_v35 = vperm.slane %v409_v20, 0  ;;  %v416_v36 = vperm.slane %v409_v20, 1  ;;  %v877_v38 = vld [vmem:[%s1042_s26 + $0x3] ss:$8 sm:$0xf]  ;;  %v417_v40 = vperm.slane %v409_v20, 2  ;;  %v1072_v43 = vor.u32 %v882_v33, %v881_v32 }
  0x18   : > { %933 = vset.pattern.permute.xlu2 %v979_v6  ;;  %v878_v39 = vld [vmem:[%s1042_s26 + $0x3] ss:$8 sm:$0x10]  ;;  %v418_v41 = vperm.slane %v409_v20, 3  ;;  %v419_v42 = vperm.slane %v409_v20, 4  ;;  %v328_v44 = vperm.slane %v1065_v31, 0  ;;  %vm537_vm0 = vweird.f32 %v1086_v54 }
  0x19   : > { %440 = vperm.xlu2 %933, %v289_v0   ;;  %v329_v45 = vperm.slane %v1065_v31, 1  ;;  %v330_v46 = vperm.slane %v1065_v31, 2  ;;  %v331_v47 = vperm.slane %v1065_v31, 3  ;;  %v1078_v48 = vor.u32 %v878_v39, %v877_v38  ;;  %v883_v49 = vld [vmem:[%s1042_s26 + $0x6] ss:$8 sm:$0xf] }
  0x1a   : > { %v884_v50 = vld [vmem:[%s1042_s26 + $0x6] ss:$8 sm:$0x10]  ;;  %v885_v52 = vld [vmem:[%s1042_s26 + $0x7] ss:$8 sm:$0xf] }
  0x1b   : > { %v886_v53 = vld [vmem:[%s1042_s26 + $0x7] ss:$8 sm:$0x10]  ;;  %v444_v59 = vperm.slane %v1072_v43, 0  ;;  %v445_v60 = vperm.slane %v1072_v43, 1  ;;  %v446_v63 = vperm.slane %v1072_v43, 2 }
  0x1c   : > { %v332_v3 = vperm.slane %v1065_v31, 4  ;;  %v386_v4 = vperm.slane %v1078_v48, 0  ;;  %v1106_v5 = vor.u32 %v886_v53, %v885_v52  ;;  %v387_v6 = vperm.slane %v1078_v48, 1 }
  0x1d   : > { %v390_v10 = vperm.slane %v1078_v48, 4 }
  0x1e   : > { %v502_v32 = vperm.slane %v1106_v5, 0  ;;  %v503_v33 = vperm.slane %v1106_v5, 1 }
  0x1f   : > { %934 = vset.pattern.permute.xlu1 %v980_v8  ;;  %936 = vset.pattern.permute.xlu0 %v974_v1  ;;  %v1100_v1 = vor.u32 %v884_v50, %v883_v49  ;;  %v389_v8 = vperm.slane %v1078_v48, 3 }
  0x20   : > { %469 = vperm.xlu1 %934, %v289_v0   ;;  %281 = vperm.xlu0 %936, %v278_v7   ;;  %v388_v7 = vperm.slane %v1078_v48, 2 }
  0x21   : > { %935 = vset.pattern.permute.xlu2 %v981_v9  ;;  %v473_v20 = vperm.slane %v1100_v1, 0  ;;  %v474_v21 = vperm.slane %v1100_v1, 1  ;;  %v475_v22 = vperm.slane %v1100_v1, 2 }
  0x22   : > { %498 = vperm.xlu2 %935, %v289_v0   ;;  %v447_v0 = vperm.slane %v1072_v43, 3 }
  0x28   : > { %937 = vset.pattern.permute.xlu0 %v981_v9  ;;  %v533_v9 = vmul.f32 1.4142135, %v1086_v54 }
  0x2a   : > { %v534_v37 = vsub.f32 1.0, %v533_v9 }
  0x2c   : > { %v535_v17 = vmul.f32 %v1086_v54, %v534_v37 }
  0x6a   : > { %v412_v26 = vpop.permute.xlu2 %411 }
  0x6b   : > { %v1082_v51 = vmul.f32 %v415_v35, %v412_v26  ;;  %v1088_v57 = vmul.f32 %v416_v36, %v412_v26  ;;  %v1090_v58 = vmul.f32 %v417_v40, %v412_v26  ;;  %v1094_v61 = vmul.f32 %v418_v41, %v412_v26 }
  0x6c   : > { %v1102_v2 = vmul.f32 %v419_v42, %v412_v26  ;;  %v504_v35 = vperm.slane %v1106_v5, 2  ;;  %v505_v36 = vperm.slane %v1106_v5, 3 }
  0x73   : > { %v1096_v62 = vpop.permute.xlu2 %440 }
  0x74   : > { %v1115_v13 = vmul.f32 %v444_v59, %v1096_v62  ;;  %v1118_v14 = vmul.f32 %v445_v60, %v1096_v62  ;;  %v1121_v15 = vmul.f32 %v446_v63, %v1096_v62  ;;  %v1124_v16 = vmul.f32 %v447_v0, %v1096_v62 }
  0x7c   : > { %v499_v11 = vpop.permute.xlu2 %498 }
  0x80   : > { %v296_v55 = vpop.permute.xlu0 %295  ;;  %v354_v56 = vpop.permute.xlu1 %353 }
  0x81   : > { %v309_v38 = vmul.f32 %v299_v18, %v296_v55  ;;  %v310_v39 = vmul.f32 %v300_v19, %v296_v55  ;;  %v311_v40 = vmul.f32 %v301_v23, %v296_v55  ;;  %v312_v41 = vmul.f32 %v302_v24, %v296_v55 }
  0x82   : > { %v313_v42 = vmul.f32 %v303_v25, %v296_v55  ;;  %v367_v48 = vmul.f32 %v357_v27, %v354_v56  ;;  %v368_v49 = vmul.f32 %v358_v28, %v354_v56  ;;  %v369_v18 = vmul.f32 %v359_v29, %v354_v56 }
  0x83   : > { %v370_v24 = vmul.f32 %v360_v30, %v354_v56  ;;  %v371_v12 = vmul.f32 %v361_v34, %v354_v56 }
  0x89   : > { %v325_v50 = vpop.permute.xlu0 %324  ;;  %v383_v19 = vpop.permute.xlu1 %382 }
  0x8a   : > { %v338_v52 = vmul.f32 %v328_v44, %v325_v50  ;;  %v339_v53 = vmul.f32 %v329_v45, %v325_v50  ;;  %v340_v23 = vmul.f32 %v330_v46, %v325_v50  ;;  %v341_v59 = vmul.f32 %v331_v47, %v325_v50 }
  0x8b   : > { %v342_v25 = vmul.f32 %v332_v3, %v325_v50  ;;  %v396_v27 = vmul.f32 %v386_v4, %v383_v19  ;;  %v397_v0 = vmul.f32 %v387_v6, %v383_v19  ;;  %v398_v9 = vmul.f32 %v388_v7, %v383_v19 }
  0x8c   : > { %v343_v55 = vadd.f32 %v338_v52, %v309_v38  ;;  %v344_v60 = vadd.f32 %v339_v53, %v310_v39  ;;  %v345_v28 = vadd.f32 %v340_v23, %v311_v40  ;;  %v346_v63 = vadd.f32 %v341_v59, %v312_v41 }
  0x8d   : > { %v347_v29 = vadd.f32 %v342_v25, %v313_v42  ;;  %v399_v44 = vmul.f32 %v389_v8, %v383_v19  ;;  %v400_v26 = vmul.f32 %v390_v10, %v383_v19  ;;  %v512_v7 = vmul.f32 %v502_v32, %v499_v11  ;;  %v274_v32 = vld [vmem:[%s1161_s29 + $0x8] sm:$0xff]  ;;  %v276_v19 = vld [vmem:[%s1161_s29 + $0x18] sm:$0xff] }
  0x8e   : > { %v372_v45 = vadd.f32 %v367_v48, %v343_v55  ;;  %v373_v46 = vadd.f32 %v368_v49, %v344_v60  ;;  %v374_v47 = vadd.f32 %v369_v18, %v345_v28  ;;  %v375_v31 = vadd.f32 %v370_v24, %v346_v63  ;;  %v273_v48 = vld [vmem:[%s1161_s29] sm:$0xff] }
  0x8f   : > { %v376_v30 = vadd.f32 %v371_v12, %v347_v29  ;;  %v513_v8 = vmul.f32 %v503_v33, %v499_v11  ;;  %v514_v38 = vmul.f32 %v504_v35, %v499_v11  ;;  %v506_v24 = vperm.slane %v1106_v5, 4 }
  0x90   : > { %v401_v34 = vadd.f32 %v396_v27, %v372_v45  ;;  %v402_v56 = vadd.f32 %v397_v0, %v373_v46  ;;  %v403_v3 = vadd.f32 %v398_v9, %v374_v47  ;;  %v404_v4 = vadd.f32 %v399_v44, %v375_v31 }
  0x91   : > { %v405_v6 = vadd.f32 %v400_v26, %v376_v30  ;;  %v515_v26 = vmul.f32 %v505_v36, %v499_v11  ;;  %v1355_v55 = vperm.slane %v1100_v1, 4  ;;  %v516_v44 = vmul.f32 %v506_v24, %v499_v11 }
  0x92   : > { %v470_v10 = vpop.permute.xlu1 %469  ;;  %v430_v37 = vadd.f32 %v1082_v51, %v401_v34  ;;  %v431_v39 = vadd.f32 %v1088_v57, %v402_v56  ;;  %v432_v40 = vadd.f32 %v1090_v58, %v403_v3  ;;  %v433_v41 = vadd.f32 %v1094_v61, %v404_v4  ;;  %v282_v42 = vpop.permute.xlu0 %281  ;;  %v275_v57 = vld [vmem:[%s1161_s29 + $0x10] sm:$0xff] }
  0x93   : > { %v483_v49 = vmul.f32 %v473_v20, %v470_v10  ;;  %v484_v31 = vmul.f32 %v474_v21, %v470_v10  ;;  %v485_v18 = vmul.f32 %v475_v22, %v470_v10  ;;  %v434_v58 = vadd.f32 %v1102_v2, %v405_v6 }
  0x94   : > { %v459_v33 = vadd.f32 %v1115_v13, %v430_v37  ;;  %v460_v35 = vadd.f32 %v1118_v14, %v431_v39  ;;  %v461_v51 = vadd.f32 %v1121_v15, %v432_v40  ;;  %v462_v50 = vadd.f32 %v1124_v16, %v433_v41 }
  0x95   : > { %v1353_v61 = vperm.slane %v1100_v1, 3  ;;  %v536_v20 = vadd.f32 %v1086_v54, %v535_v17  ;;  %v284_v21 = vadd.f32 %v282_v42, %v273_v48  ;;  %v285_v13 = vadd.f32 %v282_v42, %v274_v32 }
  0x96   : > { %v488_v22 = vadd.f32 %v483_v49, %v459_v33  ;;  %v489_v36 = vadd.f32 %v484_v31, %v460_v35  ;;  %v490_v53 = vadd.f32 %v485_v18, %v461_v51  ;;  %v1354_v14 = vperm.slane %v1072_v43, 4 }
  0x97   : > { %v486_v52 = vmul.f32 %v1353_v61, %v470_v10  ;;  %v286_v16 = vadd.f32 %v282_v42, %v275_v57  ;;  %v287_v59 = vadd.f32 %v282_v42, %v276_v19  ;;  %v487_v60 = vmul.f32 %v1355_v55, %v470_v10 }
  0x98   : > { %v458_v15 = vmul.f32 %v1354_v14, %v1096_v62  ;;  %v517_v2 = vadd.f32 %v512_v7, %v488_v22  ;;  %v518_v12 = vadd.f32 %v513_v8, %v489_v36  ;;  %v519_v25 = vadd.f32 %v514_v38, %v490_v53 }
  0x99   : > { %v491_v23 = vadd.f32 %v486_v52, %v462_v50  ;;  %v538_v63 = vsel %vm537_vm0, %v1086_v54, %v536_v20  ;;  %v277_v54 = vld [vmem:[%s1161_s29 + $0x20] sm:$0xff] }
  0x9a   : > { %v463_v27 = vadd.f32 %v458_v15, %v434_v58  ;;  %v1188_v43 = vadd.f32 %v517_v2, %v284_v21  ;;  %v1190_v62 = vadd.f32 %v518_v12, %v285_v13  ;;  %v1192_v29 = vadd.f32 %v519_v25, %v286_v16 }
  0x9b   : > { %v520_v28 = vadd.f32 %v515_v26, %v491_v23  ;;  %v288_v3 = vadd.f32 %v282_v42, %v277_v54 }
  0x9c   : > { %v1197_v0 = vmul.f32 %v538_v63, %v1188_v43  ;;  %v492_v9 = vadd.f32 %v487_v60, %v463_v27  ;;  %v1200_v1 = vmul.f32 %v538_v63, %v1190_v62  ;;  %v1203_v45 = vmul.f32 %v538_v63, %v1192_v29 }
  0x9d   : > { %v1194_v5 = vadd.f32 %v520_v28, %v287_v59 }
  0x9e   : > { %v544_v47 = vmul.f32 %v1197_v0, %v1197_v0  ;;  %v584_v30 = vmul.f32 %v1200_v1, %v1200_v1  ;;  %v624_v17 = vmul.f32 %v1203_v45, %v1203_v45  ;;  %v521_v56 = vadd.f32 %v516_v44, %v492_v9 }
  0x9f   : > { %v1207_v46 = vmul.f32 %v538_v63, %v1194_v5 }
  0xa0   : > { %v1215_v11 = vmin.f32 %v544_v47, 16.0  ;;  %v1219_v4 = vmin.f32 %v584_v30, 16.0  ;;  %v1221_v6 = vmin.f32 %v624_v17, 16.0  ;;  %v1231_v48 = vadd.f32 %v521_v56, %v288_v3 }
  0xa1   : > { %v664_v34 = vmul.f32 %v1207_v46, %v1207_v46 }
  0xa2   : > { %v546_v7 = vmul.f32 2.1237322e-06, %v1215_v11  ;;  %v557_v8 = vmul.f32 3.8918573e-05, %v1215_v11  ;;  %v586_v10 = vmul.f32 2.1237322e-06, %v1219_v4  ;;  %v1242_v21 = vmul.f32 %v538_v63, %v1231_v48 }
  0xa3   : > { %v1225_v38 = vmin.f32 %v664_v34, 16.0  ;;  %v597_v37 = vmul.f32 3.8918573e-05, %v1219_v4  ;;  %v626_v39 = vmul.f32 2.1237322e-06, %v1221_v6 }
  0xa4   : > { %v547_v40 = vadd.f32 0.00028619796, %v546_v7  ;;  %v558_v41 = vadd.f32 0.001143296, %v557_v8  ;;  %v637_v42 = vmul.f32 3.8918573e-05, %v1221_v6 }
  0xa5   : > { %v587_v49 = vadd.f32 0.00028619796, %v586_v10  ;;  %v598_v31 = vadd.f32 0.001143296, %v597_v37  ;;  %v627_v18 = vadd.f32 0.00028619796, %v626_v39 }
  0xa6   : > { %v548_v26 = vmul.f32 %v547_v40, %v1215_v11  ;;  %v559_v32 = vmul.f32 %v558_v41, %v1215_v11  ;;  %v638_v33 = vadd.f32 0.001143296, %v637_v42  ;;  %v666_v35 = vmul.f32 2.1237322e-06, %v1225_v38 }
  0xa7   : > { %v588_v51 = vmul.f32 %v587_v49, %v1219_v4  ;;  %v599_v50 = vmul.f32 %v598_v31, %v1219_v4  ;;  %v628_v57 = vmul.f32 %v627_v18, %v1221_v6  ;;  %v677_v19 = vmul.f32 3.8918573e-05, %v1225_v38 }
  0xa8   : > { %v549_v58 = vadd.f32 0.0036580483, %v548_v26  ;;  %v560_v61 = vadd.f32 0.014752088, %v559_v32  ;;  %v639_v52 = vmul.f32 %v638_v33, %v1221_v6  ;;  %v667_v20 = vadd.f32 0.00028619796, %v666_v35 }
  0xa9   : > { %v589_v22 = vadd.f32 0.0036580483, %v588_v51  ;;  %v600_v36 = vadd.f32 0.014752088, %v599_v50  ;;  %v629_v53 = vadd.f32 0.0036580483, %v628_v57  ;;  %v704_v31 = vmul.f32 %v1242_v21, %v1242_v21 }
  0xaa   : > { %v550_v13 = vmul.f32 %v549_v58, %v1215_v11  ;;  %v561_v14 = vmul.f32 %v560_v61, %v1215_v11  ;;  %v640_v15 = vadd.f32 0.014752088, %v639_v52  ;;  %v668_v23 = vmul.f32 %v667_v20, %v1225_v38 }
  0xab   : > { %v590_v16 = vmul.f32 %v589_v22, %v1219_v4  ;;  %v601_v59 = vmul.f32 %v600_v36, %v1219_v4  ;;  %v630_v24 = vmul.f32 %v629_v53, %v1221_v6  ;;  %v678_v2 = vadd.f32 0.001143296, %v677_v19 }
  0xac   : > { %v551_v12 = vadd.f32 0.05243302, %v550_v13  ;;  %v562_v25 = vadd.f32 0.112945676, %v561_v14  ;;  %v641_v27 = vmul.f32 %v640_v15, %v1221_v6  ;;  %v669_v55 = vadd.f32 0.0036580483, %v668_v23 }
  0xad   : > { %v591_v60 = vadd.f32 0.05243302, %v590_v16  ;;  %v602_v28 = vadd.f32 0.112945676, %v601_v59  ;;  %v631_v63 = vadd.f32 0.05243302, %v630_v24  ;;  %v679_v9 = vmul.f32 %v678_v2, %v1225_v38 }
  0xae   : > { %v552_v44 = vmul.f32 %v551_v12, %v1215_v11  ;;  %v563_v54 = vmul.f32 %v562_v25, %v1215_v11  ;;  %v642_v47 = vadd.f32 0.112945676, %v641_v27  ;;  %v670_v30 = vmul.f32 %v669_v55, %v1225_v38 }
  0xaf   : > { %v592_v17 = vmul.f32 %v591_v60, %v1219_v4  ;;  %v603_v34 = vmul.f32 %v602_v28, %v1219_v4  ;;  %v632_v56 = vmul.f32 %v631_v63, %v1221_v6  ;;  %v680_v3 = vadd.f32 0.014752088, %v679_v9 }
  0xb0   : > { %v553_v7 = vadd.f32 0.18741608, %v552_v44  ;;  %v564_v8 = vadd.f32 0.4994258, %v563_v54  ;;  %v643_v10 = vmul.f32 %v642_v47, %v1221_v6  ;;  %v671_v37 = vadd.f32 0.05243302, %v670_v30 }
  0xb1   : > { %v593_v39 = vadd.f32 0.18741608, %v592_v17  ;;  %v604_v40 = vadd.f32 0.4994258, %v603_v34  ;;  %v681_v41 = vmul.f32 %v680_v3, %v1225_v38  ;;  %v633_v32 = vadd.f32 0.18741608, %v632_v56 }
  0xb2   : > { %v565_v42 = vmul.f32 %v564_v8, %v1215_v11  ;;  %v644_v49 = vadd.f32 0.4994258, %v643_v10  ;;  %v554_v18 = vmul.f32 %v553_v7, %v1215_v11  ;;  %v672_v51 = vmul.f32 %v671_v37, %v1225_v38 }
  0xb3   : > { %v605_v26 = vmul.f32 %v604_v40, %v1219_v4  ;;  %v682_v33 = vadd.f32 0.112945676, %v681_v41  ;;  %v594_v50 = vmul.f32 %v593_v39, %v1219_v4  ;;  %v1269_v61 = vmin.f32 %v704_v31, 16.0 }
  0xb4   : > { %v566_v35 = vadd.f32 1.0, %v565_v42  ;;  %v645_v19 = vmul.f32 %v644_v49, %v1221_v6  ;;  %v555_v52 = vadd.f32 1.1283791, %v554_v18  ;;  %v634_v11 = vmul.f32 %v633_v32, %v1221_v6 }
  0xb5   : > { %v606_v57 = vadd.f32 1.0, %v605_v26  ;;  %v683_v58 = vmul.f32 %v682_v33, %v1225_v38  ;;  %v673_v20 = vadd.f32 0.18741608, %v672_v51  ;;  %v1273_v22 = vmul.f32 0.5, %v1188_v43 }
  0xb6   : > { %940 = vrcp.f32 %v566_v35  ;;  %v595_v36 = vadd.f32 1.1283791, %v594_v50  ;;  %v1275_v53 = vadd.f32 1.0, %v645_v19  ;;  %v576_v13 = vand.u32 2147483647, %v566_v35 }
  0xb7   : > { %942 = vrcp.f32 %v606_v57  ;;  %v684_v4 = vadd.f32 0.4994258, %v683_v58  ;;  %v706_v14 = vmul.f32 2.1237322e-06, %v1269_v61  ;;  %v717_v15 = vmul.f32 3.8918573e-05, %v1269_v61 }
  0xb8   : > { %v556_v23 = vmul.f32 %v555_v52, %v1197_v0  ;;  %vm572_vm1 = vweird.f32 %v566_v35  ;;  %v635_v16 = vadd.f32 1.1283791, %v634_v11  ;;  %944 = vrcp.f32 %v1275_v53 }
  0xb9   : > { %v578_v59 = vand.u32 2147483648, %v566_v35  ;;  %v685_v43 = vmul.f32 %v684_v4, %v1225_v38  ;;  %v707_v24 = vadd.f32 0.00028619796, %v706_v14  ;;  %v718_v2 = vadd.f32 0.001143296, %v717_v15 }
  0xba   : > { %v596_v27 = vmul.f32 %v595_v36, %v1200_v1  ;;  %vm612_vm2 = vweird.f32 %v606_v57  ;;  %v616_v55 = vand.u32 2147483647, %v606_v57  ;;  %vm1283_vm3 = vcmp.eq.f32.partialorder %v576_v13, 8.507059e+37 }
  0xbb   : > { %v618_v28 = vand.u32 2147483648, %v606_v57  ;;  %v1287_v63 = vadd.f32 1.0, %v685_v43  ;;  %v636_v44 = vmul.f32 %v635_v16, %v1203_v45  ;;  %v708_v54 = vmul.f32 %v707_v24, %v1269_v61 }
  0xbc   : > { %v941_v6 = vpop.eup %940  ;;  %v719_v47 = vmul.f32 %v718_v2, %v1269_v61  ;;  %v579_v30 = vor.u32 1.1754944e-38, %v578_v59  ;;  %v674_v1 = vmul.f32 %v673_v20, %v1225_v38  ;;  %vm1294_vm5 = vcmp.eq.f32.partialorder %v616_v55, 8.507059e+37 }
  0xbd   : > { %v943_v12 = vpop.eup %942  ;;  %v568_v25 = vmul.f32 %v941_v6, %v566_v35  ;;  %946 = vrcp.f32 %v1287_v63  ;;  %vm573_vm4 = vweird.f32 %v941_v6  ;;  %v709_v10 = vadd.f32 0.0036580483, %v708_v54 }
  0xbe   : > { %v608_v0 = vmul.f32 %v943_v12, %v606_v57  ;;  %v945_v34 = vpop.eup %944  ;;  %v720_v7 = vadd.f32 0.014752088, %v719_v47  ;;  %vm613_vm6 = vweird.f32 %v943_v12  ;;  %v619_v39 = vor.u32 1.1754944e-38, %v618_v28  ;;  %vm574_vm7 = vmor %vm572_vm1, %vm573_vm4 }
  0xbf   : > { %v569_v9 = vsub.f32 1.0, %v568_v25  ;;  %v648_v45 = vmul.f32 %v945_v34, %v1275_v53  ;;  %v656_v40 = vand.u32 2147483647, %v1275_v53  ;;  %vm652_vm8 = vweird.f32 %v1275_v53  ;;  %vm614_vm9 = vmor %vm612_vm2, %vm613_vm6 }
  0xc0   : > { %v609_v17 = vsub.f32 1.0, %v608_v0  ;;  %v721_v38 = vmul.f32 %v720_v7, %v1269_v61  ;;  %v658_v49 = vand.u32 2147483648, %v1275_v53  ;;  %vm653_vm10 = vweird.f32 %v945_v34 }
  0xc1   : > { %v570_v56 = vmul.f32 %v941_v6, %v569_v9  ;;  %v649_v42 = vsub.f32 1.0, %v648_v45  ;;  %v675_v18 = vadd.f32 1.1283791, %v674_v1  ;;  %v710_v35 = vmul.f32 %v709_v10, %v1269_v61  ;;  %vm654_vm12 = vmor %vm652_vm8, %vm653_vm10 }
  0xc2   : > { %v610_v8 = vmul.f32 %v943_v12, %v609_v17  ;;  %v722_v26 = vadd.f32 0.112945676, %v721_v38  ;;  %vm657_vm11 = vcmp.eq.f32.partialorder %v656_v40, 8.507059e+37  ;;  %v659_v20 = vor.u32 1.1754944e-38, %v658_v49 }
  0xc3   : > { %v571_v37 = vadd.f32 %v941_v6, %v570_v56  ;;  %v947_v32 = vpop.eup %946  ;;  %v650_v50 = vmul.f32 %v945_v34, %v649_v42  ;;  %v696_v14 = vand.u32 2147483647, %v1287_v63  ;;  %v698_v15 = vand.u32 2147483648, %v1287_v63 }
  0xc4   : > { %v611_v41 = vadd.f32 %v943_v12, %v610_v8  ;;  %v688_v52 = vmul.f32 %v947_v32, %v1287_v63  ;;  %v723_v36 = vmul.f32 %v722_v26, %v1269_v61  ;;  %vm693_vm13 = vweird.f32 %v947_v32 }
  0xc5   : > { %v575_v31 = vsel %vm574_vm7, %v941_v6, %v571_v37  ;;  %v651_v11 = vadd.f32 %v945_v34, %v650_v50  ;;  %v711_v6 = vadd.f32 0.05243302, %v710_v35  ;;  %v528_v53 = vmul.f32 0.5, %v1190_v62 }
  0xc6   : > { %v580_v33 = vsel %vm1283_vm3, %v579_v30, %v575_v31  ;;  %v615_v51 = vsel %vm614_vm9, %v943_v12, %v611_v41  ;;  %v689_v13 = vsub.f32 1.0, %v688_v52  ;;  %v724_v59 = vadd.f32 0.4994258, %v723_v36 }
  0xc7   : > { %v581_v19 = vmul.f32 %v580_v33, %v556_v23  ;;  %v620_v58 = vsel %vm1294_vm5, %v619_v39, %v615_v51  ;;  %v655_v16 = vsel %vm654_vm12, %v945_v34, %v651_v11  ;;  %vm692_vm14 = vweird.f32 %v1287_v63 }
  0xc8   : > { %v621_v57 = vmul.f32 %v620_v58, %v596_v27  ;;  %v660_v43 = vsel %vm657_vm11, %v659_v20, %v655_v16  ;;  %v690_v24 = vmul.f32 %v947_v32, %v689_v13  ;;  %v725_v25 = vmul.f32 %v724_v59, %v1269_v61  ;;  %vm694_vm15 = vmor %vm692_vm14, %vm693_vm13 }
  0xc9   : > { %v887_v4 = vclamps-f32 %v581_v19, 1.0  ;;  %v661_v12 = vmul.f32 %v660_v43, %v636_v44  ;;  %v699_v28 = vor.u32 1.1754944e-38, %v698_v15  ;;  %v676_v47 = vmul.f32 %v675_v18, %v1207_v46 }
  0xca   : > { %v888_v23 = vclamps-f32 %v621_v57, 1.0  ;;  %v691_v55 = vadd.f32 %v947_v32, %v690_v24  ;;  %v726_v9 = vadd.f32 1.0, %v725_v25  ;;  %vm697_vm0 = vcmp.eq.f32.partialorder %v696_v14, 8.507059e+37 }
  0xcb   : > { %v744_v2 = vadd.f32 1.0, %v887_v4  ;;  %v889_v0 = vclamps-f32 %v661_v12, 1.0  ;;  %v712_v44 = vmul.f32 %v711_v6, %v1269_v61  ;;  %v529_v63 = vmul.f32 0.5, %v1192_v29 }
  0xcc   : > { %v745_v27 = vadd.f32 1.0, %v888_v23  ;;  %v695_v62 = vsel %vm694_vm15, %v947_v32, %v691_v55  ;;  %948 = vrcp.f32 %v726_v9  ;;  %v530_v3 = vmul.f32 0.5, %v1194_v5 }
  0xcd   : > { %v749_v60 = vmul.f32 %v744_v2, %v1273_v22  ;;  %v700_v30 = vsel %vm697_vm0, %v699_v28, %v695_v62  ;;  %v746_v17 = vadd.f32 1.0, %v889_v0  ;;  %v713_v34 = vadd.f32 0.18741608, %v712_v44 }
  0xce   : > { %v750_v54 = vmul.f32 %v745_v27, %v528_v53  ;;  %v701_v22 = vmul.f32 %v700_v30, %v676_v47  ;;  %v738_v39 = vand.u32 2147483648, %v726_v9  ;;  %v736_v29 = vand.u32 2147483647, %v726_v9 }
  0xcf   : > { %754 = vst [vmem:[%s1321_s6] sm:$0xff] %v749_v60  ;;  %v751_v56 = vmul.f32 %v746_v17, %v529_v63  ;;  %v714_v8 = vmul.f32 %v713_v34, %v1269_v61  ;;  %vm732_vm2 = vweird.f32 %v726_v9  ;;  %v531_v26 = vmul.f32 0.5, %v1231_v48 }
  0xd0   : > { %755 = vst [vmem:[%s1321_s6 + $0x8] sm:$0xff] %v750_v54  ;;  %v890_v1 = vclamps-f32 %v701_v22, 1.0  ;;  %v739_v42 = vor.u32 1.1754944e-38, %v738_v39  ;;  %vm737_vm4 = vcmp.eq.f32.partialorder %v736_v29, 8.507059e+37  ;;  %vm758_vm5 = vcmask 924672  }
  0xd1   : > { %756 = vst [vmem:[%s1321_s6 + $0x10] sm:$0xff] %v751_v56  ;;  %v715_v40 = vadd.f32 1.1283791, %v714_v8 }
  0xd2   : > { %v747_v46 = vadd.f32 1.0, %v890_v1  ;;  %v949_v7 = vpop.eup %948 }
  0xd3   : > { %v728_v45 = vmul.f32 %v949_v7, %v726_v9  ;;  %vm733_vm1 = vweird.f32 %v949_v7  ;;  %v716_v5 = vmul.f32 %v715_v40, %v1242_v21 }
  0xd4   : > { %v752_v10 = vmul.f32 %v747_v46, %v530_v3  ;;  %vm734_vm3 = vmor %vm732_vm2, %vm733_vm1 }
  0xd5   : > { %v729_v37 = vsub.f32 1.0, %v728_v45 }
  0xd6   : > { %757 = vst [vmem:[%s1321_s6 + $0x18] sm:$0xff] %v752_v10 }
  0xd7   : > { %v730_v38 = vmul.f32 %v949_v7, %v729_v37 }
  0xd9   : > { %v731_v41 = vadd.f32 %v949_v7, %v730_v38 }
  0xdb   : > { %v735_v49 = vsel %vm734_vm3, %v949_v7, %v731_v41 }
  0xdc   : > { %v740_v31 = vsel %vm737_vm4, %v739_v42, %v735_v49 }
  0xdd   : > { %v741_v61 = vmul.f32 %v740_v31, %v716_v5 }
  0xdf   : > { %v891_v18 = vclamps-f32 %v741_v61, 1.0 }
  0xe1   : > { %v748_v32 = vadd.f32 1.0, %v891_v18 }
  0xe3   : > { %v753_v33 = vmul.f32 %v748_v32, %v531_v26 }
  0xe5   : > { %759 = vst.msk [vmem:[%s1321_s6 + $0x20] sm:$0xff] %vm758_vm5, %v753_v33 }
  0xe6 PF: > { %s14_s17 = sadd.s32 1, %s972_s17   ;;  %s1360_s15 = smov %s968_s16 }
  0xe7   : > { %p11_p5 = scmp.ge.s32.totalorder %s14_s17, 4   ;;  %s1361_s16 = smov %s1363_s18 }
  0xe9   :  { %13 = sbr.rel (!%p11_p5) target bundleno = 2 (0x2), region = 76 }

// kernel: fno2d_forward.11
= control target key start
LH: loop header
LB: loop body
LE: loop exit
PB: predicated region body
PF: predicated region fallthrough
CT: control target
= control target key end

     0   :  { %s2783_s18 = smov 0   ;;  %s2785_s19 = smov 0   ;;  %s5097_s0 = inlined_call_operand.vmem [shape: f32[2,8,625], index: 0, kind: input, shape index: {}]   ;;  %s5098_s1 = inlined_call_operand.vmem [shape: f32[32,8], index: 1, kind: input, shape index: {}]   ;;  %s5099_s2 = inlined_call_operand.vmem [shape: f32[32,1], index: 2, kind: input, shape index: {}]   ;;  %s5100_s3 = inlined_call_operand.vmem [shape: f32[4,32], index: 3, kind: input, shape index: {}]   ;;  %s5101_s4 = inlined_call_operand.vmem [shape: f32[4,1], index: 4, kind: input, shape index: {}]   ;;  %s5102_s5 = inlined_call_operand.vmem [shape: f32[2,4,625], index: 5, kind: output, shape index: {}]  }
   0x1   :  { %s2787_s20 = smov 0  }
   0x2 LB: > { %s27_s21 = sadd.s32 1, %s2714_s19  ;;  %p2497_p0 = scmp.ge.s32.totalorder %s2718_s20, 1  ;;  %s2718_s20 = sphi %s2787_s20, %s15_s20   ;;  %s2714_s19 = sphi %s2785_s19, %s5255_s19   ;;  %s2710_s18 = sphi %s2783_s18, %s5254_s18  }
   0x3   : > { %p29_p1 = scmp.ge.s32.totalorder %s27_s21, 2  ;;  %p208_p2 = scmp.lt.s32.totalorder %s2718_s20, 3 }
   0x5   : > { %s5257_s21 = smov (%p29_p1, %s27_s21), 0  ;;  %p209_p3 = pnand %p2497_p0, %p208_p2 }
   0x7   : > { %212 = sbr.rel (%p209_p3) target bundleno = 576 (0x240), region = 40 }
   0xc   : > { %v2806_v0 = vld [vmem:[%s5098_s1 + $0x10] sm:$0xff]  ;;  %v2811_v1 = vld [vmem:[%s5098_s1] sm:$0xff]  ;;  %v2720_v2 = vmov 1   ;;  %v5103_v3 = vmov 0   ;;  %v267_v4 = vld [vmem:[%s5098_s1 + $0x18] sm:$0xff]  ;;  %v2722_v6 = vmov 2  }
   0xd   : > { %2597 = vset.pattern.permute.xlu2 %v2720_v2  ;;  %2596 = vset.pattern.permute.xlu1 %v5103_v3  ;;  %v265_v5 = vld [vmem:[%s5098_s1 + $0x8] sm:$0xff]  ;;  %v2723_v7 = vmov 3   ;;  %v2724_v8 = vmov 4   ;;  %v2725_v9 = vmov 5   ;;  %v2726_v10 = vmov 6   ;;  %p245_p4 = scmp.lt.s32.totalorder %s2710_s18, 1 }
   0xe   : > { %2595 = vset.pattern.permute.xlu0 %v5103_v3  ;;  %283 = vperm.xlu1 %2596, %v2806_v0   ;;  %v2727_v11 = vmov 7   ;;  %v2850_v12 = vld [vmem:[%s5100_s3] sm:$0xf]  ;;  %v2728_v13 = vmov 10   ;;  %v2729_v16 = vmov 15   ;;  %v840_v17 = vld [vmem:[%s5099_s2 + $0x8] sm:$0xff] }
   0xf   : > { %347 = vperm.xlu2 %2597, %v2811_v1   ;;  %273 = vperm.xlu0 %2595, %v2811_v1   ;;  %v839_v18 = vld [vmem:[%s5099_s2] sm:$0xff]  ;;  %s5259_s18 = smov (!%p245_p4, %s2710_s18), 1  ;;  %v2730_v20 = vmov 20   ;;  %v842_v21 = vld [vmem:[%s5099_s2 + $0x18] sm:$0xff]  ;;  %v841_v22 = vld [vmem:[%s5099_s2 + $0x10] sm:$0xff]  ;;  %v2731_v30 = vmov 25  }
  0x10   : > { %s2536_s13 = smul.u32 40, %s5259_s18  ;;  %v2732_v49 = vmov 30  }
  0x11   : > { %s2537_s27 = smul.u32 20, %s5259_s18 }
  0x12   : > { %s2893_s22 = scalar_lea.vmem %s5097_s0, %s2536_s13 }
  0x13   : > { %v2500_v25 = vld [vmem:[%s2893_s22 + $0x1] ss:$8 sm:$0xf]  ;;  %v268_v28 = vld [vmem:[%s2893_s22] ss:$8 sm:$0xf]  ;;  %s262_s30 = scalar_lea.vmem %s5102_s5, %s2537_s27 }
  0x14   : > { %v2501_v26 = vld [vmem:[%s2893_s22 + $0x1] ss:$8 sm:$0x10]  ;;  %v269_v29 = vld [vmem:[%s2893_s22] ss:$8 sm:$0x10] }
  0x15   : > { %v2502_v31 = vld [vmem:[%s2893_s22 + $0x2] ss:$8 sm:$0xf]  ;;  %v345_v33 = vor.u32 %v2501_v26, %v2500_v25  ;;  %v270_v34 = vor.u32 %v269_v29, %v268_v28 }
  0x16   : > { %288 = vperm.xlu1 %2596, %v267_v4   ;;  %v2503_v32 = vld [vmem:[%s2893_s22 + $0x2] ss:$8 sm:$0x10] }
  0x17   : > { %351 = vperm.xlu2 %2597, %v265_v5   ;;  %278 = vperm.xlu0 %2595, %v265_v5   ;;  %v416_v35 = vor.u32 %v2503_v32, %v2502_v31  ;;  %v2910_v38 = vperm.slane %v345_v33, 0  ;;  %v2912_v39 = vperm.slane %v345_v33, 1  ;;  %v2914_v40 = vperm.slane %v270_v34, 0 }
  0x18   : > { %v2916_v41 = vperm.slane %v270_v34, 1  ;;  %v2918_v42 = vperm.slane %v270_v34, 2  ;;  %v2920_v43 = vperm.slane %v270_v34, 3  ;;  %v2922_v44 = vperm.slane %v270_v34, 4 }
  0x19   : > { %v2926_v46 = vperm.slane %v345_v33, 2  ;;  %v2928_v47 = vperm.slane %v345_v33, 3  ;;  %v2930_v48 = vperm.slane %v416_v35, 0  ;;  %v2932_v50 = vperm.slane %v416_v35, 1 }
  0x1a   : > { %v2934_v51 = vperm.slane %v416_v35, 2  ;;  %v2936_v52 = vperm.slane %v416_v35, 3  ;;  %v2938_v53 = vperm.slane %v416_v35, 4  ;;  %v2956_v62 = vperm.slane %v345_v33, 4 }
  0x1e   : > { %2599 = vset.pattern.permute.xlu1 %v2720_v2 }
  0x1f   : > { %2600 = vset.pattern.permute.xlu2 %v2722_v6  ;;  %2598 = vset.pattern.permute.xlu0 %v2720_v2 }
  0x20   : > { %359 = vperm.xlu1 %2599, %v267_v4   ;;  %418 = vperm.xlu2 %2600, %v2811_v1  }
  0x21   : > { %355 = vperm.xlu0 %2598, %v2806_v0  }
  0x28   : > { %2601 = vset.pattern.permute.xlu1 %v2722_v6  ;;  %426 = vperm.xlu2 %2600, %v2806_v0  }
  0x29   : > { %2602 = vset.pattern.permute.xlu0 %v2722_v6  ;;  %422 = vperm.xlu1 %2601, %v265_v5  }
  0x2a   : > { %430 = vperm.xlu0 %2602, %v267_v4  }
  0x30   : > { %2604 = vset.pattern.permute.xlu2 %v2723_v7 }
  0x31   : > { %2603 = vset.pattern.permute.xlu1 %v2723_v7  ;;  %493 = vperm.xlu2 %2604, %v265_v5  }
  0x32   : > { %489 = vperm.xlu1 %2603, %v2811_v1   ;;  %2605 = vset.pattern.permute.xlu0 %v2724_v8 }
  0x33   : > { %560 = vperm.xlu0 %2605, %v2811_v1  }
  0x39   : > { %501 = vperm.xlu2 %2604, %v267_v4  }
  0x3a   : > { %497 = vperm.xlu1 %2603, %v2806_v0  }
  0x3b   : > { %2609 = vset.pattern.permute.xlu0 %v2725_v9 }
  0x3c   : > { %635 = vperm.xlu0 %2609, %v265_v5  }
  0x41   : > { %2607 = vset.pattern.permute.xlu2 %v2724_v8 }
  0x42   : > { %2606 = vset.pattern.permute.xlu1 %v2724_v8  ;;  %568 = vperm.xlu2 %2607, %v2806_v0  }
  0x43   : > { %564 = vperm.xlu1 %2606, %v265_v5  }
  0x44   : > { %2613 = vset.pattern.permute.xlu0 %v2726_v10 }
  0x45   : > { %710 = vperm.xlu0 %2613, %v2806_v0  }
  0x4a   : > { %2608 = vset.pattern.permute.xlu2 %v2725_v9 }
  0x4b   : > { %572 = vperm.xlu1 %2606, %v267_v4   ;;  %631 = vperm.xlu2 %2608, %v2811_v1  }
  0x4d   : > { %2616 = vset.pattern.permute.xlu0 %v2727_v11 }
  0x4e   : > { %785 = vperm.xlu0 %2616, %v267_v4  }
  0x53   : > { %2610 = vset.pattern.permute.xlu1 %v2725_v9  ;;  %643 = vperm.xlu2 %2608, %v267_v4  }
  0x54   : > { %639 = vperm.xlu1 %2610, %v2806_v0  }
  0x56   : > { %2619 = vset.pattern.permute.xlu0 %v5103_v3 }
  0x57   : > { %1773 = vperm.xlu0 %2619, %v2850_v12  }
  0x5b   : > { %2612 = vset.pattern.permute.xlu2 %v2726_v10 }
  0x5c   : > { %2611 = vset.pattern.permute.xlu1 %v2726_v10  ;;  %706 = vperm.xlu2 %2612, %v265_v5  }
  0x5d   : > { %702 = vperm.xlu1 %2611, %v2811_v1  }
  0x5f   : > { %2624 = vset.pattern.permute.xlu0 %v2725_v9 }
  0x60   : > { %1868 = vperm.xlu0 %2624, %v2850_v12  }
  0x64   : > { %2614 = vset.pattern.permute.xlu2 %v2727_v11 }
  0x65   : > { %714 = vperm.xlu1 %2611, %v267_v4   ;;  %773 = vperm.xlu2 %2614, %v2811_v1  }
  0x68   : > { %2629 = vset.pattern.permute.xlu0 %v2728_v13 }
  0x69   : > { %v2860_v14 = vpop.permute.xlu2 %347  ;;  %1963 = vperm.xlu0 %2629, %v2850_v12  }
  0x6d   : > { %2615 = vset.pattern.permute.xlu1 %v2727_v11  ;;  %781 = vperm.xlu2 %2614, %v2806_v0  }
  0x6e   : > { %777 = vperm.xlu1 %2615, %v265_v5  }
  0x71   : > { %v2865_v15 = vpop.permute.xlu2 %351  ;;  %2634 = vset.pattern.permute.xlu0 %v2729_v16 }
  0x72   : > { %2058 = vperm.xlu0 %2634, %v2850_v12   ;;  %v2943_v54 = vmul.f32 %v2910_v38, %v2865_v15  ;;  %v2947_v55 = vmul.f32 %v2912_v39, %v2865_v15 }
  0x75   : > { %2618 = vset.pattern.permute.xlu2 %v5103_v3 }
  0x76   : > { %2617 = vset.pattern.permute.xlu1 %v5103_v3  ;;  %850 = vperm.xlu2 %2618, %v840_v17  }
  0x77   : > { %845 = vperm.xlu1 %2617, %v839_v18  }
  0x7a   : > { %v2880_v19 = vpop.permute.xlu2 %418  ;;  %2639 = vset.pattern.permute.xlu0 %v2730_v20 }
  0x7b   : > { %2153 = vperm.xlu0 %2639, %v2850_v12  }
  0x7e   : > { %860 = vperm.xlu2 %2618, %v842_v21  }
  0x7f   : > { %855 = vperm.xlu1 %2617, %v841_v22  }
  0x80   : > { %v284_v23 = vpop.permute.xlu1 %283 }
  0x81   : > { %v2895_v24 = vpop.permute.xlu0 %273  ;;  %v312_v56 = vmul.f32 %v2914_v40, %v284_v23  ;;  %v313_v57 = vmul.f32 %v2916_v41, %v284_v23  ;;  %v314_v58 = vmul.f32 %v2918_v42, %v284_v23  ;;  %v315_v59 = vmul.f32 %v2920_v43, %v284_v23 }
  0x82   : > { %v427_v27 = vpop.permute.xlu2 %426  ;;  %v316_v60 = vmul.f32 %v2922_v44, %v284_v23 }
  0x83   : > { %2644 = vset.pattern.permute.xlu0 %v2731_v30  ;;  %v454_v61 = vmul.f32 %v2930_v48, %v427_v27  ;;  %v455_v63 = vmul.f32 %v2932_v50, %v427_v27  ;;  %v456_v0 = vmul.f32 %v2934_v51, %v427_v27  ;;  %v457_v1 = vmul.f32 %v2936_v52, %v427_v27 }
  0x84   : > { %2248 = vperm.xlu0 %2644, %v2850_v12  }
  0x86   : > { %2621 = vset.pattern.permute.xlu2 %v2722_v6 }
  0x87   : > { %2620 = vset.pattern.permute.xlu1 %v2720_v2  ;;  %1811 = vperm.xlu2 %2621, %v2850_v12   ;;  %v458_v2 = vmul.f32 %v2938_v53, %v427_v27 }
  0x88   : > { %1792 = vperm.xlu1 %2620, %v2850_v12   ;;  %v289_v36 = vpop.permute.xlu1 %288 }
  0x89   : > { %v2908_v37 = vpop.permute.xlu0 %278  ;;  %v317_v4 = vmul.f32 %v2914_v40, %v289_v36  ;;  %v318_v5 = vmul.f32 %v2916_v41, %v289_v36  ;;  %v319_v6 = vmul.f32 %v2918_v42, %v289_v36  ;;  %v321_v9 = vmul.f32 %v2922_v44, %v289_v36 }
  0x8a   : > { %v307_v13 = vmul.f32 %v2914_v40, %v2908_v37 }
  0x8b   : > { %v2924_v45 = vpop.permute.xlu2 %493 }
  0x8c   : > { %2649 = vset.pattern.permute.xlu0 %v2732_v49  ;;  %v309_v49 = vmul.f32 %v2918_v42, %v2908_v37 }
  0x8d   : > { %2343 = vperm.xlu0 %2649, %v2850_v12  }
  0x8f   : > { %2623 = vset.pattern.permute.xlu2 %v2724_v8  ;;  %v320_v8 = vmul.f32 %v2920_v43, %v289_v36 }
  0x90   : > { %2622 = vset.pattern.permute.xlu1 %v2723_v7  ;;  %1849 = vperm.xlu2 %2623, %v2850_v12   ;;  %v308_v7 = vmul.f32 %v2916_v41, %v2908_v37 }
  0x91   : > { %1830 = vperm.xlu1 %2622, %v2850_v12  }
  0x92   : > { %v360_v16 = vpop.permute.xlu1 %359 }
  0x93   : > { %v388_v17 = vmul.f32 %v2910_v38, %v360_v16  ;;  %v389_v18 = vmul.f32 %v2912_v39, %v360_v16  ;;  %v390_v20 = vmul.f32 %v2926_v46, %v360_v16  ;;  %v391_v21 = vmul.f32 %v2928_v47, %v360_v16  ;;  %v356_v22 = vpop.permute.xlu0 %355  ;;  %v2978_v23 = vpop.permute.xlu2 %501 }
  0x94   : > { %v392_v25 = vmul.f32 %v2956_v62, %v360_v16  ;;  %v383_v26 = vmul.f32 %v2910_v38, %v356_v22  ;;  %v384_v27 = vmul.f32 %v2912_v39, %v356_v22  ;;  %v385_v28 = vmul.f32 %v2926_v46, %v356_v22 }
  0x95   : > { %v2984_v29 = vadd.f32 %v388_v17, %v317_v4  ;;  %v2986_v30 = vadd.f32 %v389_v18, %v318_v5  ;;  %v2988_v31 = vadd.f32 %v390_v20, %v319_v6  ;;  %v2990_v32 = vadd.f32 %v391_v21, %v320_v8  ;;  %2652 = vset.pattern.permute.xlu0 %v5103_v3  ;;  %v2504_v20 = vld [vmem:[%s2893_s22 + $0x3] ss:$8 sm:$0xf] }
  0x96   : > { %v2993_v33 = vadd.f32 %v392_v25, %v321_v9  ;;  %v386_v34 = vmul.f32 %v2928_v47, %v356_v22  ;;  %v387_v35 = vmul.f32 %v2956_v62, %v356_v22  ;;  %v403_v36 = vadd.f32 %v383_v26, %v312_v56  ;;  %v2505_v21 = vld [vmem:[%s2893_s22 + $0x3] ss:$8 sm:$0x10] }
  0x97   : > { %v310_v4 = vmul.f32 %v2920_v43, %v2908_v37  ;;  %v404_v5 = vadd.f32 %v384_v27, %v313_v57  ;;  %v405_v6 = vadd.f32 %v385_v28, %v314_v58  ;;  %v380_v8 = vmul.f32 %v2926_v46, %v2865_v15 }
  0x98   : > { %v381_v9 = vmul.f32 %v2928_v47, %v2865_v15  ;;  %v406_v16 = vadd.f32 %v386_v34, %v315_v59  ;;  %v407_v17 = vadd.f32 %v387_v35, %v316_v60  ;;  %2626 = vset.pattern.permute.xlu2 %v2727_v11  ;;  %v311_v56 = vmul.f32 %v2922_v44, %v2908_v37 }
  0x99   : > { %2625 = vset.pattern.permute.xlu1 %v2726_v10  ;;  %1906 = vperm.xlu2 %2626, %v2850_v12   ;;  %v3010_v18 = vadd.f32 %v454_v61, %v403_v36  ;;  %v3012_v57 = vadd.f32 %v455_v63, %v404_v5  ;;  %v382_v58 = vmul.f32 %v2956_v62, %v2865_v15 }
  0x9a   : > { %1887 = vperm.xlu1 %2625, %v2850_v12   ;;  %v3019_v59 = vadd.f32 %v456_v0, %v405_v6  ;;  %v3021_v11 = vadd.f32 %v457_v1, %v406_v16  ;;  %v3023_v37 = vadd.f32 %v458_v2, %v407_v17  ;;  %v398_v10 = vadd.f32 %v2943_v54, %v307_v13 }
  0x9b   : > { %v399_v60 = vadd.f32 %v2947_v55, %v308_v7  ;;  %v400_v61 = vadd.f32 %v380_v8, %v309_v49  ;;  %v401_v63 = vadd.f32 %v381_v9, %v310_v4  ;;  %v423_v22 = vpop.permute.xlu1 %422  ;;  %v402_v1 = vadd.f32 %v382_v58, %v311_v56 }
  0x9c   : > { %v449_v25 = vmul.f32 %v2930_v48, %v423_v22  ;;  %v450_v15 = vmul.f32 %v2932_v50, %v423_v22  ;;  %v451_v26 = vmul.f32 %v2934_v51, %v423_v22  ;;  %v452_v0 = vmul.f32 %v2936_v52, %v423_v22  ;;  %v3031_v27 = vpop.permute.xlu2 %568  ;;  %v431_v36 = vpop.permute.xlu0 %430 }
  0x9d   : > { %v487_v2 = vor.u32 %v2505_v21, %v2504_v20  ;;  %v453_v28 = vmul.f32 %v2938_v53, %v423_v22  ;;  %v373_v35 = vmul.f32 %v2910_v38, %v2860_v14  ;;  %v2733_v49 = vmov 9   ;;  %v2506_v20 = vld [vmem:[%s2893_s22 + $0x4] ss:$8 sm:$0xf] }
  0x9e   : > { %v3034_v54 = vadd.f32 %v449_v25, %v398_v10  ;;  %v3036_v55 = vadd.f32 %v450_v15, %v399_v60  ;;  %v3038_v13 = vadd.f32 %v451_v26, %v400_v61  ;;  %v3040_v7 = vadd.f32 %v452_v0, %v401_v63 }
  0x9f   : > { %v3042_v34 = vadd.f32 %v453_v28, %v402_v1  ;;  %v374_v4 = vmul.f32 %v2912_v39, %v2860_v14  ;;  %v375_v5 = vmul.f32 %v2926_v46, %v2860_v14  ;;  %v302_v6 = vmul.f32 %v2914_v40, %v2895_v24 }
  0xa0   : > { %v3052_v8 = vperm.slane %v487_v2, 0  ;;  %v2734_v9 = vmov 8   ;;  %v303_v38 = vmul.f32 %v2916_v41, %v2895_v24  ;;  %v3057_v16 = vperm.slane %v487_v2, 1  ;;  %v2507_v41 = vld [vmem:[%s2893_s22 + $0x4] ss:$8 sm:$0x10] }
  0xa1   : > { %2628 = vset.pattern.permute.xlu2 %v2733_v49  ;;  %v3059_v39 = vperm.slane %v487_v2, 2  ;;  %v3061_v17 = vperm.slane %v487_v2, 3  ;;  %v376_v40 = vmul.f32 %v2928_v47, %v2860_v14  ;;  %v377_v46 = vmul.f32 %v2956_v62, %v2860_v14 }
  0xa2   : > { %2627 = vset.pattern.permute.xlu1 %v2734_v9  ;;  %1944 = vperm.xlu2 %2628, %v2850_v12   ;;  %v459_v56 = vmul.f32 %v2930_v48, %v431_v36  ;;  %v460_v58 = vmul.f32 %v2932_v50, %v431_v36  ;;  %v444_v10 = vmul.f32 %v2930_v48, %v2880_v19  ;;  %v3080_v61 = vperm.slane %v487_v2, 4 }
  0xa3   : > { %1925 = vperm.xlu1 %2627, %v2850_v12   ;;  %v445_v60 = vmul.f32 %v2932_v50, %v2880_v19  ;;  %v304_v47 = vmul.f32 %v2918_v42, %v2895_v24  ;;  %v446_v62 = vmul.f32 %v2934_v51, %v2880_v19  ;;  %v305_v63 = vmul.f32 %v2920_v43, %v2895_v24 }
  0xa4   : > { %v3072_v21 = vpop.permute.xlu1 %489  ;;  %v306_v22 = vmul.f32 %v2922_v44, %v2895_v24  ;;  %v393_v48 = vadd.f32 %v373_v35, %v302_v6  ;;  %v394_v25 = vadd.f32 %v374_v4, %v303_v38  ;;  %v3090_v15 = vor.u32 %v2507_v41, %v2506_v20  ;;  %v2508_v41 = vld [vmem:[%s2893_s22 + $0x5] ss:$8 sm:$0xf] }
  0xa5   : > { %v3082_v14 = vpop.permute.xlu2 %631  ;;  %v530_v42 = vmul.f32 %v3052_v8, %v2978_v23  ;;  %v531_v50 = vmul.f32 %v3057_v16, %v2978_v23  ;;  %v479_v26 = vadd.f32 %v459_v56, %v2984_v29  ;;  %v480_v0 = vadd.f32 %v460_v58, %v2986_v30 }
  0xa6   : > { %v447_v43 = vmul.f32 %v2936_v52, %v2880_v19  ;;  %v448_v24 = vmul.f32 %v2938_v53, %v2880_v19  ;;  %v395_v44 = vadd.f32 %v375_v5, %v304_v47  ;;  %v461_v1 = vmul.f32 %v2934_v51, %v431_v36 }
  0xa7   : > { %v396_v2 = vadd.f32 %v376_v40, %v305_v63  ;;  %v397_v28 = vadd.f32 %v377_v46, %v306_v22  ;;  %v462_v35 = vmul.f32 %v2936_v52, %v431_v36  ;;  %v463_v49 = vmul.f32 %v2938_v53, %v431_v36 }
  0xa8   : > { %v2735_v4 = vmov 12   ;;  %v532_v29 = vmul.f32 %v3059_v39, %v2978_v23  ;;  %v3108_v30 = vperm.slane %v3090_v15, 2  ;;  %v3110_v6 = vadd.f32 %v444_v10, %v393_v48  ;;  %v2509_v10 = vld [vmem:[%s2893_s22 + $0x5] ss:$8 sm:$0x10] }
  0xa9   : > { %v3112_v19 = vadd.f32 %v445_v60, %v394_v25  ;;  %v2736_v5 = vmov 11   ;;  %v533_v51 = vmul.f32 %v3061_v17, %v2978_v23  ;;  %v534_v52 = vmul.f32 %v3080_v61, %v2978_v23 }
  0xaa   : > { %2631 = vset.pattern.permute.xlu2 %v2735_v4  ;;  %v3120_v36 = vadd.f32 %v530_v42, %v479_v26  ;;  %v3122_v9 = vadd.f32 %v531_v50, %v480_v0  ;;  %v481_v38 = vadd.f32 %v461_v1, %v2988_v31  ;;  %v482_v20 = vadd.f32 %v462_v35, %v2990_v32  ;;  %v2510_v35 = vld [vmem:[%s2893_s22 + $0x6] ss:$8 sm:$0xf] }
  0xab   : > { %2630 = vset.pattern.permute.xlu1 %v2736_v5  ;;  %2001 = vperm.xlu2 %2631, %v2850_v12   ;;  %v483_v23 = vadd.f32 %v463_v49, %v2993_v33  ;;  %v466_v63 = vadd.f32 %v446_v62, %v395_v44  ;;  %v598_v32 = vmul.f32 %v3108_v30, %v3031_v27  ;;  %v3152_v62 = vperm.slane %v3090_v15, 0  ;;  %v2511_v49 = vld [vmem:[%s2893_s22 + $0x6] ss:$8 sm:$0x10] }
  0xac   : > { %1982 = vperm.xlu1 %2630, %v2850_v12   ;;  %v498_v53 = vpop.permute.xlu1 %497  ;;  %v3160_v42 = vadd.f32 %v532_v29, %v481_v38  ;;  %v3162_v50 = vadd.f32 %v533_v51, %v482_v20  ;;  %v521_v26 = vmul.f32 %v3057_v16, %v2924_v45  ;;  %v522_v0 = vmul.f32 %v3059_v39, %v2924_v45 }
  0xad   : > { %v525_v40 = vmul.f32 %v3052_v8, %v498_v53  ;;  %v526_v46 = vmul.f32 %v3057_v16, %v498_v53  ;;  %v527_v56 = vmul.f32 %v3059_v39, %v498_v53  ;;  %v3128_v58 = vpop.permute.xlu2 %643  ;;  %v528_v60 = vmul.f32 %v3061_v17, %v498_v53 }
  0xae   : > { %v529_v47 = vmul.f32 %v3080_v61, %v498_v53  ;;  %v467_v44 = vadd.f32 %v447_v43, %v396_v2  ;;  %v2737_v1 = vmov 14   ;;  %v523_v4 = vmul.f32 %v3061_v17, %v2924_v45 }
  0xaf   : > { %v3137_v31 = vadd.f32 %v525_v40, %v3010_v18  ;;  %v3140_v22 = vadd.f32 %v526_v46, %v3012_v57  ;;  %v547_v48 = vadd.f32 %v527_v56, %v3019_v59  ;;  %v3146_v33 = vadd.f32 %v528_v60, %v3021_v11 }
  0xb0   : > { %v3149_v25 = vadd.f32 %v529_v47, %v3023_v37  ;;  %v3155_v18 = vperm.slane %v3090_v15, 1  ;;  %v629_v57 = vor.u32 %v2509_v10, %v2508_v41  ;;  %v3158_v59 = vperm.slane %v3090_v15, 3  ;;  %v561_v10 = vpop.permute.xlu0 %560 }
  0xb1   : > { %v3164_v11 = vadd.f32 %v534_v52, %v483_v23  ;;  %v520_v37 = vmul.f32 %v3052_v8, %v2924_v45  ;;  %v524_v29 = vmul.f32 %v3080_v61, %v2924_v45  ;;  %v3179_v5 = vperm.slane %v3090_v15, 4 }
  0xb2   : > { %5112 = vst [vmem:[#allocation2_spill] sm:$0xff] %v3149_v25  ;;  %v2738_v51 = vmov 13   ;;  %v3182_v52 = vadd.f32 %v598_v32, %v547_v48  ;;  %v468_v43 = vadd.f32 %v448_v24, %v397_v28  ;;  %v3184_v2 = vperm.slane %v629_v57, 0 }
  0xb3   : > { %2633 = vset.pattern.permute.xlu2 %v2737_v1  ;;  %v3186_v53 = vperm.slane %v629_v57, 1  ;;  %v3188_v38 = vperm.slane %v629_v57, 2  ;;  %v3195_v45 = vmul.f32 %v3152_v62, %v3031_v27  ;;  %v3197_v15 = vperm.slane %v629_v57, 3 }
  0xb4   : > { %2632 = vset.pattern.permute.xlu1 %v2738_v51  ;;  %2039 = vperm.xlu2 %2633, %v2850_v12   ;;  %5113 = vst [vmem:[#allocation3_spill] sm:$0xff] %v3182_v52  ;;  %v3199_v46 = vperm.slane %v629_v57, 4  ;;  %v3203_v24 = vor.u32 %v2511_v49, %v2510_v35  ;;  %v3207_v28 = vmul.f32 %v3155_v18, %v3031_v27  ;;  %v2740_v35 = vmov 16  }
  0xb5   : > { %2020 = vperm.xlu1 %2632, %v2850_v12   ;;  %v3191_v40 = vpop.permute.xlu1 %564  ;;  %v3211_v20 = vmul.f32 %v3158_v59, %v3031_v27  ;;  %v515_v23 = vmul.f32 %v3052_v8, %v3072_v21  ;;  %v516_v41 = vmul.f32 %v3057_v16, %v3072_v21  ;;  %v3219_v60 = vmul.f32 %v3179_v5, %v3031_v27 }
  0xb6   : > { %v3201_v56 = vpop.permute.xlu2 %706  ;;  %v517_v47 = vmul.f32 %v3059_v39, %v3072_v21  ;;  %v518_v48 = vmul.f32 %v3061_v17, %v3072_v21  ;;  %v519_v32 = vmul.f32 %v3080_v61, %v3072_v21  ;;  %v3228_v57 = vadd.f32 %v520_v37, %v3034_v54 }
  0xb7   : > { %5114 = vst [vmem:[#allocation4_spill] sm:$0xff] %v3211_v20  ;;  %v3231_v8 = vadd.f32 %v521_v26, %v3036_v55  ;;  %v3234_v16 = vadd.f32 %v522_v0, %v3038_v13  ;;  %v586_v27 = vmul.f32 %v3152_v62, %v561_v10  ;;  %v3238_v1 = vadd.f32 %v523_v4, %v3040_v7 }
  0xb8   : > { %5115 = vst [vmem:[#allocation5_spill] sm:$0xff] %v3219_v60  ;;  %v3241_v39 = vadd.f32 %v524_v29, %v3042_v34  ;;  %v535_v17 = vadd.f32 %v515_v23, %v3110_v6  ;;  %v536_v21 = vadd.f32 %v516_v41, %v3112_v19  ;;  %v587_v54 = vmul.f32 %v3155_v18, %v561_v10 }
  0xb9   : > { %v588_v55 = vmul.f32 %v3108_v30, %v561_v10  ;;  %v537_v61 = vadd.f32 %v517_v47, %v466_v63  ;;  %v538_v37 = vadd.f32 %v518_v48, %v467_v44  ;;  %v539_v13 = vadd.f32 %v519_v32, %v468_v43 }
  0xba   : > { %v589_v26 = vmul.f32 %v3158_v59, %v561_v10  ;;  %v2739_v0 = vmov 17   ;;  %v590_v7 = vmul.f32 %v3179_v5, %v561_v10  ;;  %v657_v34 = vmul.f32 %v3184_v2, %v3082_v14 }
  0xbb   : > { %v672_v6 = vmul.f32 %v3184_v2, %v3128_v58  ;;  %v3254_v19 = vperm.slane %v3203_v24, 0  ;;  %v674_v51 = vmul.f32 %v3188_v38, %v3128_v58  ;;  %v675_v43 = vmul.f32 %v3197_v15, %v3128_v58 }
  0xbc   : > { %2636 = vset.pattern.permute.xlu2 %v2739_v0  ;;  %v676_v23 = vmul.f32 %v3199_v46, %v3128_v58  ;;  %v607_v3 = vadd.f32 %v587_v54, %v536_v21  ;;  %v608_v52 = vadd.f32 %v588_v55, %v537_v61  ;;  %v609_v25 = vadd.f32 %v589_v26, %v538_v37 }
  0xbd   : > { %2635 = vset.pattern.permute.xlu1 %v2740_v35  ;;  %v573_v63 = vpop.permute.xlu1 %572  ;;  %2096 = vperm.xlu2 %2636, %v2850_v12   ;;  %v606_v35 = vadd.f32 %v586_v27, %v535_v17  ;;  %v661_v27 = vmul.f32 %v3199_v46, %v3082_v14  ;;  %v3295_v17 = vperm.slane %v3203_v24, 1  ;;  %v3298_v21 = vperm.slane %v3203_v24, 2 }
  0xbe   : > { %v601_v44 = vmul.f32 %v3152_v62, %v573_v63  ;;  %v602_v49 = vmul.f32 %v3155_v18, %v573_v63  ;;  %v603_v4 = vmul.f32 %v3108_v30, %v573_v63  ;;  %v604_v29 = vmul.f32 %v3158_v59, %v573_v63  ;;  %2077 = vperm.xlu1 %2635, %v2850_v12  }
  0xbf   : > { %v605_v41 = vmul.f32 %v3179_v5, %v573_v63  ;;  %v3269_v10 = vpop.permute.xlu2 %773  ;;  %v658_v63 = vmul.f32 %v3186_v53, %v3082_v14  ;;  %v3301_v54 = vperm.slane %v3203_v24, 3  ;;  %v591_v55 = vmul.f32 %v3152_v62, %v3191_v40 }
  0xc0   : > { %5116 = vst [vmem:[#allocation6_spill] sm:$0xff] %v3269_v10  ;;  %v621_v47 = vadd.f32 %v601_v44, %v3120_v36  ;;  %v3273_v48 = vadd.f32 %v602_v49, %v3122_v9  ;;  %v623_v32 = vadd.f32 %v603_v4, %v3160_v42  ;;  %v624_v0 = vadd.f32 %v604_v29, %v3162_v50  ;;  %v636_v10 = vpop.permute.xlu0 %635 }
  0xc1   : > { %v625_v60 = vadd.f32 %v605_v41, %v3164_v11  ;;  %v610_v42 = vadd.f32 %v590_v7, %v539_v13  ;;  %v659_v50 = vmul.f32 %v3188_v38, %v3082_v14  ;;  %v660_v11 = vmul.f32 %v3197_v15, %v3082_v14 }
  0xc2   : > { %v3280_v20 = vadd.f32 %v672_v6, %v621_v47  ;;  %v3282_v36 = vadd.f32 %v674_v51, %v623_v32  ;;  %v3284_v9 = vadd.f32 %v675_v43, %v624_v0  ;;  %v592_v61 = vmul.f32 %v3155_v18, %v3191_v40 }
  0xc3   : > { %v3286_v44 = vadd.f32 %v676_v23, %v625_v60  ;;  %v2741_v60 = vmov 19   ;;  %v3308_v37 = vperm.slane %v3203_v24, 4  ;;  %v2742_v14 = vmov 18  }
  0xc4   : > { %v2743_v26 = vmov 1.4142135   ;;  %v3313_v7 = vadd.f32 %v657_v34, %v606_v35  ;;  %v593_v62 = vmul.f32 %v3108_v30, %v3191_v40  ;;  %v594_v18 = vmul.f32 %v3158_v59, %v3191_v40 }
  0xc5   : > { %2638 = vset.pattern.permute.xlu2 %v2741_v60  ;;  %2653 = vrcp.f32 %v2743_v26  ;;  %v595_v24 = vmul.f32 %v3179_v5, %v3191_v40  ;;  %v3322_v6 = vadd.f32 %v658_v63, %v607_v3  ;;  %v3324_v49 = vadd.f32 %v659_v50, %v608_v52  ;;  %v2512_v5 = vld [vmem:[%s2893_s22 + $0x7] ss:$8 sm:$0xf] }
  0xc6   : > { %2637 = vset.pattern.permute.xlu1 %v2742_v14  ;;  %v3310_v13 = vpop.permute.xlu1 %639  ;;  %2134 = vperm.xlu2 %2638, %v2850_v12   ;;  %v3326_v4 = vadd.f32 %v660_v11, %v609_v25  ;;  %v3328_v29 = vadd.f32 %v661_v27, %v610_v42  ;;  %v673_v34 = vmul.f32 %v3186_v53, %v3128_v58  ;;  %v2513_v40 = vld [vmem:[%s2893_s22 + $0x7] ss:$8 sm:$0x10]  ;;  %v2745_v27 = vmov 21   ;;  %v5117_v26 = vld [vmem:[#allocation4_spill] sm:$0xff] }
  0xc7   : > { %2115 = vperm.xlu1 %2637, %v2850_v12   ;;  %v662_v30 = vmul.f32 %v3184_v2, %v636_v10  ;;  %v663_v59 = vmul.f32 %v3186_v53, %v636_v10  ;;  %v664_v51 = vmul.f32 %v3188_v38, %v636_v10  ;;  %v3337_v43 = vpop.permute.xlu2 %781  ;;  %v611_v3 = vadd.f32 %v591_v55, %v3228_v57 }
  0xc8   : > { %v612_v25 = vadd.f32 %v592_v61, %v3231_v8  ;;  %v665_v52 = vmul.f32 %v3197_v15, %v636_v10  ;;  %v666_v23 = vmul.f32 %v3199_v46, %v636_v10  ;;  %v613_v58 = vadd.f32 %v593_v62, %v3234_v16  ;;  %v711_v32 = vpop.permute.xlu0 %710 }
  0xc9   : > { %v614_v41 = vadd.f32 %v594_v18, %v3238_v1  ;;  %v615_v47 = vadd.f32 %v595_v24, %v3241_v39  ;;  %v771_v35 = vor.u32 %v2513_v40, %v2512_v5  ;;  %v3350_v63 = vadd.f32 %v3195_v45, %v3137_v31  ;;  %v5118_v24 = vld [vmem:[#allocation2_spill] sm:$0xff] }
  0xca   : > { %v3354_v57 = vadd.f32 %v3207_v28, %v3140_v22  ;;  %v733_v8 = vmul.f32 %v3254_v19, %v3201_v56  ;;  %v734_v16 = vmul.f32 %v3295_v17, %v3201_v56  ;;  %v735_v1 = vmul.f32 %v3298_v21, %v3201_v56 }
  0xcb   : > { %v3346_v0 = vpop.eup %2653  ;;  %v682_v10 = vadd.f32 %v662_v30, %v611_v3  ;;  %v683_v42 = vadd.f32 %v663_v59, %v612_v25  ;;  %v736_v31 = vmul.f32 %v3301_v54, %v3201_v56  ;;  %v737_v22 = vmul.f32 %v3308_v37, %v3201_v56  ;;  %v5119_v30 = vld [vmem:[#allocation5_spill] sm:$0xff] }
  0xcc   : > { %v904_v39 = vmul.f32 1.4142135, %v3346_v0  ;;  %v2744_v45 = vmov 22   ;;  %v684_v28 = vadd.f32 %v664_v51, %v613_v58  ;;  %v685_v50 = vadd.f32 %v665_v52, %v614_v41 }
  0xcd   : > { %v686_v11 = vadd.f32 %v666_v23, %v615_v47  ;;  %v3370_v55 = vperm.slane %v771_v35, 0  ;;  %v3372_v61 = vperm.slane %v771_v35, 1  ;;  %v3374_v14 = vperm.slane %v771_v35, 2 }
  0xce   : > { %2641 = vset.pattern.permute.xlu2 %v2744_v45  ;;  %v619_v56 = vadd.f32 %v5117_v26, %v3146_v33  ;;  %v3379_v62 = vperm.slane %v771_v35, 3  ;;  %v3381_v18 = vperm.slane %v771_v35, 4  ;;  %v620_v59 = vadd.f32 %v5119_v30, %v5118_v24 }
  0xcf   : > { %2640 = vset.pattern.permute.xlu1 %v2745_v27  ;;  %v3367_v60 = vpop.permute.xlu1 %702  ;;  %2191 = vperm.xlu2 %2641, %v2850_v12   ;;  %v905_v5 = vsub.f32 1.0, %v904_v39  ;;  %v3387_v40 = vadd.f32 %v733_v8, %v682_v10  ;;  %v3389_v3 = vadd.f32 %v734_v16, %v683_v42  ;;  %v738_v25 = vmul.f32 %v3254_v19, %v711_v32  ;;  %v5122_v16 = vld [vmem:[#allocation6_spill] sm:$0xff] }
  0xd0   : > { %2172 = vperm.xlu1 %2640, %v2850_v12   ;;  %v3385_v51 = vpop.permute.xlu2 %850  ;;  %v739_v33 = vmul.f32 %v3295_v17, %v711_v32  ;;  %v3393_v52 = vadd.f32 %v735_v1, %v684_v28  ;;  %v3395_v23 = vadd.f32 %v736_v31, %v685_v50  ;;  %v3397_v58 = vadd.f32 %v737_v22, %v686_v11  ;;  %v786_v47 = vpop.permute.xlu0 %785 }
  0xd1   : > { %5120 = vst [vmem:[#allocation4_spill] sm:$0xff] %v3385_v51  ;;  %v740_v41 = vmul.f32 %v3298_v21, %v711_v32  ;;  %v741_v35 = vmul.f32 %v3301_v54, %v711_v32  ;;  %v3402_v8 = vmul.f32 %v3308_v37, %v711_v32  ;;  %v3406_v39 = vmul.f32 %v3370_v55, %v5122_v16 }
  0xd2   : > { %5121 = vst [vmem:[#allocation2_spill] sm:$0xff] %v3397_v58  ;;  %v3410_v1 = vmul.f32 %v3372_v61, %v5122_v16  ;;  %v3414_v10 = vmul.f32 %v3374_v14, %v5122_v16  ;;  %v906_v42 = vmul.f32 %v3346_v0, %v905_v5  ;;  %v3419_v31 = vmul.f32 %v3379_v62, %v5122_v16 }
  0xd3   : > { %5123 = vst [vmem:[#allocation5_spill] sm:$0xff] %v3406_v39  ;;  %v693_v32 = vadd.f32 %v673_v34, %v3273_v48  ;;  %v814_v22 = vmul.f32 %v3370_v55, %v786_v47  ;;  %v815_v45 = vmul.f32 %v3372_v61, %v786_v47  ;;  %v667_v28 = vmul.f32 %v3184_v2, %v3310_v13 }
  0xd4   : > { %5124 = vst [vmem:[#allocation6_spill] sm:$0xff] %v3410_v1  ;;  %v668_v50 = vmul.f32 %v3186_v53, %v3310_v13  ;;  %v2746_v27 = vmov 24   ;;  %v816_v26 = vmul.f32 %v3374_v14, %v786_v47  ;;  %v817_v24 = vmul.f32 %v3379_v62, %v786_v47 }
  0xd5   : > { %5125 = vst [vmem:[#allocation7_spill] sm:$0xff] %v3414_v10  ;;  %v669_v2 = vmul.f32 %v3188_v38, %v3310_v13  ;;  %v670_v53 = vmul.f32 %v3197_v15, %v3310_v13  ;;  %vm908_vm0 = vweird.f32 %v3346_v0  ;;  %v3447_v38 = vmul.f32 %v3381_v18, %v5122_v16 }
  0xd6   : > { %5126 = vst [vmem:[#allocation8_spill] sm:$0xff] %v3419_v31  ;;  %v2747_v31 = vmov 23   ;;  %v671_v15 = vmul.f32 %v3199_v46, %v3310_v13 }
  0xd7   : > { %v715_v11 = vpop.permute.xlu1 %714  ;;  %2643 = vset.pattern.permute.xlu2 %v2746_v27  ;;  %v907_v27 = vadd.f32 %v3346_v0, %v906_v42  ;;  %v688_v42 = vadd.f32 %v668_v50, %v3354_v57  ;;  %v728_v50 = vmul.f32 %v3254_v19, %v3367_v60 }
  0xd8   : > { %v743_v30 = vmul.f32 %v3254_v19, %v715_v11  ;;  %v744_v48 = vmul.f32 %v3295_v17, %v715_v11  ;;  %v745_v34 = vmul.f32 %v3298_v21, %v715_v11  ;;  %v746_v5 = vmul.f32 %v3301_v54, %v715_v11  ;;  %2642 = vset.pattern.permute.xlu1 %v2747_v31  ;;  %v3453_v51 = vpop.permute.xlu2 %860 }
  0xd9   : > { %2229 = vperm.xlu2 %2643, %v2850_v12   ;;  %2210 = vperm.xlu1 %2642, %v2850_v12   ;;  %v687_v12 = vadd.f32 %v667_v28, %v3350_v63  ;;  %v3460_v16 = vsel %vm908_vm0, %v3346_v0, %v907_v27  ;;  %v3478_v0 = vmul.f32 %v3372_v61, %v3337_v43 }
  0xda   : > { %v763_v10 = vadd.f32 %v743_v30, %v3280_v20  ;;  %v764_v1 = vadd.f32 %v744_v48, %v693_v32  ;;  %v765_v39 = vadd.f32 %v745_v34, %v3282_v36  ;;  %v766_v31 = vadd.f32 %v746_v5, %v3284_v9  ;;  %v5127_v36 = vld [vmem:[#allocation3_spill] sm:$0xff] }
  0xdb   : > { %v689_v48 = vadd.f32 %v669_v2, %v5127_v36  ;;  %v690_v9 = vadd.f32 %v670_v53, %v619_v56  ;;  %v818_v34 = vmul.f32 %v3381_v18, %v786_v47  ;;  %v3474_v56 = vmul.f32 %v3370_v55, %v3337_v43 }
  0xdc   : > { %v834_v58 = vadd.f32 %v814_v22, %v763_v10  ;;  %v835_v20 = vadd.f32 %v815_v45, %v764_v1  ;;  %v836_v32 = vadd.f32 %v816_v26, %v765_v39  ;;  %v837_v30 = vadd.f32 %v817_v24, %v766_v31 }
  0xdd   : > { %v691_v39 = vadd.f32 %v671_v15, %v620_v59  ;;  %v3484_v47 = vadd.f32 %v738_v25, %v687_v12  ;;  %v3486_v1 = vadd.f32 %v739_v33, %v688_v42  ;;  %v3490_v10 = vmul.f32 %v3379_v62, %v3337_v43 }
  0xde   : > { %v878_v46 = vadd.f32 %v3453_v51, %v834_v58  ;;  %v3464_v13 = vadd.f32 %v3453_v51, %v835_v20  ;;  %v3467_v63 = vadd.f32 %v3453_v51, %v836_v32  ;;  %v3470_v57 = vadd.f32 %v3453_v51, %v837_v30 }
  0xdf   : > { %v3482_v58 = vmul.f32 %v3374_v14, %v3337_v43  ;;  %5129 = vst [vmem:[#allocation9_spill] sm:$0xff] %v3490_v10  ;;  %v3494_v59 = vmul.f32 %v3381_v18, %v3337_v43  ;;  %v3496_v22 = vadd.f32 %v740_v41, %v689_v48  ;;  %v3509_v33 = vadd.f32 %v741_v35, %v690_v9 }
  0xe0   : > { %v3499_v45 = vmul.f32 %v3460_v16, %v878_v46  ;;  %v3503_v28 = vmul.f32 %v3460_v16, %v3464_v13  ;;  %v3507_v25 = vmul.f32 %v3460_v16, %v3467_v63  ;;  %v747_v43 = vmul.f32 %v3308_v37, %v715_v11 }
  0xe1   : > { %5128 = vst [vmem:[#allocation3_spill] sm:$0xff] %v3482_v58  ;;  %v3516_v41 = vmul.f32 %v3460_v16, %v3470_v57  ;;  %v729_v26 = vmul.f32 %v3295_v17, %v3367_v60  ;;  %v3527_v19 = vadd.f32 %v3402_v8, %v691_v39  ;;  %v730_v11 = vmul.f32 %v3298_v21, %v3367_v60 }
  0xe2   : > { %5130 = vst [vmem:[#allocation10_spill] sm:$0xff] %v3494_v59  ;;  %v1530_v24 = vmul.f32 %v3499_v45, %v3499_v45  ;;  %v1570_v5 = vmul.f32 %v3503_v28, %v3503_v28  ;;  %v1610_v35 = vmul.f32 %v3507_v25, %v3507_v25  ;;  %v731_v2 = vmul.f32 %v3301_v54, %v3367_v60 }
  0xe3   : > { %5131 = vst [vmem:[#allocation11_spill] sm:$0xff] %v3509_v33  ;;  %v1650_v17 = vmul.f32 %v3516_v41, %v3516_v41  ;;  %v732_v53 = vmul.f32 %v3308_v37, %v3367_v60  ;;  %v3544_v8 = vadd.f32 %v728_v50, %v3313_v7  ;;  %v767_v21 = vadd.f32 %v747_v43, %v3286_v44 }
  0xe4   : > { %5132 = vst [vmem:[#allocation12_spill] sm:$0xff] %v3527_v19  ;;  %v3537_v27 = vmin.f32 %v1530_v24, 16.0  ;;  %v3539_v31 = vmin.f32 %v1570_v5, 16.0  ;;  %v3541_v15 = vmin.f32 %v1610_v35, 16.0  ;;  %v3547_v12 = vmul.f32 0.5, %v878_v46 }
  0xe5   : > { %v3549_v54 = vmin.f32 %v1650_v17, 16.0  ;;  %v3552_v42 = vadd.f32 %v729_v26, %v3322_v6  ;;  %v3558_v32 = vadd.f32 %v730_v11, %v3324_v49  ;;  %v3564_v36 = vadd.f32 %v731_v2, %v3326_v4 }
  0xe6   : > { %v1532_v37 = vmul.f32 2.1237322e-06, %v3537_v27  ;;  %v1543_v60 = vmul.f32 3.8918573e-05, %v3537_v27  ;;  %v1572_v20 = vmul.f32 2.1237322e-06, %v3539_v31  ;;  %v838_v46 = vadd.f32 %v818_v34, %v767_v21 }
  0xe7   : > { %v1583_v7 = vmul.f32 3.8918573e-05, %v3539_v31  ;;  %v1612_v44 = vmul.f32 2.1237322e-06, %v3541_v15  ;;  %v1623_v30 = vmul.f32 3.8918573e-05, %v3541_v15  ;;  %v3575_v34 = vadd.f32 %v732_v53, %v3328_v29 }
  0xe8   : > { %v1533_v6 = vadd.f32 0.00028619796, %v1532_v37  ;;  %v1544_v48 = vadd.f32 0.001143296, %v1543_v60  ;;  %v1573_v9 = vadd.f32 0.00028619796, %v1572_v20  ;;  %v3578_v60 = vadd.f32 %v3453_v51, %v838_v46 }
  0xe9   : > { %v1584_v39 = vadd.f32 0.001143296, %v1583_v7  ;;  %v1613_v50 = vadd.f32 0.00028619796, %v1612_v44  ;;  %v1624_v43 = vadd.f32 0.001143296, %v1623_v30 }
  0xea   : > { %v1534_v26 = vmul.f32 %v1533_v6, %v3537_v27  ;;  %v1545_v49 = vmul.f32 %v1544_v48, %v3537_v27  ;;  %v1574_v24 = vmul.f32 %v1573_v9, %v3539_v31  ;;  %v1652_v5 = vmul.f32 2.1237322e-06, %v3549_v54 }
  0xeb   : > { %v1585_v35 = vmul.f32 %v1584_v39, %v3539_v31  ;;  %v1614_v4 = vmul.f32 %v1613_v50, %v3541_v15  ;;  %v1625_v11 = vmul.f32 %v1624_v43, %v3541_v15  ;;  %v1663_v2 = vmul.f32 3.8918573e-05, %v3549_v54 }
  0xec   : > { %v1535_v17 = vadd.f32 0.0036580483, %v1534_v26  ;;  %v1546_v21 = vadd.f32 0.014752088, %v1545_v49  ;;  %v1575_v37 = vadd.f32 0.0036580483, %v1574_v24  ;;  %v778_v49 = vpop.permute.xlu1 %777 }
  0xed   : > { %v1586_v20 = vadd.f32 0.014752088, %v1585_v35  ;;  %v1615_v7 = vadd.f32 0.0036580483, %v1614_v4  ;;  %v1626_v44 = vadd.f32 0.014752088, %v1625_v11 }
  0xee   : > { %v1536_v30 = vmul.f32 %v1535_v17, %v3537_v27  ;;  %v1547_v6 = vmul.f32 %v1546_v21, %v3537_v27  ;;  %v1576_v48 = vmul.f32 %v1575_v37, %v3539_v31  ;;  %v1653_v9 = vadd.f32 0.00028619796, %v1652_v5 }
  0xef   : > { %v1587_v39 = vmul.f32 %v1586_v20, %v3539_v31  ;;  %v1616_v29 = vmul.f32 %v1615_v7, %v3541_v15  ;;  %v1627_v53 = vmul.f32 %v1626_v44, %v3541_v15  ;;  %v1664_v50 = vadd.f32 0.001143296, %v1663_v2 }
  0xf0   : > { %v1537_v43 = vadd.f32 0.05243302, %v1536_v30  ;;  %v1548_v51 = vadd.f32 0.112945676, %v1547_v6  ;;  %v1577_v46 = vadd.f32 0.05243302, %v1576_v48  ;;  %v1654_v26 = vmul.f32 %v1653_v9, %v3549_v54 }
  0xf1   : > { %v1588_v24 = vadd.f32 0.112945676, %v1587_v39  ;;  %v1617_v35 = vadd.f32 0.05243302, %v1616_v29  ;;  %v1628_v4 = vadd.f32 0.112945676, %v1627_v53  ;;  %v1665_v11 = vmul.f32 %v1664_v50, %v3549_v54 }
  0xf2   : > { %v3590_v5 = vmul.f32 %v3460_v16, %v3578_v60  ;;  %v1538_v17 = vmul.f32 %v1537_v43, %v3537_v27  ;;  %v1549_v21 = vmul.f32 %v1548_v51, %v3537_v27  ;;  %v1578_v2 = vmul.f32 %v1577_v46, %v3539_v31 }
  0xf3   : > { %v1589_v37 = vmul.f32 %v1588_v24, %v3539_v31  ;;  %v1629_v20 = vmul.f32 %v1628_v4, %v3541_v15  ;;  %v1666_v7 = vadd.f32 0.014752088, %v1665_v11  ;;  %v804_v44 = vmul.f32 %v3370_v55, %v778_v49 }
  0xf4   : > { %v1539_v30 = vadd.f32 0.18741608, %v1538_v17  ;;  %v1550_v6 = vadd.f32 0.4994258, %v1549_v21  ;;  %v1618_v48 = vmul.f32 %v1617_v35, %v3541_v15  ;;  %v1655_v9 = vadd.f32 0.0036580483, %v1654_v26 }
  0xf5   : > { %v1590_v39 = vadd.f32 0.4994258, %v1589_v37  ;;  %v1630_v29 = vadd.f32 0.4994258, %v1629_v20  ;;  %v1667_v53 = vmul.f32 %v1666_v7, %v3549_v54  ;;  %v805_v50 = vmul.f32 %v3372_v61, %v778_v49 }
  0xf6   : > { %v1551_v43 = vmul.f32 %v1550_v6, %v3537_v27  ;;  %v1579_v51 = vadd.f32 0.18741608, %v1578_v2  ;;  %v1690_v46 = vmul.f32 %v3590_v5, %v3590_v5  ;;  %v806_v24 = vmul.f32 %v3374_v14, %v778_v49 }
  0xf7   : > { %v1591_v55 = vmul.f32 %v1590_v39, %v3539_v31  ;;  %v1631_v4 = vmul.f32 %v1630_v29, %v3541_v15  ;;  %v1668_v35 = vadd.f32 0.112945676, %v1667_v53  ;;  %v807_v26 = vmul.f32 %v3379_v62, %v778_v49 }
  0xf8   : > { %v1540_v11 = vmul.f32 %v1539_v30, %v3537_v27  ;;  %v3609_v17 = vadd.f32 1.0, %v1551_v43  ;;  %v1619_v61 = vadd.f32 0.18741608, %v1618_v48  ;;  %v1656_v21 = vmul.f32 %v1655_v9, %v3549_v54 }
  0xf9   : > { %v3612_v2 = vadd.f32 1.0, %v1591_v55  ;;  %v3614_v37 = vadd.f32 1.0, %v1631_v4  ;;  %v808_v14 = vmul.f32 %v3381_v18, %v778_v49  ;;  %v824_v20 = vadd.f32 %v804_v44, %v3387_v40 }
  0xfa   : > { %2655 = vrcp.f32 %v3609_v17  ;;  %v1580_v7 = vmul.f32 %v1579_v51, %v3539_v31  ;;  %v3620_v62 = vmin.f32 %v1690_v46, 16.0  ;;  %v825_v27 = vadd.f32 %v805_v50, %v3389_v3 }
  0xfb   : > { %2657 = vrcp.f32 %v3612_v2  ;;  %v1669_v30 = vmul.f32 %v1668_v35, %v3549_v54  ;;  %v826_v6 = vadd.f32 %v806_v24, %v3393_v52  ;;  %v827_v48 = vadd.f32 %v807_v26, %v3395_v23  ;;  %v5133_v23 = vld [vmem:[#allocation2_spill] sm:$0xff] }
  0xfc   : > { %v3628_v18 = vmul.f32 0.5, %v3464_v13  ;;  %v1541_v40 = vadd.f32 1.1283791, %v1540_v11  ;;  %v1620_v49 = vmul.f32 %v1619_v61, %v3541_v15  ;;  %v1657_v44 = vadd.f32 0.05243302, %v1656_v21  ;;  %v5134_v13 = vld [vmem:[#allocation4_spill] sm:$0xff] }
  0xfd   : > { %v3632_v31 = vmul.f32 0.5, %v3467_v63  ;;  %v3635_v3 = vmul.f32 0.5, %v3470_v57  ;;  %v3638_v9 = vmul.f32 0.5, %v3578_v60  ;;  %2659 = vrcp.f32 %v3614_v37 }
  0xfe   : > { %v1581_v52 = vadd.f32 1.1283791, %v1580_v7  ;;  %v3642_v39 = vadd.f32 %v808_v14, %v5133_v23  ;;  %v3645_v29 = vadd.f32 %v5134_v13, %v824_v20  ;;  %v3648_v15 = vadd.f32 %v5134_v13, %v825_v27 }
  0xff   : > { %v1670_v63 = vadd.f32 0.4994258, %v1669_v30  ;;  %v1692_v53 = vmul.f32 2.1237322e-06, %v3620_v62  ;;  %v3652_v57 = vadd.f32 %v5134_v13, %v826_v6  ;;  %v3655_v60 = vadd.f32 %v5134_v13, %v827_v48 }
 0x100   : > { %v3657_v50 = vpop.eup %2655  ;;  %v3660_v43 = vmul.f32 %v1541_v40, %v3499_v45  ;;  %v1621_v51 = vadd.f32 1.1283791, %v1620_v49  ;;  %v1658_v46 = vmul.f32 %v1657_v44, %v3549_v54  ;;  %v1703_v24 = vmul.f32 3.8918573e-05, %v3620_v62 }
 0x101   : > { %v3664_v55 = vpop.eup %2657  ;;  %v1554_v4 = vmul.f32 %v3657_v50, %v3609_v17  ;;  %vm1558_vm1 = vweird.f32 %v3609_v17  ;;  %v1562_v35 = vand.u32 2147483647, %v3609_v17  ;;  %v1671_v26 = vmul.f32 %v1670_v63, %v3549_v54 }
 0x102   : > { %v1693_v11 = vadd.f32 0.00028619796, %v1692_v53  ;;  %v1564_v45 = vand.u32 2147483648, %v3609_v17  ;;  %v3673_v61 = vmul.f32 %v1581_v52, %v3503_v28  ;;  %v1594_v21 = vmul.f32 %v3664_v55, %v3612_v2 }
 0x103   : > { %vm1598_vm2 = vweird.f32 %v3612_v2  ;;  %v2660_v14 = vpop.eup %2659  ;;  %v1555_v20 = vsub.f32 1.0, %v1554_v4  ;;  %v3678_v7 = vadd.f32 1.0, %v1671_v26  ;;  %v1704_v30 = vadd.f32 0.001143296, %v1703_v24 }
 0x104   : > { %v1694_v27 = vmul.f32 %v1693_v11, %v3620_v62  ;;  %v1595_v6 = vsub.f32 1.0, %v1594_v21  ;;  %v1602_v48 = vand.u32 2147483647, %v3612_v2  ;;  %v1604_v40 = vand.u32 2147483648, %v3612_v2 }
 0x105   : > { %v1634_v28 = vmul.f32 %v2660_v14, %v3614_v37  ;;  %v1556_v49 = vmul.f32 %v3657_v50, %v1555_v20  ;;  %vm3685_vm3 = vcmp.eq.f32.partialorder %v1562_v35, 8.507059e+37  ;;  %v1622_v52 = vmul.f32 %v1621_v51, %v3507_v25 }
 0x106   : > { %v1642_v23 = vand.u32 2147483647, %v3614_v37  ;;  %2661 = vrcp.f32 %v3678_v7  ;;  %v1596_v63 = vmul.f32 %v3664_v55, %v1595_v6  ;;  %v1659_v24 = vadd.f32 0.18741608, %v1658_v46 }
 0x107   : > { %v1635_v53 = vsub.f32 1.0, %v1634_v28  ;;  %v1695_v4 = vadd.f32 0.0036580483, %v1694_v27  ;;  %v1557_v26 = vadd.f32 %v3657_v50, %v1556_v49  ;;  %vm1559_vm4 = vweird.f32 %v3657_v50 }
 0x108   : > { %v1644_v35 = vand.u32 2147483648, %v3614_v37  ;;  %v1705_v11 = vmul.f32 %v1704_v30, %v3620_v62  ;;  %v1597_v21 = vadd.f32 %v3664_v55, %v1596_v63  ;;  %vm1599_vm5 = vweird.f32 %v3664_v55  ;;  %vm3703_vm8 = vmor %vm1558_vm1, %vm1559_vm4 }
 0x109   : > { %v1636_v25 = vmul.f32 %v2660_v14, %v1635_v53  ;;  %v1696_v51 = vmul.f32 %v1695_v4, %v3620_v62  ;;  %v1565_v20 = vor.u32 1.1754944e-38, %v1564_v45  ;;  %vm1638_vm6 = vweird.f32 %v3614_v37  ;;  %vm3719_vm10 = vmor %vm1598_vm2, %vm1599_vm5 }
 0x10a   : > { %vm1639_vm7 = vweird.f32 %v2660_v14  ;;  %v1706_v46 = vadd.f32 0.014752088, %v1705_v11  ;;  %vm3707_vm9 = vcmp.eq.f32.partialorder %v1602_v48, 8.507059e+37  ;;  %v1660_v28 = vmul.f32 %v1659_v24, %v3549_v54 }
 0x10b   : > { %v1637_v6 = vadd.f32 %v2660_v14, %v1636_v25  ;;  %v1697_v49 = vadd.f32 0.05243302, %v1696_v51  ;;  %v1561_v45 = vsel %vm3703_vm8, %v3657_v50, %v1557_v26  ;;  %v1605_v48 = vor.u32 1.1754944e-38, %v1604_v40  ;;  %vm3733_vm12 = vmor %vm1638_vm6, %vm1639_vm7 }
 0x10c   : > { %v3712_v63 = vpop.eup %2661  ;;  %vm3723_vm11 = vcmp.eq.f32.partialorder %v1642_v23, 8.507059e+37  ;;  %v1707_v54 = vmul.f32 %v1706_v46, %v3620_v62  ;;  %v1601_v24 = vsel %vm3719_vm10, %v3664_v55, %v1597_v21  ;;  %v1645_v2 = vor.u32 1.1754944e-38, %v1644_v35 }
 0x10d   : > { %v1674_v40 = vmul.f32 %v3712_v63, %v3678_v7  ;;  %v3741_v23 = vadd.f32 %v5134_v13, %v3642_v39  ;;  %v1641_v4 = vsel %vm3733_vm12, %v2660_v14, %v1637_v6  ;;  %v1698_v26 = vmul.f32 %v1697_v49, %v3620_v62 }
 0x10e   : > { %v1708_v55 = vadd.f32 0.112945676, %v1707_v54  ;;  %v3747_v37 = vmul.f32 0.5, %v3645_v29  ;;  %v1566_v11 = vsel %vm3685_vm3, %v1565_v20, %v1561_v45  ;;  %v1661_v35 = vadd.f32 1.1283791, %v1660_v28 }
 0x10f   : > { %v1675_v21 = vsub.f32 1.0, %v1674_v40  ;;  %v3753_v25 = vmul.f32 %v3460_v16, %v3645_v29  ;;  %v1606_v39 = vsel %vm3707_vm9, %v1605_v48, %v1601_v24  ;;  %v3760_v14 = vmul.f32 %v3460_v16, %v3648_v15 }
 0x110   : > { %v1709_v13 = vmul.f32 %v1708_v55, %v3620_v62  ;;  %v3764_v51 = vmul.f32 %v3460_v16, %v3652_v57  ;;  %v1646_v44 = vsel %vm3723_vm11, %v1645_v2, %v1641_v4  ;;  %v1682_v20 = vand.u32 2147483647, %v3678_v7 }
 0x111   : > { %v1684_v29 = vand.u32 2147483648, %v3678_v7  ;;  %v1699_v46 = vadd.f32 0.18741608, %v1698_v26  ;;  %v1676_v27 = vmul.f32 %v3712_v63, %v1675_v21  ;;  %vm1678_vm13 = vweird.f32 %v3678_v7 }
 0x112   : > { %v1710_v30 = vadd.f32 0.4994258, %v1709_v13  ;;  %v3773_v6 = vmul.f32 0.5, %v3648_v15  ;;  %v3776_v28 = vmul.f32 %v1566_v11, %v3660_v43  ;;  %v3779_v49 = vmul.f32 %v1606_v39, %v3673_v61 }
 0x113   : > { %v3783_v45 = vmul.f32 %v3460_v16, %v3655_v60  ;;  %v1130_v17 = vmul.f32 %v3753_v25, %v3753_v25  ;;  %v3787_v48 = vmul.f32 %v1646_v44, %v1622_v52  ;;  %v1170_v15 = vmul.f32 %v3760_v14, %v3760_v14 }
 0x114   : > { %v1711_v53 = vmul.f32 %v1710_v30, %v3620_v62  ;;  %v1210_v43 = vmul.f32 %v3764_v51, %v3764_v51  ;;  %vm3794_vm14 = vcmp.eq.f32.partialorder %v1682_v20, 8.507059e+37  ;;  %v1685_v54 = vor.u32 1.1754944e-38, %v1684_v29 }
 0x115   : > { %v1700_v24 = vmul.f32 %v1699_v46, %v3620_v62  ;;  %v3799_v50 = vmin.f32 %v1130_v17, 16.0  ;;  %v1677_v52 = vadd.f32 %v3712_v63, %v1676_v27  ;;  %vm1679_vm15 = vweird.f32 %v3712_v63 }
 0x116   : > { %v3803_v2 = vadd.f32 1.0, %v1711_v53  ;;  %v3805_v40 = vmin.f32 %v1170_v15, 16.0  ;;  %v3809_v55 = vmin.f32 %v1210_v43, 16.0  ;;  %v1250_v11 = vmul.f32 %v3783_v45, %v3783_v45  ;;  %vm3820_vm0 = vmor %vm1678_vm13, %vm1679_vm15 }
 0x117   : > { %v1132_v4 = vmul.f32 2.1237322e-06, %v3799_v50  ;;  %v1143_v26 = vmul.f32 3.8918573e-05, %v3799_v50  ;;  %v1662_v13 = vmul.f32 %v1661_v35, %v3516_v41  ;;  %v3824_v20 = vadd.f32 1.1283791, %v1700_v24 }
 0x118   : > { %2663 = vrcp.f32 %v3803_v2  ;;  %v1681_v27 = vsel %vm3820_vm0, %v3712_v63, %v1677_v52  ;;  %v1722_v30 = vand.u32 2147483647, %v3803_v2  ;;  %v1172_v17 = vmul.f32 2.1237322e-06, %v3805_v40 }
 0x119   : > { %v1133_v29 = vadd.f32 0.00028619796, %v1132_v4  ;;  %v1144_v46 = vadd.f32 0.001143296, %v1143_v26  ;;  %v1183_v41 = vmul.f32 3.8918573e-05, %v3805_v40  ;;  %v3839_v43 = vmul.f32 %v3460_v16, %v3741_v23 }
 0x11a   : > { %v1212_v53 = vmul.f32 2.1237322e-06, %v3809_v55  ;;  %v3835_v15 = vmin.f32 %v1250_v11, 16.0  ;;  %v1173_v24 = vadd.f32 0.00028619796, %v1172_v17  ;;  %v1686_v4 = vsel %vm3794_vm14, %v1685_v54, %v1681_v27 }
 0x11b   : > { %v1134_v7 = vmul.f32 %v1133_v29, %v3799_v50  ;;  %v1145_v35 = vmul.f32 %v1144_v46, %v3799_v50  ;;  %v1184_v63 = vadd.f32 0.001143296, %v1183_v41  ;;  %v1223_v52 = vmul.f32 3.8918573e-05, %v3809_v55 }
 0x11c   : > { %v1213_v29 = vadd.f32 0.00028619796, %v1212_v53  ;;  %v1724_v46 = vand.u32 2147483648, %v3803_v2  ;;  %v1174_v11 = vmul.f32 %v1173_v24, %v3805_v40  ;;  %v1252_v61 = vmul.f32 2.1237322e-06, %v3835_v15 }
 0x11d   : > { %v1135_v26 = vadd.f32 0.0036580483, %v1134_v7  ;;  %v1146_v44 = vadd.f32 0.014752088, %v1145_v35  ;;  %v1185_v21 = vmul.f32 %v1184_v63, %v3805_v40  ;;  %v1224_v62 = vadd.f32 0.001143296, %v1223_v52 }
 0x11e   : > { %v2664_v39 = vpop.eup %2663  ;;  %v1175_v54 = vadd.f32 0.0036580483, %v1174_v11  ;;  %v1214_v7 = vmul.f32 %v1213_v29, %v3809_v55  ;;  %vm1718_vm2 = vweird.f32 %v3803_v2  ;;  %vm1723_vm4 = vcmp.eq.f32.partialorder %v1722_v30, 8.507059e+37 }
 0x11f   : > { %v1714_v59 = vmul.f32 %v2664_v39, %v3803_v2  ;;  %v1136_v17 = vmul.f32 %v1135_v26, %v3799_v50  ;;  %v1147_v41 = vmul.f32 %v1146_v44, %v3799_v50  ;;  %v1186_v27 = vadd.f32 0.014752088, %v1185_v21 }
 0x120   : > { %v1225_v35 = vmul.f32 %v1224_v62, %v3809_v55  ;;  %vm1719_vm1 = vweird.f32 %v2664_v39  ;;  %v1176_v63 = vmul.f32 %v1175_v54, %v3805_v40  ;;  %v1215_v10 = vadd.f32 0.0036580483, %v1214_v7 }
 0x121   : > { %v1715_v53 = vsub.f32 1.0, %v1714_v59  ;;  %v1137_v24 = vadd.f32 0.05243302, %v1136_v17  ;;  %v1148_v19 = vadd.f32 0.112945676, %v1147_v41  ;;  %v1187_v52 = vmul.f32 %v1186_v27, %v3805_v40  ;;  %vm1720_vm3 = vmor %vm1718_vm2, %vm1719_vm1 }
 0x122   : > { %v1226_v26 = vadd.f32 0.014752088, %v1225_v35  ;;  %v1253_v21 = vadd.f32 0.00028619796, %v1252_v61  ;;  %v1177_v58 = vadd.f32 0.05243302, %v1176_v63  ;;  %v1216_v62 = vmul.f32 %v1215_v10, %v3809_v55 }
 0x123   : > { %v1716_v33 = vmul.f32 %v2664_v39, %v1715_v53  ;;  %v1138_v44 = vmul.f32 %v1137_v24, %v3799_v50  ;;  %v1149_v11 = vmul.f32 %v1148_v19, %v3799_v50  ;;  %v1188_v29 = vadd.f32 0.112945676, %v1187_v52 }
 0x124   : > { %v1227_v59 = vmul.f32 %v1226_v26, %v3809_v55  ;;  %v1178_v27 = vmul.f32 %v1177_v58, %v3805_v40  ;;  %v1254_v19 = vmul.f32 %v1253_v21, %v3835_v15  ;;  %v1687_v61 = vmul.f32 %v1686_v4, %v1662_v13 }
 0x125   : > { %v1717_v17 = vadd.f32 %v2664_v39, %v1716_v33  ;;  %v1139_v41 = vadd.f32 0.18741608, %v1138_v44  ;;  %v1150_v54 = vadd.f32 0.4994258, %v1149_v11  ;;  %v1189_v7 = vmul.f32 %v1188_v29, %v3805_v40 }
 0x126   : > { %v1228_v35 = vadd.f32 0.112945676, %v1227_v59  ;;  %v1725_v24 = vor.u32 1.1754944e-38, %v1724_v46  ;;  %v1217_v63 = vadd.f32 0.05243302, %v1216_v62  ;;  %v1290_v2 = vmul.f32 %v3839_v43, %v3839_v43 }
 0x127   : > { %v1721_v53 = vsel %vm1720_vm3, %v2664_v39, %v1717_v17  ;;  %v1151_v10 = vmul.f32 %v1150_v54, %v3799_v50  ;;  %v1190_v33 = vadd.f32 0.4994258, %v1189_v7  ;;  %v1179_v58 = vadd.f32 0.18741608, %v1178_v27 }
 0x128   : > { %v1726_v52 = vsel %vm1723_vm4, %v1725_v24, %v1721_v53  ;;  %v1229_v44 = vmul.f32 %v1228_v35, %v3809_v55  ;;  %v1702_v11 = vmul.f32 %v3824_v20, %v3590_v5  ;;  %v1140_v39 = vmul.f32 %v1139_v41, %v3799_v50 }
 0x129   : > { %v3867_v26 = vadd.f32 1.0, %v1151_v10  ;;  %v1191_v13 = vmul.f32 %v1190_v33, %v3805_v40  ;;  %v1255_v4 = vadd.f32 0.0036580483, %v1254_v19  ;;  %v2532_v30 = vclamps-f32 %v1687_v61, 1.0 }
 0x12a   : > { %v5151_v46 = vclamps-f32 %v3776_v28, 1.0  ;;  %v5152_v29 = vclamps-f32 %v3779_v49, 1.0  ;;  %v3879_v59 = vmul.f32 %v1726_v52, %v1702_v11  ;;  %v3882_v17 = vmul.f32 0.5, %v3652_v57 }
 0x12b   : > { %2665 = vrcp.f32 %v3867_v26  ;;  %v3884_v5 = vadd.f32 1.0, %v1191_v13  ;;  %v1218_v50 = vmul.f32 %v1217_v63, %v3809_v55  ;;  %v5153_v20 = vclamps-f32 %v3787_v48, 1.0 }
 0x12c   : > { %v1745_v21 = vadd.f32 1.0, %v5151_v46  ;;  %v1746_v62 = vadd.f32 1.0, %v5152_v29  ;;  %v1180_v28 = vmul.f32 %v1179_v58, %v3805_v40  ;;  %v1230_v54 = vadd.f32 0.4994258, %v1229_v44 }
 0x12d   : > { %v1747_v41 = vadd.f32 1.0, %v5153_v20  ;;  %v3890_v27 = vmin.f32 %v1290_v2, 16.0  ;;  %v3893_v49 = vmul.f32 0.5, %v3655_v60  ;;  %v1141_v7 = vadd.f32 1.1283791, %v1140_v39 }
 0x12e   : > { %2667 = vrcp.f32 %v3884_v5  ;;  %v1256_v57 = vmul.f32 %v1255_v4, %v3835_v15  ;;  %v3897_v35 = vadd.f32 1.0, %v2532_v30  ;;  %v3900_v19 = vmul.f32 %v1745_v21, %v3547_v12 }
 0x12f   : > { %v3903_v48 = vmul.f32 %v1746_v62, %v3628_v18  ;;  %v3906_v40 = vmul.f32 0.5, %v3741_v23  ;;  %v2533_v61 = vclamps-f32 %v3879_v59, 1.0  ;;  %v1219_v60 = vadd.f32 0.18741608, %v1218_v50  ;;  %v846_v59 = vpop.permute.xlu1 %845 }
 0x130   : > { %5154 = vst [vmem:[#allocation2_spill] sm:$0xff] %v3900_v19  ;;  %v1231_v53 = vmul.f32 %v1230_v54, %v3809_v55  ;;  %v1263_v24 = vmul.f32 3.8918573e-05, %v3835_v15  ;;  %v3912_v33 = vmul.f32 %v1747_v41, %v3632_v31  ;;  %v1162_v12 = vand.u32 2147483647, %v3867_v26 }
 0x131   : > { %5155 = vst [vmem:[#allocation4_spill] sm:$0xff] %v3903_v48  ;;  %v2666_v10 = vpop.eup %2665  ;;  %v1181_v63 = vadd.f32 1.1283791, %v1180_v28  ;;  %v1292_v18 = vmul.f32 2.1237322e-06, %v3890_v27  ;;  %v1142_v2 = vmul.f32 %v1141_v7, %v3753_v25  ;;  %vm1158_vm5 = vweird.f32 %v3867_v26 }
 0x132   : > { %5156 = vst [vmem:[#allocation13_spill] sm:$0xff] %v3912_v33  ;;  %v1154_v23 = vmul.f32 %v2666_v10, %v3867_v26  ;;  %v3918_v52 = vadd.f32 1.0, %v1231_v53  ;;  %v1257_v58 = vadd.f32 0.05243302, %v1256_v57  ;;  %v1264_v44 = vadd.f32 0.001143296, %v1263_v24 }
 0x133   : > { %v1293_v11 = vadd.f32 0.00028619796, %v1292_v18  ;;  %v1303_v39 = vmul.f32 3.8918573e-05, %v3890_v27  ;;  %v1164_v4 = vand.u32 2147483648, %v3867_v26  ;;  %v1220_v30 = vmul.f32 %v1219_v60, %v3809_v55 }
 0x134   : > { %v2668_v31 = vpop.eup %2667  ;;  %v1155_v13 = vsub.f32 1.0, %v1154_v23  ;;  %2669 = vrcp.f32 %v3918_v52  ;;  %vm3925_vm6 = vcmp.eq.f32.partialorder %v1162_v12, 8.507059e+37  ;;  %v1182_v46 = vmul.f32 %v1181_v63, %v3760_v14 }
 0x135   : > { %v1194_v21 = vmul.f32 %v2668_v31, %v3884_v5  ;;  %v1202_v29 = vand.u32 2147483647, %v3884_v5  ;;  %vm1159_vm7 = vweird.f32 %v2666_v10  ;;  %v1265_v50 = vmul.f32 %v1264_v44, %v3835_v15 }
 0x136   : > { %v1156_v62 = vmul.f32 %v2666_v10, %v1155_v13  ;;  %v1294_v20 = vmul.f32 %v1293_v11, %v3890_v27  ;;  %v1204_v55 = vand.u32 2147483648, %v3884_v5  ;;  %v1258_v28 = vmul.f32 %v1257_v58, %v3835_v15  ;;  %vm3938_vm8 = vmor %vm1158_vm5, %vm1159_vm7  ;;  %v3950_v11 = vld [vmem:[%s5100_s3] sm:$0xf] }
 0x137   : > { %v1195_v41 = vsub.f32 1.0, %v1194_v21  ;;  %v1304_v54 = vadd.f32 0.001143296, %v1303_v39  ;;  %v1266_v57 = vadd.f32 0.014752088, %v1265_v50  ;;  %vm1199_vm9 = vweird.f32 %v2668_v31 }
 0x138   : > { %v1157_v7 = vadd.f32 %v2666_v10, %v1156_v62  ;;  %v1295_v60 = vadd.f32 0.0036580483, %v1294_v20  ;;  %v2748_v12 = vmov 27   ;;  %v1165_v23 = vor.u32 1.1754944e-38, %v1164_v4 }
 0x139   : > { %v1196_v53 = vmul.f32 %v2668_v31, %v1195_v41  ;;  %v1305_v24 = vmul.f32 %v1304_v54, %v3890_v27  ;;  %2646 = vset.pattern.permute.xlu2 %v2748_v12  ;;  %v1267_v58 = vmul.f32 %v1266_v57, %v3835_v15  ;;  %v2749_v26 = vmov 26  }
 0x13a   : > { %v2670_v63 = vpop.eup %2669  ;;  %v1161_v18 = vsel %vm3938_vm8, %v2666_v10, %v1157_v7  ;;  %v1296_v44 = vmul.f32 %v1295_v60, %v3890_v27  ;;  %2645 = vset.pattern.permute.xlu1 %v2749_v26  ;;  %2286 = vperm.xlu2 %2646, %v3950_v11   ;;  %vm1198_vm10 = vweird.f32 %v3884_v5  ;;  %v1205_v13 = vor.u32 1.1754944e-38, %v1204_v55 }
 0x13b   : > { %v1197_v39 = vadd.f32 %v2668_v31, %v1196_v53  ;;  %v1234_v10 = vmul.f32 %v2670_v63, %v3918_v52  ;;  %2267 = vperm.xlu1 %2645, %v3950_v11   ;;  %v1166_v4 = vsel %vm3925_vm6, %v1165_v23, %v1161_v18  ;;  %vm1200_vm11 = vmor %vm1198_vm10, %vm1199_vm9  ;;  %v1268_v21 = vadd.f32 0.112945676, %v1267_v58 }
 0x13c   : > { %v1297_v62 = vadd.f32 0.05243302, %v1296_v44  ;;  %v1306_v50 = vadd.f32 0.014752088, %v1305_v24  ;;  %vm1203_vm12 = vcmp.eq.f32.partialorder %v1202_v29, 8.507059e+37  ;;  %v1244_v5 = vand.u32 2147483648, %v3918_v52 }
 0x13d   : > { %v1201_v20 = vsel %vm1200_vm11, %v2668_v31, %v1197_v39  ;;  %v1235_v41 = vsub.f32 1.0, %v1234_v10  ;;  %v1259_v54 = vadd.f32 0.18741608, %v1258_v28  ;;  %v1269_v55 = vmul.f32 %v1268_v21, %v3835_v15 }
 0x13e   : > { %v1206_v7 = vsel %vm1203_vm12, %v1205_v13, %v1201_v20  ;;  %v1298_v57 = vmul.f32 %v1297_v62, %v3890_v27  ;;  %v1167_v60 = vmul.f32 %v1166_v4, %v1142_v2  ;;  %vm1239_vm13 = vweird.f32 %v2670_v63  ;;  %v5164_v4 = vld [vmem:[#allocation6_spill] sm:$0xff]  ;;  %v5165_v62 = vld [vmem:[#allocation7_spill] sm:$0xff] }
 0x13f   : > { %v1236_v14 = vmul.f32 %v2670_v63, %v1235_v41  ;;  %v1307_v25 = vmul.f32 %v1306_v50, %v3890_v27  ;;  %v1749_v53 = vadd.f32 1.0, %v2533_v61  ;;  %v1207_v24 = vmul.f32 %v1206_v7, %v1182_v46  ;;  %v5163_v61 = vld [vmem:[#allocation5_spill] sm:$0xff] }
 0x140   : > { %vm1238_vm14 = vweird.f32 %v3918_v52  ;;  %v1270_v31 = vadd.f32 0.4994258, %v1269_v55  ;;  %v1242_v28 = vand.u32 2147483647, %v3918_v52  ;;  %v1299_v12 = vadd.f32 0.18741608, %v1298_v57 }
 0x141   : > { %v1237_v29 = vadd.f32 %v2670_v63, %v1236_v14  ;;  %v1308_v18 = vadd.f32 0.112945676, %v1307_v25  ;;  %v1221_v23 = vadd.f32 1.1283791, %v1220_v30  ;;  %vm3967_vm15 = vmor %vm1238_vm14, %vm1239_vm13  ;;  %v1260_v2 = vmul.f32 %v1259_v54, %v3835_v15  ;;  %v5168_v14 = vld [vmem:[#allocation8_spill] sm:$0xff] }
 0x142   : > { %v1271_v44 = vmul.f32 %v1270_v31, %v3835_v15  ;;  %v819_v46 = vadd.f32 %v5163_v61, %v3544_v8  ;;  %v2519_v26 = vclamps-f32 %v1167_v60, 1.0  ;;  %v1245_v52 = vor.u32 1.1754944e-38, %v1244_v5 }
 0x143   : > { %v1241_v39 = vsel %vm3967_vm15, %v2670_v63, %v1237_v29  ;;  %v1309_v13 = vmul.f32 %v1308_v18, %v3890_v27  ;;  %v2520_v30 = vclamps-f32 %v1207_v24, 1.0  ;;  %v820_v21 = vadd.f32 %v5164_v4, %v3552_v42 }
 0x144   : > { %v3978_v10 = vadd.f32 1.0, %v1271_v44  ;;  %v821_v15 = vadd.f32 %v5165_v62, %v3558_v32  ;;  %vm1243_vm0 = vcmp.eq.f32.partialorder %v1242_v28, 8.507059e+37  ;;  %v1300_v50 = vmul.f32 %v1299_v12, %v3890_v27 }
 0x145   : > { %v1310_v8 = vadd.f32 0.4994258, %v1309_v13  ;;  %v3985_v20 = vadd.f32 %v846_v59, %v819_v46  ;;  %v1246_v41 = vsel %vm1243_vm0, %v1245_v52, %v1241_v39  ;;  %v3988_v63 = vadd.f32 %v846_v59, %v820_v21 }
 0x146   : > { %2671 = vrcp.f32 %v3978_v10  ;;  %v3990_v54 = vadd.f32 %v846_v59, %v821_v15  ;;  %v1222_v7 = vmul.f32 %v1221_v23, %v3764_v51  ;;  %v1261_v5 = vadd.f32 1.1283791, %v1260_v2 }
 0x147   : > { %v1311_v42 = vmul.f32 %v1310_v8, %v3890_v27  ;;  %v1735_v55 = vadd.f32 1.0, %v2519_v26  ;;  %v3996_v32 = vmul.f32 %v3897_v35, %v3635_v3  ;;  %v3999_v57 = vmul.f32 %v1749_v53, %v3638_v9 }
 0x148   : > { %v1736_v60 = vadd.f32 1.0, %v2520_v30  ;;  %v822_v25 = vadd.f32 %v5168_v14, %v3564_v36  ;;  %v4003_v24 = vmul.f32 %v1246_v41, %v1222_v7  ;;  %v1301_v31 = vadd.f32 1.1283791, %v1300_v50 }
 0x149   : > { %5166 = vst [vmem:[#allocation5_spill] sm:$0xff] %v3996_v32  ;;  %v4005_v29 = vadd.f32 1.0, %v1311_v42  ;;  %v823_v51 = vadd.f32 %v3447_v38, %v3575_v34  ;;  %v1284_v27 = vand.u32 2147483648, %v3978_v10  ;;  %v4012_v3 = vmul.f32 %v3460_v16, %v3985_v20 }
 0x14a   : > { %5167 = vst [vmem:[#allocation6_spill] sm:$0xff] %v3999_v57  ;;  %v4016_v9 = vmul.f32 %v3460_v16, %v3988_v63  ;;  %v4020_v36 = vmul.f32 %v3460_v16, %v3990_v54  ;;  %v4023_v35 = vmul.f32 %v1261_v5, %v3783_v45  ;;  %v4027_v38 = vmul.f32 %v1735_v55, %v3747_v37 }
 0x14b   : > { %2673 = vrcp.f32 %v4005_v29  ;;  %v4029_v34 = vadd.f32 %v846_v59, %v822_v25  ;;  %v4034_v28 = vmul.f32 %v1736_v60, %v3773_v6  ;;  %v4036_v12 = vadd.f32 %v846_v59, %v823_v51 }
 0x14c   : > { %v4031_v53 = vpop.eup %2671  ;;  %v930_v18 = vmul.f32 %v4012_v3, %v4012_v3  ;;  %v970_v45 = vmul.f32 %v4016_v9, %v4016_v9  ;;  %v2521_v23 = vclamps-f32 %v4003_v24, 1.0  ;;  %vm1278_vm1 = vweird.f32 %v3978_v10 }
 0x14d   : > { %v1274_v37 = vmul.f32 %v4031_v53, %v3978_v10  ;;  %v1282_v58 = vand.u32 2147483647, %v3978_v10  ;;  %v4048_v6 = vmul.f32 %v1301_v31, %v3839_v43  ;;  %v1285_v2 = vor.u32 1.1754944e-38, %v1284_v27 }
 0x14e   : > { %v4050_v44 = vmin.f32 %v930_v18, 16.0  ;;  %v4052_v59 = vmin.f32 %v970_v45, 16.0  ;;  %v1010_v61 = vmul.f32 %v4020_v36, %v4020_v36  ;;  %v1322_v26 = vand.u32 2147483647, %v4005_v29 }
 0x14f   : > { %v1275_v46 = vsub.f32 1.0, %v1274_v37  ;;  %v4059_v39 = vmul.f32 %v3460_v16, %v4029_v34  ;;  %v2750_v30 = vmov 29   ;;  %v2751_v4 = vmov 28  }
 0x150   : > { %v932_v52 = vmul.f32 2.1237322e-06, %v4050_v44  ;;  %v943_v43 = vmul.f32 3.8918573e-05, %v4050_v44  ;;  %v972_v13 = vmul.f32 2.1237322e-06, %v4052_v59  ;;  %2648 = vset.pattern.permute.xlu2 %v2750_v30  ;;  %2647 = vset.pattern.permute.xlu1 %v2751_v4  ;;  %vm1279_vm2 = vweird.f32 %v4031_v53 }
 0x151   : > { %v4064_v21 = vpop.eup %2673  ;;  %v1276_v62 = vmul.f32 %v4031_v53, %v1275_v46  ;;  %v1324_v15 = vand.u32 2147483648, %v4005_v29  ;;  %v983_v50 = vmul.f32 3.8918573e-05, %v4052_v59  ;;  %v4069_v8 = vmin.f32 %v1010_v61, 16.0  ;;  %2324 = vperm.xlu2 %2648, %v3950_v11   ;;  %2305 = vperm.xlu1 %2647, %v3950_v11   ;;  %vm4094_vm5 = vmor %vm1278_vm1, %vm1279_vm2 }
 0x152   : > { %vm4074_vm3 = vcmp.eq.f32.partialorder %v1282_v58, 8.507059e+37  ;;  %v1314_v7 = vmul.f32 %v4064_v21, %v4005_v29  ;;  %vm1318_vm4 = vweird.f32 %v4005_v29  ;;  %v933_v5 = vadd.f32 0.00028619796, %v932_v52 }
 0x153   : > { %v944_v42 = vadd.f32 0.001143296, %v943_v43  ;;  %v1277_v55 = vadd.f32 %v4031_v53, %v1276_v62  ;;  %v973_v60 = vadd.f32 0.00028619796, %v972_v13  ;;  %v984_v14 = vadd.f32 0.001143296, %v983_v50 }
 0x154   : > { %v1012_v25 = vmul.f32 2.1237322e-06, %v4069_v8  ;;  %v1315_v31 = vsub.f32 1.0, %v1314_v7  ;;  %v934_v51 = vmul.f32 %v933_v5, %v4050_v44  ;;  %v1023_v18 = vmul.f32 3.8918573e-05, %v4069_v8 }
 0x155   : > { %v945_v27 = vmul.f32 %v944_v42, %v4050_v44  ;;  %v974_v45 = vmul.f32 %v973_v60, %v4052_v59  ;;  %v985_v37 = vmul.f32 %v984_v14, %v4052_v59  ;;  %v1050_v61 = vmul.f32 %v4059_v39, %v4059_v39 }
 0x156   : > { %v1013_v58 = vadd.f32 0.00028619796, %v1012_v25  ;;  %v1316_v52 = vmul.f32 %v4064_v21, %v1315_v31  ;;  %vm1319_vm6 = vweird.f32 %v4064_v21  ;;  %v935_v43 = vadd.f32 0.0036580483, %v934_v51 }
 0x157   : > { %v946_v13 = vadd.f32 0.014752088, %v945_v27  ;;  %v1281_v30 = vsel %vm4094_vm5, %v4031_v53, %v1277_v55  ;;  %v975_v4 = vadd.f32 0.0036580483, %v974_v45  ;;  %v986_v62 = vadd.f32 0.014752088, %v985_v37  ;;  %vm4125_vm8 = vmor %vm1318_vm4, %vm1319_vm6 }
 0x158   : > { %v1014_v50 = vmul.f32 %v1013_v58, %v4069_v8  ;;  %v1317_v10 = vadd.f32 %v4064_v21, %v1316_v52  ;;  %v936_v7 = vmul.f32 %v935_v43, %v4050_v44  ;;  %v1024_v42 = vadd.f32 0.001143296, %v1023_v18 }
 0x159   : > { %v947_v5 = vmul.f32 %v946_v13, %v4050_v44  ;;  %v4109_v60 = vmul.f32 %v3460_v16, %v4036_v12  ;;  %v976_v14 = vmul.f32 %v975_v4, %v4052_v59  ;;  %v987_v25 = vmul.f32 %v986_v62, %v4052_v59 }
 0x15a   : > { %v1015_v53 = vadd.f32 0.0036580483, %v1014_v50  ;;  %v5173_v55 = vmov 0   ;;  %vm4114_vm7 = vcmp.eq.f32.partialorder %v1322_v26, 8.507059e+37  ;;  %v937_v51 = vadd.f32 0.05243302, %v936_v7 }
 0x15b   : > { %2651 = vset.pattern.permute.xlu2 %v5173_v55  ;;  %v948_v27 = vadd.f32 0.112945676, %v947_v5  ;;  %v1025_v45 = vmul.f32 %v1024_v42, %v4069_v8  ;;  %v1286_v18 = vsel %vm4074_vm3, %v1285_v2, %v1281_v30  ;;  %v977_v58 = vadd.f32 0.05243302, %v976_v14 }
 0x15c   : > { %v988_v26 = vadd.f32 0.112945676, %v987_v25  ;;  %v4129_v46 = vmin.f32 %v1050_v61, 16.0  ;;  %v1321_v52 = vsel %vm4125_vm8, %v4064_v21, %v1317_v10  ;;  %v938_v43 = vmul.f32 %v937_v51, %v4050_v44 }
 0x15d   : > { %v949_v2 = vmul.f32 %v948_v27, %v4050_v44  ;;  %v1016_v41 = vmul.f32 %v1015_v53, %v4069_v8  ;;  %v1325_v13 = vor.u32 1.1754944e-38, %v1324_v15  ;;  %v978_v29 = vmul.f32 %v977_v58, %v4052_v59 }
 0x15e   : > { %v989_v30 = vmul.f32 %v988_v26, %v4052_v59  ;;  %v1026_v4 = vadd.f32 0.014752088, %v1025_v45  ;;  %v1287_v62 = vmul.f32 %v1286_v18, %v4023_v35  ;;  %v939_v61 = vadd.f32 0.18741608, %v938_v43 }
 0x15f   : > { %v950_v50 = vadd.f32 0.4994258, %v949_v2  ;;  %v1090_v7 = vmul.f32 %v4109_v60, %v4109_v60  ;;  %v1326_v21 = vsel %vm4114_vm7, %v1325_v13, %v1321_v52  ;;  %v979_v10 = vadd.f32 0.18741608, %v978_v29 }
 0x160   : > { %v990_v5 = vadd.f32 0.4994258, %v989_v30  ;;  %v1027_v42 = vmul.f32 %v1026_v4, %v4069_v8  ;;  %v940_v15 = vmul.f32 %v939_v61, %v4050_v44  ;;  %v1017_v25 = vadd.f32 0.05243302, %v1016_v41 }
 0x161   : > { %v951_v14 = vmul.f32 %v950_v50, %v4050_v44  ;;  %v1052_v53 = vmul.f32 2.1237322e-06, %v4129_v46  ;;  %v4149_v35 = vmul.f32 0.5, %v3985_v20  ;;  %v4152_v55 = vmul.f32 0.5, %v3988_v63 }
 0x162   : > { %v991_v31 = vmul.f32 %v990_v5, %v4052_v59  ;;  %v1028_v51 = vadd.f32 0.112945676, %v1027_v42  ;;  %v2522_v27 = vclamps-f32 %v1287_v62, 1.0  ;;  %v1737_v45 = vadd.f32 1.0, %v2521_v23 }
 0x163   : > { %v4157_v18 = vadd.f32 1.0, %v951_v14  ;;  %v980_v44 = vmul.f32 %v979_v10, %v4052_v59  ;;  %v4161_v37 = vmul.f32 %v1326_v21, %v4048_v6  ;;  %v1053_v63 = vadd.f32 0.00028619796, %v1052_v53 }
 0x164   : > { %v4163_v58 = vadd.f32 1.0, %v991_v31  ;;  %v1029_v20 = vmul.f32 %v1028_v51, %v4069_v8  ;;  %v941_v26 = vadd.f32 1.1283791, %v940_v15  ;;  %v1018_v52 = vmul.f32 %v1017_v25, %v4069_v8 }
 0x165   : > { %2675 = vrcp.f32 %v4157_v18  ;;  %v4168_v43 = vmin.f32 %v1090_v7, 16.0  ;;  %v4171_v24 = vmul.f32 0.5, %v3990_v54  ;;  %v4174_v23 = vmul.f32 0.5, %v4029_v34 }
 0x166   : > { %v4177_v6 = vmul.f32 0.5, %v4036_v12  ;;  %2677 = vrcp.f32 %v4163_v58  ;;  %v4180_v59 = vadd.f32 1.0, %v2522_v27  ;;  %v4183_v2 = vmul.f32 %v1737_v45, %v3882_v17 }
 0x167   : > { %v981_v41 = vadd.f32 1.1283791, %v980_v44  ;;  %v4187_v13 = vadd.f32 %v3474_v56, %v3484_v47  ;;  %v2523_v54 = vclamps-f32 %v4161_v37, 1.0  ;;  %v1030_v29 = vadd.f32 0.4994258, %v1029_v20 }
 0x168   : > { %v1054_v34 = vmul.f32 %v1053_v63, %v4129_v46  ;;  %v1063_v12 = vmul.f32 3.8918573e-05, %v4129_v46  ;;  %v942_v30 = vmul.f32 %v941_v26, %v4012_v3  ;;  %v962_v4 = vand.u32 2147483647, %v4157_v18 }
 0x169   : > { %v1019_v62 = vadd.f32 0.18741608, %v1018_v52  ;;  %v1092_v17 = vmul.f32 2.1237322e-06, %v4168_v43  ;;  %vm958_vm9 = vweird.f32 %v4157_v18  ;;  %v1031_v61 = vmul.f32 %v1030_v29, %v4069_v8 }
 0x16a   : > { %v1055_v56 = vadd.f32 0.0036580483, %v1054_v34  ;;  %v1064_v47 = vadd.f32 0.001143296, %v1063_v12  ;;  %v964_v7 = vand.u32 2147483648, %v4157_v18  ;;  %v982_v21 = vmul.f32 %v981_v41, %v4016_v9 }
 0x16b   : > { %v2676_v50 = vpop.eup %2675  ;;  %vm998_vm10 = vweird.f32 %v4163_v58  ;;  %v1093_v10 = vadd.f32 0.00028619796, %v1092_v17  ;;  %v4201_v42 = vadd.f32 1.0, %v1031_v61  ;;  %v1103_v14 = vmul.f32 3.8918573e-05, %v4168_v43 }
 0x16c   : > { %v2678_v3 = vpop.eup %2677  ;;  %v954_v5 = vmul.f32 %v2676_v50, %v4157_v18  ;;  %v1056_v15 = vmul.f32 %v1055_v56, %v4129_v46  ;;  %vm4205_vm11 = vcmp.eq.f32.partialorder %v962_v4, 8.507059e+37  ;;  %v1065_v9 = vmul.f32 %v1064_v47, %v4129_v46 }
 0x16d   : > { %v994_v53 = vmul.f32 %v2678_v3, %v4163_v58  ;;  %v1094_v31 = vmul.f32 %v1093_v10, %v4168_v43  ;;  %v1002_v27 = vand.u32 2147483647, %v4163_v58  ;;  %v1004_v45 = vand.u32 2147483648, %v4163_v58 }
 0x16e   : > { %v955_v51 = vsub.f32 1.0, %v954_v5  ;;  %2679 = vrcp.f32 %v4201_v42  ;;  %v1020_v20 = vmul.f32 %v1019_v62, %v4069_v8  ;;  %v1057_v63 = vadd.f32 0.05243302, %v1056_v15 }
 0x16f   : > { %v995_v44 = vsub.f32 1.0, %v994_v53  ;;  %v1066_v26 = vadd.f32 0.014752088, %v1065_v9  ;;  %vm959_vm12 = vweird.f32 %v2676_v50  ;;  %v1095_v41 = vadd.f32 0.0036580483, %v1094_v31 }
 0x170   : > { %v956_v52 = vmul.f32 %v2676_v50, %v955_v51  ;;  %v1104_v29 = vadd.f32 0.001143296, %v1103_v14  ;;  %v965_v34 = vor.u32 1.1754944e-38, %v964_v7  ;;  %vm999_vm13 = vweird.f32 %v2678_v3  ;;  %vm960_vm14 = vmor %vm958_vm9, %vm959_vm12 }
 0x171   : > { %v996_v12 = vmul.f32 %v2678_v3, %v995_v44  ;;  %v1067_v4 = vmul.f32 %v1066_v26, %v4129_v46  ;;  %v1058_v61 = vmul.f32 %v1057_v63, %v4129_v46  ;;  %v1096_v56 = vmul.f32 %v1095_v41, %v4168_v43  ;;  %vm1000_vm0 = vmor %vm998_vm10, %vm999_vm13 }
 0x172   : > { %v957_v17 = vadd.f32 %v2676_v50, %v956_v52  ;;  %v1105_v47 = vmul.f32 %v1104_v29, %v4168_v43  ;;  %vm1003_vm15 = vcmp.eq.f32.partialorder %v1002_v27, 8.507059e+37  ;;  %v1005_v62 = vor.u32 1.1754944e-38, %v1004_v45 }
 0x173   : > { %v997_v8 = vadd.f32 %v2678_v3, %v996_v12  ;;  %v1068_v10 = vadd.f32 0.112945676, %v1067_v4  ;;  %v1021_v15 = vadd.f32 1.1283791, %v1020_v20  ;;  %v1097_v14 = vadd.f32 0.05243302, %v1096_v56 }
 0x174   : > { %v2680_v5 = vpop.eup %2679  ;;  %v961_v7 = vsel %vm960_vm14, %v2676_v50, %v957_v17  ;;  %v1106_v53 = vadd.f32 0.014752088, %v1105_v47  ;;  %v1042_v18 = vand.u32 2147483647, %v4201_v42  ;;  %v1059_v45 = vadd.f32 0.18741608, %v1058_v61  ;;  %v4236_v17 = vpop.permute.xlu0 %1773 }
 0x175   : > { %v966_v9 = vsel %vm4205_vm11, %v965_v34, %v961_v7  ;;  %v1001_v31 = vsel %vm1000_vm0, %v2678_v3, %v997_v8  ;;  %v1034_v51 = vmul.f32 %v2680_v5, %v4201_v42  ;;  %v1069_v63 = vmul.f32 %v1068_v10, %v4129_v46 }
 0x176   : > { %v967_v44 = vmul.f32 %v966_v9, %v942_v30  ;;  %v1006_v27 = vsel %vm1003_vm15, %v1005_v62, %v1001_v31  ;;  %v1098_v58 = vmul.f32 %v1097_v14, %v4168_v43  ;;  %v1107_v20 = vmul.f32 %v1106_v53, %v4168_v43 }
 0x177   : > { %v1007_v50 = vmul.f32 %v1006_v27, %v982_v21  ;;  %v1035_v26 = vsub.f32 1.0, %v1034_v51  ;;  %vm1039_vm1 = vweird.f32 %v2680_v5  ;;  %v1044_v25 = vand.u32 2147483648, %v4201_v42  ;;  %v856_v51 = vpop.permute.xlu1 %855  ;;  %v5182_v27 = vld [vmem:[#allocation9_spill] sm:$0xff] }
 0x178   : > { %v2514_v52 = vclamps-f32 %v967_v44, 1.0  ;;  %v1070_v3 = vadd.f32 0.4994258, %v1069_v63  ;;  %v1099_v34 = vadd.f32 0.18741608, %v1098_v58  ;;  %v1739_v30 = vadd.f32 1.0, %v2523_v54 }
 0x179   : > { %v2515_v41 = vclamps-f32 %v1007_v50, 1.0  ;;  %v1036_v29 = vmul.f32 %v2680_v5, %v1035_v26  ;;  %v1108_v12 = vadd.f32 0.112945676, %v1107_v20  ;;  %vm1038_vm2 = vweird.f32 %v4201_v42  ;;  %v5183_v50 = vld [vmem:[#allocation12_spill] sm:$0xff] }
 0x17a   : > { %v1071_v21 = vmul.f32 %v1070_v3, %v4129_v46  ;;  %v1730_v4 = vadd.f32 1.0, %v2514_v52  ;;  %v1060_v56 = vmul.f32 %v1059_v45, %v4129_v46  ;;  %v4242_v62 = vmul.f32 %v4180_v59, %v3893_v49  ;;  %vm1040_vm3 = vmor %vm1038_vm2, %vm1039_vm1 }
 0x17b   : > { %v1037_v61 = vadd.f32 %v2680_v5, %v1036_v29  ;;  %v1109_v47 = vmul.f32 %v1108_v12, %v4168_v43  ;;  %v1731_v8 = vadd.f32 1.0, %v2515_v41  ;;  %v1045_v37 = vor.u32 1.1754944e-38, %v1044_v25 }
 0x17c   : > { %v4245_v54 = vadd.f32 1.0, %v1071_v21  ;;  %v1100_v42 = vmul.f32 %v1099_v34, %v4168_v43  ;;  %v1022_v10 = vmul.f32 %v1021_v15, %v4020_v36  ;;  %vm1043_vm4 = vcmp.eq.f32.partialorder %v1042_v18, 8.507059e+37  ;;  %v5180_v18 = vld [vmem:[#allocation3_spill] sm:$0xff]  ;;  %v4293_v21 = vpop.permute.xlu0 %1868 }
 0x17d   : > { %v1041_v7 = vsel %vm1040_vm3, %v2680_v5, %v1037_v61  ;;  %v1110_v14 = vadd.f32 0.4994258, %v1109_v47  ;;  %v4251_v53 = vmul.f32 %v1730_v4, %v4149_v35  ;;  %v4254_v49 = vmul.f32 %v1731_v8, %v4152_v55  ;;  %v5181_v35 = vld [vmem:[#allocation11_spill] sm:$0xff] }
 0x17e   : > { %v1046_v46 = vsel %vm1043_vm4, %v1045_v37, %v1041_v7  ;;  %2681 = vrcp.f32 %v4245_v54  ;;  %v4257_v59 = vmul.f32 %v1739_v30, %v3906_v40  ;;  %v1061_v9 = vadd.f32 1.1283791, %v1060_v56  ;;  %v4291_v30 = vpop.permute.xlu2 %1811 }
 0x17f   : > { %v1111_v31 = vmul.f32 %v1110_v14, %v4168_v43  ;;  %v830_v36 = vadd.f32 %v3478_v0, %v3486_v1  ;;  %v1047_v5 = vmul.f32 %v1046_v46, %v1022_v10  ;;  %v1101_v15 = vadd.f32 1.1283791, %v1100_v42  ;;  %v5184_v43 = vld [vmem:[#allocation10_spill] sm:$0xff] }
 0x180   : > { %v831_v44 = vadd.f32 %v5180_v18, %v3496_v22  ;;  %v832_v45 = vadd.f32 %v5182_v27, %v5181_v35  ;;  %v1082_v55 = vand.u32 2147483647, %v4245_v54  ;;  %v1084_v40 = vand.u32 2147483648, %v4245_v54 }
 0x181   : > { %v4268_v63 = vadd.f32 1.0, %v1111_v31  ;;  %v833_v26 = vadd.f32 %v5184_v43, %v5183_v50  ;;  %v1814_v58 = vperm.slane %v4251_v53, 2  ;;  %v1815_v0 = vperm.slane %v4254_v49, 2 }
 0x182   : > { %v1871_v1 = vperm.slane %v4251_v53, 5  ;;  %v873_v22 = vadd.f32 %v856_v51, %v4187_v13  ;;  %v1062_v20 = vmul.f32 %v1061_v9, %v4059_v39  ;;  %v874_v52 = vadd.f32 %v856_v51, %v830_v36 }
 0x183   : > { %2683 = vrcp.f32 %v4268_v63  ;;  %v4278_v25 = vadd.f32 %v856_v51, %v831_v44  ;;  %v2516_v41 = vclamps-f32 %v1047_v5, 1.0  ;;  %vm1078_vm5 = vweird.f32 %v4245_v54 }
 0x184   : > { %v2682_v3 = vpop.eup %2681  ;;  %v4282_v29 = vmul.f32 %v1101_v15, %v4109_v60  ;;  %v4284_v34 = vadd.f32 %v856_v51, %v832_v45  ;;  %vm4287_vm6 = vcmp.eq.f32.partialorder %v1082_v55, 8.507059e+37  ;;  %v1085_v39 = vor.u32 1.1754944e-38, %v1084_v40 }
 0x185   : > { %v1074_v12 = vmul.f32 %v2682_v3, %v4245_v54  ;;  %v1872_v4 = vperm.slane %v4254_v49, 5  ;;  %v4297_v61 = vmul.f32 %v1814_v58, %v4291_v30  ;;  %v4300_v60 = vmul.f32 %v1815_v0, %v4291_v30 }
 0x186   : > { %v4303_v56 = vmul.f32 %v1871_v1, %v4293_v21  ;;  %v4305_v47 = vadd.f32 %v856_v51, %v833_v26  ;;  %v4308_v37 = vmul.f32 %v3460_v16, %v873_v22  ;;  %v4311_v42 = vmul.f32 %v3460_v16, %v874_v52 }
 0x187   : > { %v1075_v8 = vsub.f32 1.0, %v1074_v12  ;;  %v4315_v10 = vmul.f32 %v3460_v16, %v4278_v25  ;;  %vm1079_vm7 = vweird.f32 %v2682_v3  ;;  %vm1118_vm8 = vweird.f32 %v4268_v63 }
 0x188   : > { %v1122_v7 = vand.u32 2147483647, %v4268_v63  ;;  %v1124_v14 = vand.u32 2147483648, %v4268_v63  ;;  %v1732_v46 = vadd.f32 1.0, %v2516_v41  ;;  %v1330_v51 = vmul.f32 %v4308_v37, %v4308_v37  ;;  %vm1080_vm9 = vmor %vm1078_vm5, %vm1079_vm7 }
 0x189   : > { %v2684_v9 = vpop.eup %2683  ;;  %v1076_v31 = vmul.f32 %v2682_v3, %v1075_v8  ;;  %v1370_v36 = vmul.f32 %v4311_v42, %v4311_v42  ;;  %v1410_v5 = vmul.f32 %v4315_v10, %v4315_v10  ;;  %v4328_v18 = vmul.f32 %v1872_v4, %v4293_v21 }
 0x18a   : > { %v1114_v15 = vmul.f32 %v2684_v9, %v4268_v63  ;;  %v4330_v44 = vmul.f32 0.5, %v873_v22  ;;  %v4332_v35 = vmul.f32 0.5, %v874_v52  ;;  %v4334_v45 = vmin.f32 %v1330_v51, 16.0 }
 0x18b   : > { %v1077_v27 = vadd.f32 %v2682_v3, %v1076_v31  ;;  %v4336_v55 = vmin.f32 %v1370_v36, 16.0  ;;  %v4338_v40 = vmin.f32 %v1410_v5, 16.0  ;;  %vm1119_vm10 = vweird.f32 %v2684_v9 }
 0x18c   : > { %v1115_v50 = vsub.f32 1.0, %v1114_v15  ;;  %vm4343_vm11 = vcmp.eq.f32.partialorder %v1122_v7, 8.507059e+37  ;;  %v1332_v58 = vmul.f32 2.1237322e-06, %v4334_v45  ;;  %v1343_v0 = vmul.f32 3.8918573e-05, %v4334_v45  ;;  %vm1120_vm12 = vmor %vm1118_vm8, %vm1119_vm10 }
 0x18d   : > { %v1081_v26 = vsel %vm1080_vm9, %v2682_v3, %v1077_v27  ;;  %v1372_v1 = vmul.f32 2.1237322e-06, %v4336_v55  ;;  %v2752_v22 = vmov 31   ;;  %v1383_v41 = vmul.f32 3.8918573e-05, %v4336_v55 }
 0x18e   : > { %2650 = vset.pattern.permute.xlu1 %v2752_v22  ;;  %v1086_v52 = vsel %vm4287_vm6, %v1085_v39, %v1081_v26  ;;  %v1116_v54 = vmul.f32 %v2684_v9, %v1115_v50  ;;  %v1412_v12 = vmul.f32 2.1237322e-06, %v4338_v40  ;;  %v1333_v3 = vadd.f32 0.00028619796, %v1332_v58 }
 0x18f   : > { %2362 = vperm.xlu1 %2650, %v3950_v11   ;;  %v1087_v4 = vmul.f32 %v1086_v52, %v1062_v20  ;;  %v1344_v8 = vadd.f32 0.001143296, %v1343_v0  ;;  %v1373_v7 = vadd.f32 0.00028619796, %v1372_v1  ;;  %v1384_v51 = vadd.f32 0.001143296, %v1383_v41 }
 0x190   : > { %v1117_v31 = vadd.f32 %v2684_v9, %v1116_v54  ;;  %v1413_v36 = vadd.f32 0.00028619796, %v1412_v12  ;;  %v1423_v5 = vmul.f32 3.8918573e-05, %v4338_v40  ;;  %v1125_v13 = vor.u32 1.1754944e-38, %v1124_v14 }
 0x191   : > { %v1334_v39 = vmul.f32 %v1333_v3, %v4334_v45  ;;  %v1345_v15 = vmul.f32 %v1344_v8, %v4334_v45  ;;  %v1374_v11 = vmul.f32 %v1373_v7, %v4336_v55  ;;  %v2517_v20 = vclamps-f32 %v1087_v4, 1.0 }
 0x192   : > { %v1121_v27 = vsel %vm1120_vm12, %v2684_v9, %v1117_v31  ;;  %v1385_v50 = vmul.f32 %v1384_v51, %v4336_v55  ;;  %v1414_v26 = vmul.f32 %v1413_v36, %v4338_v40  ;;  %v1424_v63 = vadd.f32 0.001143296, %v1423_v5 }
 0x193   : > { %v1126_v58 = vsel %vm4343_vm11, %v1125_v13, %v1121_v27  ;;  %v1335_v0 = vadd.f32 0.0036580483, %v1334_v39  ;;  %v1346_v1 = vadd.f32 0.014752088, %v1345_v15  ;;  %v4368_v22 = vmul.f32 %v1732_v46, %v4171_v24 }
 0x194   : > { %v1127_v14 = vmul.f32 %v1126_v58, %v4282_v29  ;;  %v1375_v52 = vadd.f32 0.0036580483, %v1374_v11  ;;  %v1386_v54 = vadd.f32 0.014752088, %v1385_v50  ;;  %v4371_v41 = vmul.f32 0.5, %v4278_v25 }
 0x195   : > { %v1336_v9 = vmul.f32 %v1335_v0, %v4334_v45  ;;  %v1347_v12 = vmul.f32 %v1346_v1, %v4334_v45  ;;  %v1415_v4 = vadd.f32 0.0036580483, %v1414_v26  ;;  %v1733_v3 = vadd.f32 1.0, %v2517_v20 }
 0x196   : > { %v2518_v43 = vclamps-f32 %v1127_v14, 1.0  ;;  %v1376_v8 = vmul.f32 %v1375_v52, %v4336_v55  ;;  %v1387_v7 = vmul.f32 %v1386_v54, %v4336_v55  ;;  %v4379_v24 = vmul.f32 %v3460_v16, %v4284_v34 }
 0x197   : > { %v1337_v29 = vadd.f32 0.05243302, %v1336_v9  ;;  %v1348_v46 = vadd.f32 0.112945676, %v1347_v12  ;;  %v1425_v25 = vmul.f32 %v1424_v63, %v4338_v40  ;;  %v4384_v51 = vmul.f32 %v3460_v16, %v4305_v47 }
 0x198   : > { %v1734_v31 = vadd.f32 1.0, %v2518_v43  ;;  %v1377_v36 = vadd.f32 0.05243302, %v1376_v8  ;;  %v1388_v5 = vadd.f32 0.112945676, %v1387_v7  ;;  %v4387_v13 = vmul.f32 0.5, %v4284_v34 }
 0x199   : > { %v1338_v39 = vmul.f32 %v1337_v29, %v4334_v45  ;;  %v1349_v15 = vmul.f32 %v1348_v46, %v4334_v45  ;;  %v1416_v11 = vmul.f32 %v1415_v4, %v4338_v40  ;;  %v4393_v20 = vmul.f32 %v1733_v3, %v4174_v23 }
 0x19a   : > { %v1816_v27 = vperm.slane %v4368_v22, 2  ;;  %v1378_v50 = vmul.f32 %v1377_v36, %v4336_v55  ;;  %v1389_v16 = vmul.f32 %v1388_v5, %v4336_v55  ;;  %v4399_v26 = vmul.f32 %v1734_v31, %v4177_v6 }
 0x19b   : > { %v1339_v34 = vadd.f32 0.18741608, %v1338_v39  ;;  %v1350_v58 = vadd.f32 0.4994258, %v1349_v15  ;;  %v1426_v0 = vadd.f32 0.014752088, %v1425_v25  ;;  %v1450_v14 = vmul.f32 %v4379_v24, %v4379_v24 }
 0x19c   : > { %v1379_v1 = vadd.f32 0.18741608, %v1378_v50  ;;  %v1390_v63 = vadd.f32 0.4994258, %v1389_v16  ;;  %v1490_v23 = vmul.f32 %v4384_v51, %v4384_v51  ;;  %v1417_v9 = vadd.f32 0.05243302, %v1416_v11 }
 0x19d   : > { %v1340_v52 = vmul.f32 %v1339_v34, %v4334_v45  ;;  %v1351_v54 = vmul.f32 %v1350_v58, %v4334_v45  ;;  %v1427_v12 = vmul.f32 %v1426_v0, %v4338_v40  ;;  %v1817_v6 = vperm.slane %v4393_v20, 2 }
 0x19e   : > { %v1873_v4 = vperm.slane %v4368_v22, 5  ;;  %v1874_v43 = vperm.slane %v4393_v20, 5  ;;  %v1391_v3 = vmul.f32 %v1390_v63, %v4336_v55  ;;  %v1818_v8 = vperm.slane %v4399_v26, 2 }
 0x19f   : > { %v1875_v7 = vperm.slane %v4399_v26, 5  ;;  %v4414_v29 = vadd.f32 1.0, %v1351_v54  ;;  %v1380_v46 = vmul.f32 %v1379_v1, %v4336_v55  ;;  %v4418_v45 = vmul.f32 0.5, %v4305_v47 }
 0x1a0   : > { %v4420_v25 = vadd.f32 1.0, %v1391_v3  ;;  %v1428_v31 = vadd.f32 0.112945676, %v1427_v12  ;;  %v4422_v36 = vmin.f32 %v1450_v14, 16.0  ;;  %v1341_v5 = vadd.f32 1.1283791, %v1340_v52 }
 0x1a1   : > { %2685 = vrcp.f32 %v4414_v29  ;;  %v1418_v39 = vmul.f32 %v1417_v9, %v4338_v40  ;;  %v4426_v15 = vmin.f32 %v1490_v23, 16.0  ;;  %v4429_v11 = vmul.f32 %v1816_v27, %v4291_v30 }
 0x1a2   : > { %v4432_v55 = vmul.f32 %v1817_v6, %v4291_v30  ;;  %v4435_v47 = vmul.f32 %v1873_v4, %v4293_v21  ;;  %2687 = vrcp.f32 %v4420_v25  ;;  %v4439_v50 = vmul.f32 %v1818_v8, %v4291_v30 }
 0x1a3   : > { %v4442_v16 = vmul.f32 %v1874_v43, %v4293_v21  ;;  %v4445_v34 = vmul.f32 %v1875_v7, %v4293_v21  ;;  %v1381_v58 = vadd.f32 1.1283791, %v1380_v46  ;;  %v1362_v27 = vand.u32 2147483647, %v4414_v29 }
 0x1a4   : > { %v1429_v0 = vmul.f32 %v1428_v31, %v4338_v40  ;;  %v1452_v1 = vmul.f32 2.1237322e-06, %v4422_v36  ;;  %v1463_v63 = vmul.f32 3.8918573e-05, %v4422_v36  ;;  %v1342_v14 = vmul.f32 %v1341_v5, %v4308_v37 }
 0x1a5   : > { %v1364_v30 = vand.u32 2147483648, %v4414_v29  ;;  %v1419_v23 = vadd.f32 0.18741608, %v1418_v39  ;;  %v1492_v52 = vmul.f32 2.1237322e-06, %v4426_v15  ;;  %vm1358_vm13 = vweird.f32 %v4414_v29 }
 0x1a6   : > { %v1430_v21 = vadd.f32 0.4994258, %v1429_v0  ;;  %v1453_v54 = vadd.f32 0.00028619796, %v1452_v1  ;;  %v1464_v9 = vadd.f32 0.001143296, %v1463_v63  ;;  %v1382_v6 = vmul.f32 %v1381_v58, %v4311_v42 }
 0x1a7   : > { %v2686_v12 = vpop.eup %2685  ;;  %vm1398_vm14 = vweird.f32 %v4420_v25  ;;  %v1493_v4 = vadd.f32 0.00028619796, %v1492_v52  ;;  %v1503_v43 = vmul.f32 3.8918573e-05, %v4426_v15  ;;  %vm4459_vm15 = vcmp.eq.f32.partialorder %v1362_v27, 8.507059e+37 }
 0x1a8   : > { %v2688_v3 = vpop.eup %2687  ;;  %v1354_v37 = vmul.f32 %v2686_v12, %v4414_v29  ;;  %v1402_v7 = vand.u32 2147483647, %v4420_v25  ;;  %v1431_v46 = vmul.f32 %v1430_v21, %v4338_v40  ;;  %v1454_v31 = vmul.f32 %v1453_v54, %v4422_v36 }
 0x1a9   : > { %v1394_v42 = vmul.f32 %v2688_v3, %v4420_v25  ;;  %v1404_v5 = vand.u32 2147483648, %v4420_v25  ;;  %v1465_v39 = vmul.f32 %v1464_v9, %v4422_v36  ;;  %v1494_v58 = vmul.f32 %v1493_v4, %v4426_v15 }
 0x1aa   : > { %v1355_v0 = vsub.f32 1.0, %v1354_v37  ;;  %v4470_v1 = vadd.f32 1.0, %v1431_v46  ;;  %v1455_v27 = vadd.f32 0.0036580483, %v1454_v31  ;;  %v1504_v63 = vadd.f32 0.001143296, %v1503_v43 }
 0x1ab   : > { %v1395_v52 = vsub.f32 1.0, %v1394_v42  ;;  %v1420_v57 = vmul.f32 %v1419_v23, %v4338_v40  ;;  %v1466_v32 = vadd.f32 0.014752088, %v1465_v39  ;;  %v1495_v21 = vadd.f32 0.0036580483, %v1494_v58 }
 0x1ac   : > { %v1356_v33 = vmul.f32 %v2686_v12, %v1355_v0  ;;  %vm1359_vm0 = vweird.f32 %v2686_v12  ;;  %v1365_v54 = vor.u32 1.1754944e-38, %v1364_v30  ;;  %2689 = vrcp.f32 %v4470_v1 }
 0x1ad   : > { %v1396_v48 = vmul.f32 %v2688_v3, %v1395_v52  ;;  %vm1399_vm1 = vweird.f32 %v2688_v3  ;;  %v1456_v9 = vmul.f32 %v1455_v27, %v4422_v36  ;;  %v1467_v4 = vmul.f32 %v1466_v32, %v4422_v36  ;;  %vm1360_vm3 = vmor %vm1358_vm13, %vm1359_vm0 }
 0x1ae   : > { %v1357_v37 = vadd.f32 %v2686_v12, %v1356_v33  ;;  %vm4476_vm2 = vcmp.eq.f32.partialorder %v1402_v7, 8.507059e+37  ;;  %v1496_v40 = vmul.f32 %v1495_v21, %v4426_v15  ;;  %v1505_v23 = vmul.f32 %v1504_v63, %v4426_v15  ;;  %vm1400_vm4 = vmor %vm1398_vm14, %vm1399_vm1 }
 0x1af   : > { %v1397_v30 = vadd.f32 %v2688_v3, %v1396_v48  ;;  %v1405_v43 = vor.u32 1.1754944e-38, %v1404_v5  ;;  %v1457_v31 = vadd.f32 0.05243302, %v1456_v9  ;;  %v1468_v42 = vadd.f32 0.112945676, %v1467_v4 }
 0x1b0   : > { %v1361_v39 = vsel %vm1360_vm3, %v2686_v12, %v1357_v37  ;;  %v1421_v33 = vadd.f32 1.1283791, %v1420_v57  ;;  %v1497_v32 = vadd.f32 0.05243302, %v1496_v40  ;;  %v1506_v7 = vadd.f32 0.014752088, %v1505_v23 }
 0x1b1   : > { %v1366_v58 = vsel %vm4459_vm15, %v1365_v54, %v1361_v39  ;;  %v1401_v0 = vsel %vm1400_vm4, %v2688_v3, %v1397_v30  ;;  %v1458_v27 = vmul.f32 %v1457_v31, %v4422_v36  ;;  %v1469_v29 = vmul.f32 %v1468_v42, %v4422_v36 }
 0x1b2   : > { %v2690_v63 = vpop.eup %2689  ;;  %v1367_v48 = vmul.f32 %v1366_v58, %v1342_v14  ;;  %v1406_v5 = vsel %vm4476_vm2, %v1405_v43, %v1401_v0  ;;  %v1498_v12 = vmul.f32 %v1497_v32, %v4426_v15  ;;  %v1507_v25 = vmul.f32 %v1506_v7, %v4426_v15  ;;  %v4502_v43 = vpop.permute.xlu1 %1792 }
 0x1b3   : > { %v1407_v57 = vmul.f32 %v1406_v5, %v1382_v6  ;;  %v1434_v52 = vmul.f32 %v2690_v63, %v4470_v1  ;;  %v1442_v8 = vand.u32 2147483647, %v4470_v1  ;;  %v1459_v21 = vadd.f32 0.18741608, %v1458_v27  ;;  %v1850_v32 = vpop.permute.xlu2 %1849 }
 0x1b4   : > { %v2524_v3 = vclamps-f32 %v1367_v48, 1.0  ;;  %v1444_v54 = vand.u32 2147483648, %v4470_v1  ;;  %v1470_v9 = vadd.f32 0.4994258, %v1469_v29  ;;  %v1499_v4 = vadd.f32 0.18741608, %v1498_v12 }
 0x1b5   : > { %v2525_v37 = vclamps-f32 %v1407_v57, 1.0  ;;  %v1435_v14 = vsub.f32 1.0, %v1434_v52  ;;  %v1460_v46 = vmul.f32 %v1459_v21, %v4422_v36  ;;  %v1508_v40 = vadd.f32 0.112945676, %v1507_v25 }
 0x1b6   : > { %v1422_v23 = vmul.f32 %v1421_v33, %v4315_v10  ;;  %vm1438_vm5 = vweird.f32 %v4470_v1  ;;  %v1471_v6 = vmul.f32 %v1470_v9, %v4422_v36  ;;  %v1500_v30 = vmul.f32 %v1499_v4, %v4426_v15 }
 0x1b7   : > { %v1436_v31 = vmul.f32 %v2690_v63, %v1435_v14  ;;  %vm1439_vm6 = vweird.f32 %v2690_v63  ;;  %v1509_v42 = vmul.f32 %v1508_v40, %v4426_v15  ;;  %v1740_v39 = vadd.f32 1.0, %v2524_v3 }
 0x1b8   : > { %vm4505_vm7 = vcmp.eq.f32.partialorder %v1442_v8, 8.507059e+37  ;;  %v1445_v58 = vor.u32 1.1754944e-38, %v1444_v54  ;;  %v1461_v10 = vadd.f32 1.1283791, %v1460_v46  ;;  %v4509_v33 = vadd.f32 1.0, %v1471_v6  ;;  %vm1440_vm8 = vmor %vm1438_vm5, %vm1439_vm6 }
 0x1b9   : > { %v1437_v0 = vadd.f32 %v2690_v63, %v1436_v31  ;;  %v1510_v36 = vadd.f32 0.4994258, %v1509_v42  ;;  %v1741_v27 = vadd.f32 1.0, %v2525_v37  ;;  %v1966_v29 = vperm.slane %v4027_v38, 2 }
 0x1ba   : > { %2691 = vrcp.f32 %v4509_v33  ;;  %v1484_v48 = vand.u32 2147483648, %v4509_v33  ;;  %v1501_v5 = vadd.f32 1.1283791, %v1500_v30  ;;  %v1852_v12 = vperm.slane %v4251_v53, 4  ;;  %v4552_v42 = vpop.permute.xlu1 %1830 }
 0x1bb   : > { %v1441_v25 = vsel %vm1440_vm8, %v2690_v63, %v1437_v0  ;;  %v1511_v57 = vmul.f32 %v1510_v36, %v4426_v15  ;;  %v4519_v52 = vmul.f32 %v1740_v39, %v4330_v44  ;;  %v1853_v8 = vperm.slane %v4254_v49, 4  ;;  %v4561_v36 = vpop.permute.xlu2 %1906 }
 0x1bc   : > { %v1446_v21 = vsel %vm4505_vm7, %v1445_v58, %v1441_v25  ;;  %v4525_v1 = vmul.f32 %v1461_v10, %v4379_v24  ;;  %v1854_v3 = vperm.slane %v4368_v22, 4  ;;  %v1855_v54 = vperm.slane %v4393_v20, 4 }
 0x1bd   : > { %v1447_v9 = vmul.f32 %v1446_v21, %v1422_v23  ;;  %v1482_v63 = vand.u32 2147483647, %v4509_v33  ;;  %v4530_v4 = vadd.f32 1.0, %v1511_v57  ;;  %v4533_v44 = vmul.f32 %v1741_v27, %v4332_v35 }
 0x1be   : > { %v1485_v15 = vor.u32 1.1754944e-38, %v1484_v48  ;;  %v4536_v37 = vmul.f32 %v1501_v5, %v4384_v51  ;;  %v1856_v14 = vperm.slane %v4399_v26, 4  ;;  %v4539_v24 = vmul.f32 %v1852_v12, %v1850_v32  ;;  %v1964_v12 = vpop.permute.xlu0 %1963 }
 0x1bf   : > { %v2526_v46 = vclamps-f32 %v1447_v9, 1.0  ;;  %vm1478_vm9 = vweird.f32 %v4509_v33  ;;  %2693 = vrcp.f32 %v4530_v4  ;;  %v4543_v40 = vmul.f32 %v1853_v8, %v1850_v32 }
 0x1c0   : > { %v1967_v23 = vperm.slane %v4034_v28, 2  ;;  %v2692_v6 = vpop.eup %2691  ;;  %v1524_v35 = vand.u32 2147483648, %v4530_v4  ;;  %v4547_v30 = vmul.f32 %v1854_v3, %v1850_v32  ;;  %v4549_v51 = vmul.f32 %v1855_v54, %v1850_v32  ;;  %v2380_v3 = vld [vmem:[%s5101_s4] sm:$0xf] }
 0x1c1   : > { %v1968_v31 = vperm.slane %v4183_v2, 2  ;;  %v1474_v39 = vmul.f32 %v2692_v6, %v4509_v33  ;;  %vm4555_vm10 = vcmp.eq.f32.partialorder %v1482_v63, 8.507059e+37  ;;  %v1742_v58 = vadd.f32 1.0, %v2526_v46  ;;  %2383 = vperm.xlu2 %2651, %v2380_v3  }
 0x1c2   : > { %v1969_v10 = vperm.slane %v4242_v62, 2  ;;  %v1970_v0 = vperm.slane %v4257_v59, 2  ;;  %vm1479_vm11 = vweird.f32 %v2692_v6  ;;  %v1522_v27 = vand.u32 2147483647, %v4530_v4 }
 0x1c3   : > { %v1525_v48 = vor.u32 1.1754944e-38, %v1524_v35  ;;  %v4564_v5 = vmul.f32 %v1856_v14, %v1850_v32  ;;  %v1475_v25 = vsub.f32 1.0, %v1474_v39  ;;  %v4566_v57 = vmul.f32 %v1966_v29, %v1964_v12  ;;  %vm1480_vm15 = vmor %vm1478_vm9, %vm1479_vm11 }
 0x1c4   : > { %v4568_v8 = vmul.f32 %v1967_v23, %v1964_v12  ;;  %v4570_v21 = vmul.f32 %v1968_v31, %v1964_v12  ;;  %vm1518_vm12 = vweird.f32 %v4530_v4  ;;  %v1909_v54 = vperm.slane %v4251_v53, 7 }
 0x1c5   : > { %5197 = vst [vmem:[#allocation7_spill] sm:$0xff] %v4566_v57  ;;  %v1910_v9 = vperm.slane %v4254_v49, 7  ;;  %v1911_v32 = vperm.slane %v4368_v22, 7  ;;  %v1912_v63 = vperm.slane %v4393_v20, 7  ;;  %v2694_v29 = vpop.eup %2693  ;;  %v1476_v14 = vmul.f32 %v2692_v6, %v1475_v25  ;;  %v4618_v57 = vpop.permute.xlu1 %1887 }
 0x1c6   : > { %5198 = vst [vmem:[#allocation8_spill] sm:$0xff] %v4568_v8  ;;  %v4581_v46 = vmul.f32 %v1742_v58, %v4371_v41  ;;  %v4583_v23 = vmul.f32 %v1969_v10, %v1964_v12  ;;  %v4585_v35 = vmul.f32 %v1970_v0, %v1964_v12  ;;  %v1514_v31 = vmul.f32 %v2694_v29, %v4530_v4 }
 0x1c7   : > { %5199 = vst [vmem:[#allocation3_spill] sm:$0xff] %v4570_v21  ;;  %vm4588_vm13 = vcmp.eq.f32.partialorder %v1522_v27, 8.507059e+37  ;;  %v1913_v21 = vperm.slane %v4399_v26, 7  ;;  %v1776_v8 = vperm.slane %v4251_v53, 0  ;;  %v1777_v3 = vperm.slane %v4254_v49, 0 }
 0x1c8   : > { %5200 = vst [vmem:[#allocation11_spill] sm:$0xff] %v4583_v23  ;;  %v1477_v25 = vadd.f32 %v2692_v6, %v1476_v14  ;;  %vm1519_vm14 = vweird.f32 %v2694_v29  ;;  %v4596_v41 = vmul.f32 %v1909_v54, %v4561_v36  ;;  %v4599_v58 = vmul.f32 %v1910_v9, %v4561_v36 }
 0x1c9   : > { %5201 = vst [vmem:[#allocation9_spill] sm:$0xff] %v4585_v35  ;;  %v1515_v10 = vsub.f32 1.0, %v1514_v31  ;;  %v4605_v0 = vmul.f32 %v1911_v32, %v4561_v36  ;;  %v4608_v27 = vmul.f32 %v1912_v63, %v4561_v36  ;;  %v1778_v12 = vperm.slane %v4368_v22, 0  ;;  %vm1520_vm0 = vmor %vm1518_vm12, %vm1519_vm14 }
 0x1ca   : > { %5204 = vst [vmem:[#allocation12_spill] sm:$0xff] %v4596_v41  ;;  %v1481_v14 = vsel %vm1480_vm15, %v2692_v6, %v1477_v25  ;;  %v1779_v54 = vperm.slane %v4393_v20, 0  ;;  %v1780_v35 = vperm.slane %v4399_v26, 0  ;;  %v1795_v9 = vperm.slane %v4251_v53, 1 }
 0x1cb   : > { %5205 = vst [vmem:[#allocation10_spill] sm:$0xff] %v4599_v58  ;;  %v1486_v33 = vsel %vm4555_vm10, %v1485_v15, %v1481_v14  ;;  %v1516_v23 = vmul.f32 %v2694_v29, %v1515_v10  ;;  %v1781_v31 = vmul.f32 %v1776_v8, %v4236_v17  ;;  %v1782_v32 = vmul.f32 %v1777_v3, %v4236_v17  ;;  %v2059_v3 = vpop.permute.xlu0 %2058 }
 0x1cc   : > { %5206 = vst [vmem:[#allocation14_spill] sm:$0xff] %v4605_v0  ;;  %v1487_v63 = vmul.f32 %v1486_v33, %v4525_v1  ;;  %v1783_v6 = vmul.f32 %v1778_v12, %v4236_v17  ;;  %v1796_v25 = vperm.slane %v4254_v49, 1  ;;  %v4624_v0 = vpop.permute.xlu2 %1944  ;;  %v1798_v15 = vperm.slane %v4393_v20, 1 }
 0x1cd   : > { %5207 = vst [vmem:[#allocation15_spill] sm:$0xff] %v4608_v27  ;;  %v1797_v27 = vperm.slane %v4368_v22, 1  ;;  %v1517_v58 = vadd.f32 %v2694_v29, %v1516_v23  ;;  %v1799_v7 = vperm.slane %v4399_v26, 1  ;;  %v1800_v8 = vmul.f32 %v1795_v9, %v4502_v43 }
 0x1ce   : > { %5208 = vst [vmem:[#allocation16_spill] sm:$0xff] %v4618_v57  ;;  %v2527_v10 = vclamps-f32 %v1487_v63, 1.0  ;;  %v1784_v1 = vmul.f32 %v1779_v54, %v4236_v17  ;;  %v1801_v12 = vmul.f32 %v1796_v25, %v4502_v43  ;;  %v1785_v23 = vmul.f32 %v1780_v35, %v4236_v17 }
 0x1cf   : > { %v1802_v14 = vmul.f32 %v1797_v27, %v4502_v43  ;;  %v1521_v33 = vsel %vm1520_vm0, %v2694_v29, %v1517_v58  ;;  %v1803_v41 = vmul.f32 %v1798_v15, %v4502_v43  ;;  %v1804_v57 = vmul.f32 %v1799_v7, %v4502_v43 }
 0x1d0   : > { %v1526_v9 = vsel %vm4588_vm13, %v1525_v48, %v1521_v33  ;;  %v1743_v63 = vadd.f32 1.0, %v2527_v10  ;;  %v4641_v4 = vmul.f32 %v1913_v21, %v4561_v36  ;;  %v2061_v54 = vperm.slane %v4027_v38, 7 }
 0x1d1   : > { %v1527_v25 = vmul.f32 %v1526_v9, %v4536_v37  ;;  %v1805_v19 = vadd.f32 %v1800_v8, %v1781_v31  ;;  %v1806_v27 = vadd.f32 %v1801_v12, %v1782_v32  ;;  %v2062_v29 = vperm.slane %v4034_v28, 7 }
 0x1d2   : > { %v1807_v17 = vadd.f32 %v1802_v14, %v1783_v6  ;;  %v2063_v35 = vperm.slane %v4183_v2, 7  ;;  %v2064_v43 = vperm.slane %v4242_v62, 7  ;;  %v2065_v39 = vperm.slane %v4257_v59, 7 }
 0x1d3   : > { %v2528_v48 = vclamps-f32 %v1527_v25, 1.0  ;;  %v1808_v58 = vadd.f32 %v1803_v41, %v1784_v1  ;;  %v1809_v15 = vadd.f32 %v1804_v57, %v1785_v23  ;;  %v1947_v36 = vperm.slane %v4027_v38, 1  ;;  %v4664_v41 = vpop.permute.xlu1 %1925 }
 0x1d4   : > { %v4651_v21 = vmul.f32 %v1743_v63, %v4387_v13  ;;  %v4653_v37 = vmul.f32 %v2061_v54, %v2059_v3  ;;  %v4655_v31 = vmul.f32 %v2062_v29, %v2059_v3  ;;  %v1948_v32 = vperm.slane %v4034_v28, 1  ;;  %v4672_v14 = vpop.permute.xlu2 %2001  ;;  %v2154_v63 = vpop.permute.xlu0 %2153 }
 0x1d5   : > { %v1744_v6 = vadd.f32 1.0, %v2528_v48  ;;  %v4658_v7 = vmul.f32 %v2063_v35, %v2059_v3  ;;  %v4660_v8 = vmul.f32 %v2064_v43, %v2059_v3  ;;  %v4662_v10 = vmul.f32 %v2065_v39, %v2059_v3 }
 0x1d6   : > { %v1949_v57 = vperm.slane %v4183_v2, 1  ;;  %v1950_v13 = vperm.slane %v4242_v62, 1  ;;  %v1951_v1 = vperm.slane %v4257_v59, 1  ;;  %v4670_v12 = vmul.f32 %v1947_v36, %v4624_v0 }
 0x1d7   : > { %5209 = vst [vmem:[#allocation17_spill] sm:$0xff] %v4660_v8  ;;  %v4675_v33 = vmul.f32 %v1744_v6, %v4418_v45  ;;  %v4678_v23 = vmul.f32 %v1948_v32, %v4624_v0  ;;  %v1824_v3 = vadd.f32 %v4297_v61, %v1805_v19  ;;  %v1825_v9 = vadd.f32 %v4300_v60, %v1806_v27 }
 0x1d8   : > { %5210 = vst [vmem:[#allocation18_spill] sm:$0xff] %v4662_v10  ;;  %v1826_v54 = vadd.f32 %v4429_v11, %v1807_v17  ;;  %v1827_v25 = vadd.f32 %v4432_v55, %v1808_v58  ;;  %v1828_v29 = vadd.f32 %v4439_v50, %v1809_v15  ;;  %v1833_v35 = vperm.slane %v4251_v53, 3 }
 0x1d9   : > { %v1834_v43 = vperm.slane %v4254_v49, 3  ;;  %v1835_v45 = vperm.slane %v4368_v22, 3  ;;  %v1836_v39 = vperm.slane %v4393_v20, 3  ;;  %v1837_v48 = vperm.slane %v4399_v26, 3 }
 0x1da   : > { %v1838_v19 = vmul.f32 %v1833_v35, %v4552_v42  ;;  %v2156_v61 = vperm.slane %v4519_v52, 4  ;;  %v2157_v60 = vperm.slane %v4533_v44, 4  ;;  %v2158_v11 = vperm.slane %v4581_v46, 4 }
 0x1db   : > { %v1839_v55 = vmul.f32 %v1834_v43, %v4552_v42  ;;  %v1840_v50 = vmul.f32 %v1835_v45, %v4552_v42  ;;  %v1841_v27 = vmul.f32 %v1836_v39, %v4552_v42  ;;  %v1842_v17 = vmul.f32 %v1837_v48, %v4552_v42 }
 0x1dc   : > { %v4699_v58 = vmul.f32 %v1949_v57, %v4624_v0  ;;  %v1843_v15 = vadd.f32 %v1838_v19, %v1824_v3  ;;  %v2159_v36 = vperm.slane %v4651_v21, 4  ;;  %v2160_v32 = vperm.slane %v4675_v33, 4 }
 0x1dd   : > { %v1844_v6 = vadd.f32 %v1839_v55, %v1825_v9  ;;  %v1845_v35 = vadd.f32 %v1840_v50, %v1826_v54  ;;  %v1846_v10 = vadd.f32 %v1841_v27, %v1827_v25  ;;  %v1847_v8 = vadd.f32 %v1842_v17, %v1828_v29  ;;  %v4718_v54 = vpop.permute.xlu1 %1982 }
 0x1de   : > { %v4704_v43 = vmul.f32 %v1950_v13, %v4624_v0  ;;  %v4707_v45 = vmul.f32 %v1951_v1, %v4624_v0  ;;  %v1862_v42 = vadd.f32 %v4539_v24, %v1843_v15  ;;  %v4710_v39 = vmul.f32 %v2156_v61, %v2154_v63  ;;  %v2040_v1 = vpop.permute.xlu2 %2039  ;;  %v2249_v61 = vpop.permute.xlu0 %2248 }
 0x1df   : > { %v1863_v57 = vadd.f32 %v4543_v40, %v1844_v6  ;;  %v1864_v3 = vadd.f32 %v4547_v30, %v1845_v35  ;;  %v4714_v48 = vmul.f32 %v2157_v60, %v2154_v63  ;;  %v4716_v9 = vmul.f32 %v2158_v11, %v2154_v63 }
 0x1e0   : > { %v4720_v25 = vmul.f32 %v2159_v36, %v2154_v63  ;;  %v2004_v13 = vperm.slane %v4027_v38, 4  ;;  %v2005_v0 = vperm.slane %v4034_v28, 4  ;;  %v2006_v24 = vperm.slane %v4183_v2, 4 }
 0x1e1   : > { %5211 = vst [vmem:[#allocation19_spill] sm:$0xff] %v4714_v48  ;;  %v1865_v29 = vadd.f32 %v4549_v51, %v1846_v10  ;;  %v1866_v40 = vadd.f32 %v4564_v5, %v1847_v8  ;;  %v4727_v30 = vmul.f32 %v2160_v32, %v2154_v63  ;;  %v2007_v19 = vperm.slane %v4242_v62, 4  ;;  %v5215_v32 = vld [vmem:[#allocation2_spill] sm:$0xff] }
 0x1e2   : > { %5212 = vst [vmem:[#allocation20_spill] sm:$0xff] %v4716_v9  ;;  %v2008_v60 = vperm.slane %v4257_v59, 4  ;;  %v4732_v11 = vmul.f32 %v2004_v13, %v4672_v14  ;;  %v1881_v55 = vadd.f32 %v4303_v56, %v1862_v42  ;;  %v1882_v50 = vadd.f32 %v4328_v18, %v1863_v57  ;;  %v5219_v13 = vld [vmem:[#allocation5_spill] sm:$0xff] }
 0x1e3   : > { %5213 = vst [vmem:[#allocation21_spill] sm:$0xff] %v4720_v25  ;;  %v4737_v27 = vmul.f32 %v2005_v0, %v4672_v14  ;;  %v4740_v51 = vmul.f32 %v2006_v24, %v4672_v14  ;;  %v4743_v5 = vmul.f32 %v2007_v19, %v4672_v14  ;;  %v1883_v8 = vadd.f32 %v4435_v47, %v1864_v3  ;;  %v5216_v47 = vld [vmem:[#allocation16_spill] sm:$0xff]  ;;  %v5220_v24 = vld [vmem:[#allocation6_spill] sm:$0xff] }
 0x1e4   : > { %5214 = vst [vmem:[#allocation22_spill] sm:$0xff] %v4727_v30  ;;  %v1890_v10 = vperm.slane %v4251_v53, 6  ;;  %v1891_v63 = vperm.slane %v4254_v49, 6  ;;  %v1892_v17 = vperm.slane %v4368_v22, 6  ;;  %v1893_v56 = vperm.slane %v4393_v20, 6  ;;  %v5217_v53 = vld [vmem:[#allocation4_spill] sm:$0xff] }
 0x1e5   : > { %v1884_v18 = vadd.f32 %v4442_v16, %v1865_v29  ;;  %v1885_v15 = vadd.f32 %v4445_v34, %v1866_v40  ;;  %v1894_v36 = vperm.slane %v4399_v26, 6  ;;  %v2251_v6 = vperm.slane %v5215_v32, 1  ;;  %v5218_v49 = vld [vmem:[#allocation13_spill] sm:$0xff]  ;;  %v4768_v30 = vpop.permute.xlu1 %2020 }
 0x1e6   : > { %v4755_v35 = vmul.f32 %v2008_v60, %v4672_v14  ;;  %v1895_v42 = vmul.f32 %v1890_v10, %v5216_v47  ;;  %v2252_v57 = vperm.slane %v5217_v53, 1  ;;  %v2253_v3 = vperm.slane %v5218_v49, 1 }
 0x1e7   : > { %v1896_v22 = vmul.f32 %v1891_v63, %v5216_v47  ;;  %v1897_v20 = vmul.f32 %v1892_v17, %v5216_v47  ;;  %v1898_v16 = vmul.f32 %v1893_v56, %v5216_v47  ;;  %v1899_v34 = vmul.f32 %v1894_v36, %v5216_v47  ;;  %v4775_v36 = vpop.permute.xlu2 %2096 }
 0x1e8   : > { %v1900_v26 = vadd.f32 %v1895_v42, %v1881_v55  ;;  %v2254_v0 = vperm.slane %v5219_v13, 1  ;;  %v2255_v14 = vperm.slane %v5220_v24, 1  ;;  %v4766_v29 = vmul.f32 %v2251_v6, %v2249_v61 }
 0x1e9   : > { %v1901_v40 = vadd.f32 %v1896_v22, %v1882_v50  ;;  %v1902_v19 = vadd.f32 %v1897_v20, %v1883_v8  ;;  %v1903_v60 = vadd.f32 %v1898_v16, %v1884_v18  ;;  %v1904_v10 = vadd.f32 %v1899_v34, %v1885_v15  ;;  %v2344_v50 = vpop.permute.xlu0 %2343 }
 0x1ea   : > { %5221 = vst [vmem:[#allocation2_spill] sm:$0xff] %v4766_v29  ;;  %v4770_v63 = vmul.f32 %v2252_v57, %v2249_v61  ;;  %v2042_v17 = vperm.slane %v4027_v38, 6  ;;  %v2043_v56 = vperm.slane %v4034_v28, 6  ;;  %v2044_v55 = vperm.slane %v4183_v2, 6 }
 0x1eb   : > { %v2045_v47 = vperm.slane %v4242_v62, 6  ;;  %v2046_v6 = vperm.slane %v4257_v59, 6  ;;  %v2346_v8 = vperm.slane %v5215_v32, 6  ;;  %v2347_v18 = vperm.slane %v5217_v53, 6 }
 0x1ec   : > { %5222 = vst [vmem:[#allocation16_spill] sm:$0xff] %v4770_v63  ;;  %v4781_v15 = vmul.f32 %v2253_v3, %v2249_v61  ;;  %v4783_v42 = vmul.f32 %v2254_v0, %v2249_v61  ;;  %v4785_v57 = vmul.f32 %v2255_v14, %v2249_v61  ;;  %v2348_v22 = vperm.slane %v5218_v49, 6 }
 0x1ed   : > { %v4788_v20 = vmul.f32 %v2042_v17, %v2040_v1  ;;  %v4790_v16 = vmul.f32 %v2043_v56, %v2040_v1  ;;  %v4792_v34 = vmul.f32 %v2044_v55, %v2040_v1  ;;  %v4794_v63 = vmul.f32 %v2045_v47, %v2040_v1  ;;  %v5229_v17 = vld [vmem:[#allocation12_spill] sm:$0xff]  ;;  %v5230_v56 = vld [vmem:[#allocation10_spill] sm:$0xff]  ;;  %v5232_v47 = vld [vmem:[#allocation15_spill] sm:$0xff] }
 0x1ee   : > { %5223 = vst [vmem:[#allocation4_spill] sm:$0xff] %v4781_v15  ;;  %v4796_v29 = vmul.f32 %v2046_v6, %v2040_v1  ;;  %v2349_v25 = vperm.slane %v5219_v13, 6  ;;  %v2350_v3 = vperm.slane %v5220_v24, 6  ;;  %v4800_v0 = vmul.f32 %v2346_v8, %v2344_v50  ;;  %v5231_v55 = vld [vmem:[#allocation14_spill] sm:$0xff] }
 0x1ef   : > { %5224 = vst [vmem:[#allocation13_spill] sm:$0xff] %v4783_v42  ;;  %v4802_v61 = vmul.f32 %v2347_v18, %v2344_v50  ;;  %v4804_v14 = vmul.f32 %v2348_v22, %v2344_v50  ;;  %v1920_v42 = vadd.f32 %v5230_v56, %v1901_v40  ;;  %v1921_v15 = vadd.f32 %v5231_v55, %v1902_v19  ;;  %v4825_v56 = vpop.permute.xlu1 %2077 }
 0x1f0   : > { %5225 = vst [vmem:[#allocation5_spill] sm:$0xff] %v4785_v57  ;;  %v1919_v57 = vadd.f32 %v5229_v17, %v1900_v26  ;;  %v1922_v9 = vadd.f32 %v5232_v47, %v1903_v60  ;;  %v1928_v1 = vperm.slane %v4027_v38, 0  ;;  %v1929_v6 = vperm.slane %v4034_v28, 0 }
 0x1f1   : > { %5226 = vst [vmem:[#allocation6_spill] sm:$0xff] %v4800_v0  ;;  %v1923_v48 = vadd.f32 %v4641_v4, %v1904_v10  ;;  %v1930_v8 = vperm.slane %v4183_v2, 0  ;;  %v1931_v18 = vperm.slane %v4242_v62, 0  ;;  %v1932_v22 = vperm.slane %v4257_v59, 0 }
 0x1f2   : > { %5227 = vst [vmem:[#allocation23_spill] sm:$0xff] %v4802_v61  ;;  %v1933_v26 = vmul.f32 %v1928_v1, %v4664_v41  ;;  %v1934_v40 = vmul.f32 %v1929_v6, %v4664_v41  ;;  %v2099_v19 = vperm.slane %v4519_v52, 1  ;;  %v2100_v10 = vperm.slane %v4533_v44, 1 }
 0x1f3   : > { %5228 = vst [vmem:[#allocation24_spill] sm:$0xff] %v4804_v14  ;;  %v4816_v14 = vmul.f32 %v2349_v25, %v2344_v50  ;;  %v1935_v60 = vmul.f32 %v1930_v8, %v4664_v41  ;;  %v1936_v17 = vmul.f32 %v1931_v18, %v4664_v41  ;;  %v1937_v4 = vmul.f32 %v1932_v22, %v4664_v41 }
 0x1f4   : > { %v4827_v55 = vmul.f32 %v2350_v3, %v2344_v50  ;;  %v1938_v25 = vadd.f32 %v1933_v26, %v1919_v57  ;;  %v1939_v47 = vadd.f32 %v1934_v40, %v1920_v42  ;;  %v2101_v1 = vperm.slane %v4581_v46, 1  ;;  %v5235_v26 = vld [vmem:[#allocation8_spill] sm:$0xff] }
 0x1f5   : > { %5233 = vst [vmem:[#allocation12_spill] sm:$0xff] %v4816_v14  ;;  %v4830_v14 = vpop.permute.xlu2 %2134  ;;  %v1940_v6 = vadd.f32 %v1935_v60, %v1921_v15  ;;  %v1941_v61 = vadd.f32 %v1936_v17, %v1922_v9  ;;  %v1942_v0 = vadd.f32 %v1937_v4, %v1923_v48  ;;  %v2102_v8 = vperm.slane %v4651_v21, 1  ;;  %v5234_v48 = vld [vmem:[#allocation7_spill] sm:$0xff] }
 0x1f6   : > { %v1957_v18 = vadd.f32 %v4670_v12, %v1938_v25  ;;  %v1958_v41 = vadd.f32 %v4678_v23, %v1939_v47  ;;  %v2103_v22 = vperm.slane %v4675_v33, 1  ;;  %v4837_v50 = vmul.f32 %v2099_v19, %v4775_v36  ;;  %v5236_v60 = vld [vmem:[#allocation3_spill] sm:$0xff] }
 0x1f7   : > { %v1959_v42 = vadd.f32 %v4699_v58, %v1940_v6  ;;  %v1960_v57 = vadd.f32 %v4704_v43, %v1941_v61  ;;  %v1961_v3 = vadd.f32 %v4707_v45, %v1942_v0  ;;  %v4843_v9 = vmul.f32 %v2100_v10, %v4775_v36  ;;  %v5237_v17 = vld [vmem:[#allocation11_spill] sm:$0xff]  ;;  %v5238_v58 = vld [vmem:[#allocation9_spill] sm:$0xff] }
 0x1f8   : > { %v1976_v15 = vadd.f32 %v5234_v48, %v1957_v18  ;;  %v1977_v12 = vadd.f32 %v5235_v26, %v1958_v41  ;;  %v1985_v23 = vperm.slane %v4027_v38, 3  ;;  %v1986_v40 = vperm.slane %v4034_v28, 3 }
 0x1f9   : > { %v1978_v19 = vadd.f32 %v5236_v60, %v1959_v42  ;;  %v1979_v4 = vadd.f32 %v5237_v17, %v1960_v57  ;;  %v1980_v25 = vadd.f32 %v5238_v58, %v1961_v3  ;;  %v1987_v43 = vperm.slane %v4183_v2, 3  ;;  %v4872_v60 = vpop.permute.xlu1 %2115 }
 0x1fa   : > { %v1988_v45 = vperm.slane %v4242_v62, 3  ;;  %v1989_v0 = vperm.slane %v4257_v59, 3  ;;  %v1990_v61 = vmul.f32 %v1985_v23, %v4718_v54  ;;  %v1991_v10 = vmul.f32 %v1986_v40, %v4718_v54 }
 0x1fb   : > { %v4858_v47 = vmul.f32 %v2101_v1, %v4775_v36  ;;  %v1992_v6 = vmul.f32 %v1987_v43, %v4718_v54  ;;  %v2137_v18 = vperm.slane %v4519_v52, 3  ;;  %v2138_v41 = vperm.slane %v4533_v44, 3 }
 0x1fc   : > { %v1993_v42 = vmul.f32 %v1988_v45, %v4718_v54  ;;  %v1994_v57 = vmul.f32 %v1989_v0, %v4718_v54  ;;  %v1995_v3 = vadd.f32 %v1990_v61, %v1976_v15  ;;  %v1996_v48 = vadd.f32 %v1991_v10, %v1977_v12 }
 0x1fd   : > { %v4866_v26 = vmul.f32 %v2102_v8, %v4775_v36  ;;  %v4869_v23 = vmul.f32 %v2103_v22, %v4775_v36  ;;  %v1997_v1 = vadd.f32 %v1992_v6, %v1978_v19  ;;  %v2139_v40 = vperm.slane %v4581_v46, 3  ;;  %v2192_v54 = vpop.permute.xlu2 %2191 }
 0x1fe   : > { %v1998_v17 = vadd.f32 %v1993_v42, %v1979_v4  ;;  %v1999_v58 = vadd.f32 %v1994_v57, %v1980_v25  ;;  %v2140_v43 = vperm.slane %v4651_v21, 3  ;;  %v2141_v45 = vperm.slane %v4675_v33, 3 }
 0x1ff   : > { %v4877_v15 = vmul.f32 %v2137_v18, %v4830_v14  ;;  %v4880_v8 = vmul.f32 %v2138_v41, %v4830_v14  ;;  %v2014_v36 = vadd.f32 %v4732_v11, %v1995_v3  ;;  %v2015_v22 = vadd.f32 %v4737_v27, %v1996_v48 }
 0x200   : > { %v2016_v12 = vadd.f32 %v4740_v51, %v1997_v1  ;;  %v2017_v19 = vadd.f32 %v4743_v5, %v1998_v17  ;;  %v2018_v4 = vadd.f32 %v4755_v35, %v1999_v58  ;;  %v2023_v25 = vperm.slane %v4027_v38, 5 }
 0x201   : > { %v2024_v0 = vperm.slane %v4034_v28, 5  ;;  %v2025_v61 = vperm.slane %v4183_v2, 5  ;;  %v2026_v10 = vperm.slane %v4242_v62, 5  ;;  %v2027_v6 = vperm.slane %v4257_v59, 5 }
 0x202   : > { %v4893_v11 = vmul.f32 %v2139_v40, %v4830_v14  ;;  %v4896_v27 = vmul.f32 %v2140_v43, %v4830_v14  ;;  %v2028_v51 = vmul.f32 %v2023_v25, %v4768_v30  ;;  %v2194_v5 = vperm.slane %v4519_v52, 6 }
 0x203   : > { %v2029_v38 = vmul.f32 %v2024_v0, %v4768_v30  ;;  %v2030_v28 = vmul.f32 %v2025_v61, %v4768_v30  ;;  %v2031_v2 = vmul.f32 %v2026_v10, %v4768_v30  ;;  %v2032_v62 = vmul.f32 %v2027_v6, %v4768_v30 }
 0x204   : > { %v4905_v59 = vmul.f32 %v2141_v45, %v4830_v14  ;;  %v2033_v35 = vadd.f32 %v2028_v51, %v2014_v36  ;;  %v2195_v18 = vperm.slane %v4533_v44, 6  ;;  %v2196_v41 = vperm.slane %v4581_v46, 6  ;;  %v4918_v36 = vpop.permute.xlu1 %2172 }
 0x205   : > { %v2034_v42 = vadd.f32 %v2029_v38, %v2015_v22  ;;  %v2035_v57 = vadd.f32 %v2030_v28, %v2016_v12  ;;  %v2036_v3 = vadd.f32 %v2031_v2, %v2017_v19  ;;  %v2037_v48 = vadd.f32 %v2032_v62, %v2018_v4  ;;  %v2230_v4 = vpop.permute.xlu2 %2229 }
 0x206   : > { %v2052_v1 = vadd.f32 %v4788_v20, %v2033_v35  ;;  %v2197_v40 = vperm.slane %v4651_v21, 6  ;;  %v2198_v17 = vperm.slane %v4675_v33, 6  ;;  %v4912_v58 = vmul.f32 %v2194_v5, %v2192_v54 }
 0x207   : > { %v2053_v30 = vadd.f32 %v4790_v16, %v2034_v42  ;;  %v2054_v14 = vadd.f32 %v4792_v34, %v2035_v57  ;;  %v2055_v43 = vadd.f32 %v4794_v63, %v2036_v3  ;;  %v2056_v45 = vadd.f32 %v4796_v29, %v2037_v48  ;;  %v5239_v34 = vld [vmem:[#allocation17_spill] sm:$0xff]  ;;  %v5240_v63 = vld [vmem:[#allocation18_spill] sm:$0xff] }
 0x208   : > { %v4920_v22 = vmul.f32 %v2195_v18, %v2192_v54  ;;  %v2071_v20 = vadd.f32 %v4653_v37, %v2052_v1  ;;  %v2080_v12 = vperm.slane %v4519_v52, 0  ;;  %v2081_v19 = vperm.slane %v4533_v44, 0 }
 0x209   : > { %v2072_v25 = vadd.f32 %v4655_v31, %v2053_v30  ;;  %v2073_v16 = vadd.f32 %v4658_v7, %v2054_v14  ;;  %v2074_v0 = vadd.f32 %v5239_v34, %v2055_v43  ;;  %v2075_v61 = vadd.f32 %v5240_v63, %v2056_v45 }
 0x20a   : > { %v2082_v29 = vperm.slane %v4581_v46, 0  ;;  %v2083_v10 = vperm.slane %v4651_v21, 0  ;;  %v2084_v6 = vperm.slane %v4675_v33, 0  ;;  %v2085_v37 = vmul.f32 %v2080_v12, %v4825_v56 }
 0x20b   : > { %v4933_v51 = vmul.f32 %v2196_v41, %v2192_v54  ;;  %v4935_v5 = vmul.f32 %v2197_v40, %v2192_v54  ;;  %v4937_v38 = vmul.f32 %v2198_v17, %v2192_v54  ;;  %v2086_v31 = vmul.f32 %v2081_v19, %v4825_v56 }
 0x20c   : > { %v2087_v7 = vmul.f32 %v2082_v29, %v4825_v56  ;;  %v2088_v28 = vmul.f32 %v2083_v10, %v4825_v56  ;;  %v2089_v2 = vmul.f32 %v2084_v6, %v4825_v56  ;;  %v2090_v62 = vadd.f32 %v2085_v37, %v2071_v20 }
 0x20d   : > { %v2091_v35 = vadd.f32 %v2086_v31, %v2072_v25  ;;  %v2232_v18 = vperm.slane %v5215_v32, 0  ;;  %v2233_v42 = vperm.slane %v5217_v53, 0  ;;  %v2234_v41 = vperm.slane %v5218_v49, 0 }
 0x20e   : > { %v2092_v57 = vadd.f32 %v2087_v7, %v2073_v16  ;;  %v2093_v3 = vadd.f32 %v2088_v28, %v2074_v0  ;;  %v2094_v54 = vadd.f32 %v2089_v2, %v2075_v61  ;;  %v2235_v48 = vperm.slane %v5219_v13, 0  ;;  %v4961_v16 = vpop.permute.xlu1 %2210 }
 0x20f   : > { %v2236_v1 = vperm.slane %v5220_v24, 0  ;;  %v4948_v40 = vmul.f32 %v2232_v18, %v2230_v4  ;;  %v4950_v17 = vmul.f32 %v2233_v42, %v2230_v4  ;;  %v2109_v56 = vadd.f32 %v4837_v50, %v2090_v62 }
 0x210   : > { %v2110_v30 = vadd.f32 %v4843_v9, %v2091_v35  ;;  %v2111_v14 = vadd.f32 %v4858_v47, %v2092_v57  ;;  %v2112_v43 = vadd.f32 %v4866_v26, %v2093_v3  ;;  %v2113_v45 = vadd.f32 %v4869_v23, %v2094_v54  ;;  %v2287_v26 = vpop.permute.xlu2 %2286 }
 0x211   : > { %v2118_v20 = vperm.slane %v4519_v52, 2  ;;  %v2119_v12 = vperm.slane %v4533_v44, 2  ;;  %v2120_v19 = vperm.slane %v4581_v46, 2  ;;  %v2121_v25 = vperm.slane %v4651_v21, 2 }
 0x212   : > { %v4963_v34 = vmul.f32 %v2234_v41, %v2230_v4  ;;  %v4965_v50 = vmul.f32 %v2235_v48, %v2230_v4  ;;  %v4967_v9 = vmul.f32 %v2236_v1, %v2230_v4  ;;  %v2122_v47 = vperm.slane %v4675_v33, 2 }
 0x213   : > { %v2123_v23 = vmul.f32 %v2118_v20, %v4872_v60  ;;  %v2124_v0 = vmul.f32 %v2119_v12, %v4872_v60  ;;  %v2125_v63 = vmul.f32 %v2120_v19, %v4872_v60  ;;  %v2126_v61 = vmul.f32 %v2121_v25, %v4872_v60  ;;  %v5244_v20 = vld [vmem:[#allocation22_spill] sm:$0xff] }
 0x214   : > { %v2127_v29 = vmul.f32 %v2122_v47, %v4872_v60  ;;  %v2289_v10 = vperm.slane %v5215_v32, 3  ;;  %v2290_v6 = vperm.slane %v5217_v53, 3  ;;  %v2291_v4 = vperm.slane %v5218_v49, 3 }
 0x215   : > { %v2128_v37 = vadd.f32 %v2123_v23, %v2109_v56  ;;  %v2129_v31 = vadd.f32 %v2124_v0, %v2110_v30  ;;  %v2130_v7 = vadd.f32 %v2125_v63, %v2111_v14  ;;  %v2131_v28 = vadd.f32 %v2126_v61, %v2112_v43  ;;  %v5241_v30 = vld [vmem:[#allocation19_spill] sm:$0xff]  ;;  %v5242_v43 = vld [vmem:[#allocation20_spill] sm:$0xff] }
 0x216   : > { %v2132_v2 = vadd.f32 %v2127_v29, %v2113_v45  ;;  %v2292_v62 = vperm.slane %v5219_v13, 3  ;;  %v2293_v35 = vperm.slane %v5220_v24, 3  ;;  %v4980_v18 = vmul.f32 %v2289_v10, %v2287_v26  ;;  %v5243_v45 = vld [vmem:[#allocation21_spill] sm:$0xff]  ;;  %v2268_v23 = vpop.permute.xlu1 %2267 }
 0x217   : > { %v2147_v42 = vadd.f32 %v4877_v15, %v2128_v37  ;;  %v2148_v60 = vadd.f32 %v4880_v8, %v2129_v31  ;;  %v2149_v41 = vadd.f32 %v4893_v11, %v2130_v7  ;;  %v2150_v57 = vadd.f32 %v4896_v27, %v2131_v28 }
 0x218   : > { %v2151_v3 = vadd.f32 %v4905_v59, %v2132_v2  ;;  %v4987_v54 = vmul.f32 %v2290_v6, %v2287_v26  ;;  %v2175_v48 = vperm.slane %v4519_v52, 5  ;;  %v2176_v1 = vperm.slane %v4533_v44, 5  ;;  %v5010_v10 = vpop.permute.xlu2 %2324 }
 0x219   : > { %v2166_v56 = vadd.f32 %v4710_v39, %v2147_v42  ;;  %v2167_v14 = vadd.f32 %v5241_v30, %v2148_v60  ;;  %v2168_v15 = vadd.f32 %v5242_v43, %v2149_v41  ;;  %v2169_v8 = vadd.f32 %v5243_v45, %v2150_v57 }
 0x21a   : > { %v2170_v11 = vadd.f32 %v5244_v20, %v2151_v3  ;;  %v2177_v27 = vperm.slane %v4581_v46, 5  ;;  %v2178_v59 = vperm.slane %v4651_v21, 5  ;;  %v2179_v12 = vperm.slane %v4675_v33, 5 }
 0x21b   : > { %v4999_v19 = vmul.f32 %v2291_v4, %v2287_v26  ;;  %v5001_v25 = vmul.f32 %v2292_v62, %v2287_v26  ;;  %v2180_v39 = vmul.f32 %v2175_v48, %v4918_v36  ;;  %v2181_v47 = vmul.f32 %v2176_v1, %v4918_v36 }
 0x21c   : > { %v5005_v0 = vmul.f32 %v2293_v35, %v2287_v26  ;;  %v2182_v63 = vmul.f32 %v2177_v27, %v4918_v36  ;;  %v2183_v61 = vmul.f32 %v2178_v59, %v4918_v36  ;;  %v2184_v29 = vmul.f32 %v2179_v12, %v4918_v36 }
 0x21d   : > { %v2185_v6 = vadd.f32 %v2180_v39, %v2166_v56  ;;  %v2186_v4 = vadd.f32 %v2181_v47, %v2167_v14  ;;  %v2327_v37 = vperm.slane %v5215_v32, 5  ;;  %v2328_v31 = vperm.slane %v5217_v53, 5 }
 0x21e   : > { %v2187_v7 = vadd.f32 %v2182_v63, %v2168_v15  ;;  %v2188_v28 = vadd.f32 %v2183_v61, %v2169_v8  ;;  %v2189_v2 = vadd.f32 %v2184_v29, %v2170_v11  ;;  %v2329_v26 = vperm.slane %v5218_v49, 5  ;;  %v2306_v11 = vpop.permute.xlu1 %2305 }
 0x21f   : > { %v2330_v62 = vperm.slane %v5219_v13, 5  ;;  %v2331_v35 = vperm.slane %v5220_v24, 5  ;;  %v5018_v42 = vmul.f32 %v2327_v37, %v5010_v10  ;;  %v5021_v36 = vmul.f32 %v2328_v31, %v5010_v10  ;;  %v5245_v31 = vld [vmem:[#allocation2_spill] sm:$0xff] }
 0x220   : > { %v2204_v60 = vadd.f32 %v4912_v58, %v2185_v6  ;;  %v2205_v41 = vadd.f32 %v4920_v22, %v2186_v4  ;;  %v2206_v57 = vadd.f32 %v4933_v51, %v2187_v7  ;;  %v2207_v3 = vadd.f32 %v4935_v5, %v2188_v28  ;;  %v5246_v28 = vld [vmem:[#allocation16_spill] sm:$0xff] }
 0x221   : > { %v2208_v48 = vadd.f32 %v4937_v38, %v2189_v2  ;;  %v2213_v1 = vperm.slane %v4519_v52, 7  ;;  %v2214_v56 = vperm.slane %v4533_v44, 7  ;;  %v2215_v30 = vperm.slane %v4581_v46, 7 }
 0x222   : > { %v2216_v14 = vperm.slane %v4651_v21, 7  ;;  %v2217_v43 = vperm.slane %v4675_v33, 7  ;;  %v2270_v58 = vperm.slane %v5215_v32, 2  ;;  %v2271_v22 = vperm.slane %v5217_v53, 2 }
 0x223   : > { %v2218_v51 = vmul.f32 %v2213_v1, %v4961_v16  ;;  %v2219_v5 = vmul.f32 %v2214_v56, %v4961_v16  ;;  %v2220_v38 = vmul.f32 %v2215_v30, %v4961_v16  ;;  %v2272_v52 = vperm.slane %v5218_v49, 2 }
 0x224   : > { %v2221_v44 = vmul.f32 %v2216_v14, %v4961_v16  ;;  %v2222_v46 = vmul.f32 %v2217_v43, %v4961_v16  ;;  %v2273_v21 = vperm.slane %v5219_v13, 2  ;;  %v2274_v33 = vperm.slane %v5220_v24, 2 }
 0x225   : > { %v2223_v15 = vadd.f32 %v2218_v51, %v2204_v60  ;;  %v2224_v45 = vadd.f32 %v2219_v5, %v2205_v41  ;;  %v2225_v8 = vadd.f32 %v2220_v38, %v2206_v57  ;;  %v2275_v20 = vmul.f32 %v2270_v58, %v2268_v23  ;;  %v5247_v60 = vld [vmem:[#allocation4_spill] sm:$0xff]  ;;  %v5248_v57 = vld [vmem:[#allocation13_spill] sm:$0xff] }
 0x226   : > { %v2226_v27 = vadd.f32 %v2221_v44, %v2207_v3  ;;  %v2227_v59 = vadd.f32 %v2222_v46, %v2208_v48  ;;  %v2276_v12 = vmul.f32 %v2271_v22, %v2268_v23  ;;  %v2277_v39 = vmul.f32 %v2272_v52, %v2268_v23  ;;  %v5249_v3 = vld [vmem:[#allocation5_spill] sm:$0xff] }
 0x227   : > { %v2242_v47 = vadd.f32 %v4948_v40, %v2223_v15  ;;  %v2243_v63 = vadd.f32 %v4950_v17, %v2224_v45  ;;  %v2244_v61 = vadd.f32 %v4963_v34, %v2225_v8  ;;  %v2278_v16 = vmul.f32 %v2273_v21, %v2268_v23 }
 0x228   : > { %v2245_v29 = vadd.f32 %v4965_v50, %v2226_v27  ;;  %v2246_v6 = vadd.f32 %v4967_v9, %v2227_v59  ;;  %v2279_v4 = vmul.f32 %v2274_v33, %v2268_v23  ;;  %v2308_v37 = vperm.slane %v5215_v32, 4 }
 0x229   : > { %v2261_v7 = vadd.f32 %v5245_v31, %v2242_v47  ;;  %v2262_v2 = vadd.f32 %v5246_v28, %v2243_v63  ;;  %v2263_v41 = vadd.f32 %v5247_v60, %v2244_v61  ;;  %v2309_v40 = vperm.slane %v5217_v53, 4 }
 0x22a   : > { %v2264_v17 = vadd.f32 %v5248_v57, %v2245_v29  ;;  %v2265_v34 = vadd.f32 %v5249_v3, %v2246_v6  ;;  %v2310_v48 = vperm.slane %v5218_v49, 4  ;;  %v2311_v50 = vperm.slane %v5219_v13, 4  ;;  %v5250_v6 = vld [vmem:[#allocation6_spill] sm:$0xff] }
 0x22b   : > { %v2280_v9 = vadd.f32 %v2275_v20, %v2261_v7  ;;  %v2281_v23 = vadd.f32 %v2276_v12, %v2262_v2  ;;  %v2282_v1 = vadd.f32 %v2277_v39, %v2263_v41  ;;  %v2312_v56 = vperm.slane %v5220_v24, 4  ;;  %v2363_v20 = vpop.permute.xlu1 %2362 }
 0x22c   : > { %v2283_v30 = vadd.f32 %v2278_v16, %v2264_v17  ;;  %v2284_v14 = vadd.f32 %v2279_v4, %v2265_v34  ;;  %v2313_v43 = vmul.f32 %v2308_v37, %v2306_v11  ;;  %v2314_v58 = vmul.f32 %v2309_v40, %v2306_v11  ;;  %v5253_v37 = vld [vmem:[#allocation12_spill] sm:$0xff] }
 0x22d   : > { %v2299_v22 = vadd.f32 %v4980_v18, %v2280_v9  ;;  %v2300_v51 = vadd.f32 %v4987_v54, %v2281_v23  ;;  %v2301_v5 = vadd.f32 %v4999_v19, %v2282_v1  ;;  %v2315_v38 = vmul.f32 %v2310_v48, %v2306_v11 }
 0x22e   : > { %v2302_v52 = vadd.f32 %v5001_v25, %v2283_v30  ;;  %v2303_v44 = vadd.f32 %v5005_v0, %v2284_v14  ;;  %v2316_v46 = vmul.f32 %v2311_v50, %v2306_v11  ;;  %v2317_v21 = vmul.f32 %v2312_v56, %v2306_v11 }
 0x22f   : > { %v2334_v33 = vmul.f32 %v2329_v26, %v5010_v10  ;;  %v2318_v15 = vadd.f32 %v2313_v43, %v2299_v22  ;;  %v2319_v45 = vadd.f32 %v2314_v58, %v2300_v51  ;;  %v2320_v8 = vadd.f32 %v2315_v38, %v2301_v5 }
 0x230   : > { %v2321_v18 = vadd.f32 %v2316_v46, %v2302_v52  ;;  %v2322_v27 = vadd.f32 %v2317_v21, %v2303_v44  ;;  %v2365_v54 = vperm.slane %v5215_v32, 7  ;;  %v2366_v19 = vperm.slane %v5217_v53, 7 }
 0x231   : > { %v2335_v25 = vmul.f32 %v2330_v62, %v5010_v10  ;;  %v2336_v0 = vmul.f32 %v2331_v35, %v5010_v10  ;;  %v2367_v26 = vperm.slane %v5218_v49, 7  ;;  %v2368_v11 = vperm.slane %v5219_v13, 7  ;;  %v5251_v49 = vld [vmem:[#allocation23_spill] sm:$0xff]  ;;  %v5252_v13 = vld [vmem:[#allocation24_spill] sm:$0xff] }
 0x232   : > { %v2369_v59 = vperm.slane %v5220_v24, 7  ;;  %v2370_v12 = vmul.f32 %v2365_v54, %v2363_v20  ;;  %v2371_v39 = vmul.f32 %v2366_v19, %v2363_v20  ;;  %v2337_v32 = vadd.f32 %v5018_v42, %v2318_v15  ;;  %v2384_v24 = vpop.permute.xlu2 %2383 }
 0x233   : > { %v2372_v53 = vmul.f32 %v2367_v26, %v2363_v20  ;;  %v2373_v47 = vmul.f32 %v2368_v11, %v2363_v20  ;;  %v2338_v63 = vadd.f32 %v5021_v36, %v2319_v45  ;;  %v2339_v62 = vadd.f32 %v2334_v33, %v2320_v8 }
 0x234   : > { %v2374_v61 = vmul.f32 %v2369_v59, %v2363_v20  ;;  %v2340_v16 = vadd.f32 %v2335_v25, %v2321_v18  ;;  %v2341_v29 = vadd.f32 %v2336_v0, %v2322_v27  ;;  %v2356_v10 = vadd.f32 %v5250_v6, %v2337_v32 }
 0x235   : > { %v2357_v35 = vadd.f32 %v5251_v49, %v2338_v63  ;;  %v2358_v4 = vadd.f32 %v5252_v13, %v2339_v62  ;;  %vm2404_vm1 = vcmask 920576   ;;  %vm2397_vm2 = vcmask 1043456  }
 0x236   : > { %v2359_v31 = vadd.f32 %v5253_v37, %v2340_v16  ;;  %v2360_v42 = vadd.f32 %v4827_v55, %v2341_v29  ;;  %v2375_v7 = vadd.f32 %v2370_v12, %v2356_v10 }
 0x237   : > { %v2376_v28 = vadd.f32 %v2371_v39, %v2357_v35  ;;  %v2377_v2 = vadd.f32 %v2372_v53, %v2358_v4 }
 0x238   : > { %v2378_v36 = vadd.f32 %v2373_v47, %v2359_v31  ;;  %v2379_v60 = vadd.f32 %v2374_v61, %v2360_v42  ;;  %v2386_v17 = vadd.f32 %v2384_v24, %v2375_v7 }
 0x239   : > { %v2387_v41 = vadd.f32 %v2384_v24, %v2376_v28  ;;  %v2388_v34 = vadd.f32 %v2384_v24, %v2377_v2 }
 0x23a   : > { %v2389_v40 = vadd.f32 %v2384_v24, %v2378_v36  ;;  %v2390_v57 = vadd.f32 %v2384_v24, %v2379_v60 }
 0x23b   : > { %v2395_v3 = vrot.slane %v2387_v41, 4 }
 0x23c   : > { %v2396_v48 = vrot.slane %v2389_v40, 4  ;;  %2405 = vst.msk [vmem:[%s262_s30 + $0x10] sm:$0xf] %vm2404_vm1, %v2390_v57 }
 0x23d   : > { %v2398_v55 = vsel %vm2397_vm2, %v2386_v17, %v2395_v3 }
 0x23e   : > { %v2399_v50 = vsel %vm2397_vm2, %v2388_v34, %v2396_v48  ;;  %2402 = vst [vmem:[%s262_s30] sm:$0xff] %v2398_v55 }
 0x23f   : > { %2403 = vst [vmem:[%s262_s30 + $0x8] sm:$0xff] %v2399_v50 }
 0x240 PF: > { %s15_s20 = sadd.s32 1, %s2718_s20   ;;  %s5254_s18 = smov %s2714_s19 }
 0x241   : > { %p12_p5 = scmp.ge.s32.totalorder %s15_s20, 4   ;;  %s5255_s19 = smov %s5257_s21 }
 0x243   :  { %14 = sbr.rel (!%p12_p5) target bundleno = 2 (0x2), region = 77 }

</bundles_post_ra>
